<compile_context>
chip_gen: v7x
topology: tpu7x:2x2x1
jax: 0.10.0
libtpu: 0.0.40
codegen_flags: <defaults>
</compile_context>

<pallas_src>
import functools

import jax
import jax.numpy as jnp
import numpy as np
from jax import lax
from jax.experimental import pallas as pl
from jax.experimental.pallas import tpu as pltpu


_MIB = 1024 * 1024

# Below this many elements the fixed pallas_call launch/step (~0.35 us) overhead
# dominates; let XLA fuse the tiny op instead.
_MIN_PALLAS_ELEMS = 128 * 128

# Set to jax.lax.Precision.HIGHEST for bit-close parity with true-f32 PyTorch
# matmul on the outer path (costs extra MXU passes); default matches XLA's
# default TPU matmul behavior.
_OUTER_PRECISION = None


# ----------------------------- small helpers --------------------------------

def _round_up(a, b):
    return -(-a // b) * b


def _min_sublane(dtype):
    # Sub-32-bit dtypes pack along sublanes: min row tile is 8 for 4-byte,
    # 16 for 2-byte, 32 for 1-byte elements.
    return max(8, 32 // jnp.dtype(dtype).itemsize)


@functools.lru_cache(maxsize=None)
def _vmem_limit_bytes():
    """Generation-aware scoped-VMEM request: half of physical VMEM."""
    phys = 64 * _MIB                      # conservative fallback (v7x physical)
    try:
        phys = int(pltpu.get_tpu_info().vmem_capacity_bytes)
    except Exception:
        pass
    return max(16 * _MIB, phys // 2)      # v5e/v6e -> 64 MiB, v7x -> 32 MiB


def _make_spec(block_shape, index_map, buffers):
    """BlockSpec with optional deeper multi-buffering (guarded for API drift)."""
    if buffers > 2 and hasattr(pl, "Buffered"):
        try:
            return pl.BlockSpec(block_shape, index_map,
                                pipeline_mode=pl.Buffered(buffers))
        except TypeError:
            pass
    return pl.BlockSpec(block_shape, index_map)


def _k_keep_mask(k, d_total, tk):
    # True for lanes that hold real feature columns in this K block; only the
    # last (partial) block has any False lanes.
    valid = d_total - k * tk
    col = lax.broadcasted_iota(jnp.int32, (1, tk), 1)
    return col < valid


# ----------------------------- outer kernels ---------------------------------

def _outer_kernel_inplace(x_ref, y_ref, o_ref, *, d_total, tk, mask_k, precision):
    # f32 output: accumulate directly into the VMEM-resident output block (its
    # index_map ignores k), saving a (tm, tn) scratch and one tile copy.
    k = pl.program_id(2)

    @pl.when(k == 0)
    def _():
        o_ref[...] = jnp.zeros_like(o_ref)

    xb = x_ref[...]
    yb = y_ref[...]
    if mask_k:
        keep = _k_keep_mask(k, d_total, tk)
        xb = jnp.where(keep, xb, jnp.zeros_like(xb))
        yb = jnp.where(keep, yb, jnp.zeros_like(yb))

    # x @ y.T (both operands K-minor). Modern Mosaic handles this layout on the
    # MXU without an explicit transpose; if a bundle dump ever shows per-tile
    # vxpose on y, pre-transpose y in the wrapper and feed (tk, tn) instead.
    o_ref[...] += lax.dot_general(
        xb, yb, dimension_numbers=(((1,), (1,)), ((), ())),
        preferred_element_type=jnp.float32, precision=precision)


def _outer_kernel_scratch(x_ref, y_ref, o_ref, acc_ref, *, d_total, tk, mask_k,
                          precision):
    # Sub-f32 output: f32 scratch accumulator, cast once on the last K step.
    k = pl.program_id(2)

    @pl.when(k == 0)
    def _():
        acc_ref[...] = jnp.zeros_like(acc_ref)

    xb = x_ref[...]
    yb = y_ref[...]
    if mask_k:
        keep = _k_keep_mask(k, d_total, tk)
        xb = jnp.where(keep, xb, jnp.zeros_like(xb))
        yb = jnp.where(keep, yb, jnp.zeros_like(yb))

    acc_ref[...] += lax.dot_general(
        xb, yb, dimension_numbers=(((1,), (1,)), ((), ())),
        preferred_element_type=jnp.float32, precision=precision)

    @pl.when(k == pl.num_programs(2) - 1)
    def _():
        o_ref[...] = acc_ref[...].astype(o_ref.dtype)


# ----------------------------- inner kernels ---------------------------------

def _inner_kernel_fulld(x_ref, y_ref, o_ref):
    # x_ref, y_ref: (tr, D) full-feature blocks; o_ref: (1, tr) lane-dense slab.
    # Per-row sums land on the lane axis via an MXU ones-reduction; HIGHEST
    # precision keeps the sum f32-accurate and is free on this HBM-bound path.
    prod = x_ref[...].astype(jnp.float32) * y_ref[...].astype(jnp.float32)
    ones = jnp.ones((8, prod.shape[1]), jnp.float32)
    sums = lax.dot_general(
        ones, prod, dimension_numbers=(((1,), (1,)), ((), ())),
        preferred_element_type=jnp.float32, precision=lax.Precision.HIGHEST)
    o_ref[...] = sums[0:1, :].astype(o_ref.dtype)


def _inner_kernel_ktiled(x_ref, y_ref, o_ref, acc_ref, *, d_total, tk, mask_k):
    # Fallback for very large D: (tr, tk) blocks, (8, tr) f32 accumulator.
    k = pl.program_id(1)

    @pl.when(k == 0)
    def _():
        acc_ref[...] = jnp.zeros_like(acc_ref)

    prod = x_ref[...].astype(jnp.float32) * y_ref[...].astype(jnp.float32)
    if mask_k:
        prod = jnp.where(_k_keep_mask(k, d_total, tk), prod, 0.0)
    ones = jnp.ones((8, tk), jnp.float32)
    acc_ref[...] += lax.dot_general(
        ones, prod, dimension_numbers=(((1,), (1,)), ((), ())),
        preferred_element_type=jnp.float32, precision=lax.Precision.HIGHEST)

    @pl.when(k == pl.num_programs(1) - 1)
    def _():
        o_ref[...] = acc_ref[0:1, :].astype(o_ref.dtype)


# ----------------------------- pallas wrappers -------------------------------

def _outer_pallas(x, y):
    N, D = x.shape
    M, _ = y.shape
    out_dtype = jnp.result_type(x.dtype, y.dtype)
    if x.dtype != out_dtype:
        x = x.astype(out_dtype)
    if y.dtype != out_dtype:
        y = y.astype(out_dtype)
    itemsize = jnp.dtype(out_dtype).itemsize
    min_sub = _min_sublane(out_dtype)
    vmem_limit = _vmem_limit_bytes()

    # Preferred tiles: 512x512 output tile, K panel sized to the generation's
    # VMEM (double-buffered working set ~11 MiB at tk=1024, ~19 MiB at tk=2048).
    TM = TN = 512
    TK = 2048 if vmem_limit >= 64 * _MIB else 1024

    # Full-dim blocks for small dims (always legal -> no wrapper padding);
    # aligned tiles + partial last blocks for large dims. Garbage rows/cols in
    # partial blocks only reach write-masked output positions; the K overhang
    # is zero-masked in-kernel.
    tm = TM if N > TM else N
    tn = TN if M > TN else M
    tk = TK if D > TK else D

    # Megacore: expose >= 2 blocks on the parallel axes so both TensorCores of
    # a v7x chip get work.
    if pl.cdiv(N, tm) * pl.cdiv(M, tn) < 2:
        if N > min_sub:
            tm = _round_up(pl.cdiv(N, 2), min_sub)
        elif M > 128:
            tn = _round_up(pl.cdiv(M, 2), 128)

    mask_k = (D % tk) != 0
    statics = dict(d_total=D, tk=tk, mask_k=mask_k, precision=_OUTER_PRECISION)
    if out_dtype == jnp.float32:
        kernel = functools.partial(_outer_kernel_inplace, **statics)
        scratch = []
    else:
        kernel = functools.partial(_outer_kernel_scratch, **statics)
        scratch = [pltpu.VMEM((tm, tn), jnp.float32)]

    return pl.pallas_call(
        kernel,
        out_shape=jax.ShapeDtypeStruct((N, M), out_dtype),
        grid=(pl.cdiv(N, tm), pl.cdiv(M, tn), pl.cdiv(D, tk)),  # reduction last
        in_specs=[
            pl.BlockSpec((tm, tk), lambda i, j, k: (i, k)),
            pl.BlockSpec((tn, tk), lambda i, j, k: (j, k)),
        ],
        out_specs=pl.BlockSpec((tm, tn), lambda i, j, k: (i, j)),
        scratch_shapes=scratch,
        compiler_params=pltpu.CompilerParams(
            dimension_semantics=("parallel", "parallel", "arbitrary"),
            vmem_limit_bytes=vmem_limit,
        ),
        cost_estimate=pl.CostEstimate(
            flops=2 * N * M * D,
            transcendentals=0,
            bytes_accessed=itemsize * (N * D + M * D) + itemsize * N * M,
        ),
    )(x, y)


def _inner_pallas(x, y):
    N, D = x.shape
    out_dtype = jnp.result_type(x.dtype, y.dtype)
    if x.dtype != out_dtype:
        x = x.astype(out_dtype)
    if y.dtype != out_dtype:
        y = y.astype(out_dtype)
    itemsize = jnp.dtype(out_dtype).itemsize
    vmem_limit = _vmem_limit_bytes()
    # Headroom for output slab, accumulator, ones constant, compiler scratch.
    stream_budget = int(vmem_limit * 0.6)

    cost = pl.CostEstimate(flops=2 * N * D, transcendentals=0,
                           bytes_accessed=2 * N * D * itemsize + N * itemsize)

    # Row tile: rows land on the output lane axis, so tr must be a 128-multiple
    # unless it covers all of N. Keep >= 2 row blocks when N > 128 so both v7x
    # TensorCores get work.
    row_cands = [N] if N <= 128 else [t for t in (1024, 512, 256, 128) if t < N]

    # Plan A: contract the FULL feature dim in one step -> no reduction grid
    # axis, no accumulator read-modify-write, purely parallel grid.
    tr_full = next((t for t in row_cands
                    if 2 * 2 * t * D * itemsize <= stream_budget), None)

    if tr_full is not None:
        tr = tr_full
        rows = pl.cdiv(N, tr)
        # Deeper input buffering on long streaming grids if VMEM allows (hides
        # DMA issue latency on high-bandwidth chips, esp. v7x).
        nbuf = 3 if (rows >= 4 and 2 * 3 * tr * D * itemsize <= stream_budget) else 2
        out = pl.pallas_call(
            _inner_kernel_fulld,
            out_shape=jax.ShapeDtypeStruct((1, N), out_dtype),   # lane-dense slab
            grid=(rows,),
            in_specs=[_make_spec((tr, D), lambda i: (i, 0), nbuf),
                      _make_spec((tr, D), lambda i: (i, 0), nbuf)],
            out_specs=pl.BlockSpec((1, tr), lambda i: (0, i)),
            compiler_params=pltpu.CompilerParams(
                dimension_semantics=("parallel",),
                vmem_limit_bytes=vmem_limit,
            ),
            cost_estimate=cost,
        )(x, y)
        return out[0]

    # Plan B (very large D): tile the reduction axis with an f32 accumulator.
    tr = next((t for t in (512, 256, 128) if t < N), N)
    tk = next(t for t in (4096, 2048, 1024, 512)
              if 2 * 2 * tr * t * itemsize <= stream_budget)
    mask_k = (D % tk) != 0
    kernel = functools.partial(_inner_kernel_ktiled, d_total=D, tk=tk,
                               mask_k=mask_k)
    out = pl.pallas_call(
        kernel,
        out_shape=jax.ShapeDtypeStruct((1, N), out_dtype),
        grid=(pl.cdiv(N, tr), pl.cdiv(D, tk)),                   # reduction last
        in_specs=[pl.BlockSpec((tr, tk), lambda i, k: (i, k)),
                  pl.BlockSpec((tr, tk), lambda i, k: (i, k))],
        out_specs=pl.BlockSpec((1, tr), lambda i, k: (0, i)),
        scratch_shapes=[pltpu.VMEM((8, tr), jnp.float32)],
        compiler_params=pltpu.CompilerParams(
            dimension_semantics=("parallel", "arbitrary"),
            vmem_limit_bytes=vmem_limit,
        ),
        cost_estimate=cost,
    )(x, y)
    return out[0]


# ----------------------------- public API ------------------------------------

def inner_prod(x, y, outer=False):
    """Pallas implementation of InnerProd.forward (dim / mlp_dim are unused)."""
    if outer:
        assert x.ndim == 2 and y.ndim == 2 and x.shape[1] == y.shape[1], \
            "outer path expects x:[N,D], y:[M,D]"
        if x.size < _MIN_PALLAS_ELEMS and y.size < _MIN_PALLAS_ELEMS:
            return jnp.matmul(x, y.T)          # tiny: not worth a kernel launch
        return _outer_pallas(x, y)
    else:
        assert x.ndim == 2 and x.shape == y.shape, \
            "inner path expects x and y with identical [N, D] shapes"
        if x.size < _MIN_PALLAS_ELEMS:
            return jnp.sum(x * y, axis=-1)     # tiny: not worth a kernel launch
        return _inner_pallas(x, y)


# ----------------------------- demo -----------------------------------------

if __name__ == "__main__":
    key = jax.random.PRNGKey(0)
    kx, ky, kz, ka, kb, kc, kd = jax.random.split(key, 7)

    # --- aligned shapes: multi-block, megacore-friendly grids on both paths ---
    N, M, D = 256, 256, 1024
    x = jax.random.normal(kx, (N, D), dtype=jnp.float32)
    y = jax.random.normal(ky, (N, D), dtype=jnp.float32)    # inner path
    y2 = jax.random.normal(kz, (M, D), dtype=jnp.float32)   # outer path

    score_inner = jax.block_until_ready(inner_prod(x, y, outer=False))
    assert score_inner.shape == (N,)
    np.testing.assert_allclose(np.asarray(score_inner),
                               np.asarray(jnp.sum(x * y, axis=-1)),
                               rtol=1e-2, atol=1e-2)

    score_outer = jax.block_until_ready(inner_prod(x, y2, outer=True))
    assert score_outer.shape == (N, M)
    np.testing.assert_allclose(np.asarray(score_outer),
                               np.asarray(jnp.matmul(x, y2.T)),
                               rtol=1e-2, atol=1e-2)

    # --- unaligned shapes: no wrapper padding; partial blocks + K-tail mask ---
    Nu, Mu, Du = 200, 176, 2200
    xu = jax.random.normal(ka, (Nu, Du), dtype=jnp.float32)
    yu = jax.random.normal(kb, (Nu, Du), dtype=jnp.float32)
    y2u = jax.random.normal(kc, (Mu, Du), dtype=jnp.float32)

    s_inner_u = jax.block_until_ready(inner_prod(xu, yu, outer=False))
    assert s_inner_u.shape == (Nu,)
    np.testing.assert_allclose(np.asarray(s_inner_u),
                               np.asarray(jnp.sum(xu * yu, axis=-1)),
                               rtol=1e-2, atol=1e-2)

    s_outer_u = jax.block_until_ready(inner_prod(xu, y2u, outer=True))
    assert s_outer_u.shape == (Nu, Mu)
    np.testing.assert_allclose(np.asarray(s_outer_u),
                               np.asarray(jnp.matmul(xu, y2u.T)),
                               rtol=2e-2, atol=2e-2)

    # --- tiny shapes take the fused-XLA fallback (kernel overhead > work) ---
    xs = jax.random.normal(kd, (8, 32), dtype=jnp.float32)
    ys = jax.random.normal(kd, (8, 32), dtype=jnp.float32)
    s_small = jax.block_until_ready(inner_prod(xs, ys, outer=False))
    np.testing.assert_allclose(np.asarray(s_small),
                               np.asarray(jnp.sum(xs * ys, axis=-1)), atol=1e-5)

    print("KERNEL_OK")
</pallas_src>

<mosaic_0001>
module attributes {stable_mosaic.version = 11 : i64} {
  func.func @_inner_kernel_fulld(%arg0: i32, %arg1: memref<128x1024xf32, #tpu.memory_space<vmem>>, %arg2: memref<128x1024xf32, #tpu.memory_space<vmem>>, %arg3: memref<1x128xf32, #tpu.memory_space<vmem>>) attributes {dimension_semantics = [#tpu.dimension_semantics<parallel>], iteration_bounds = array<i64: 2>, scalar_prefetch = 0 : i64, scratch_operands = 0 : i64, tpu.core_type = #tpu.core_type<tc>, window_params = [{transform_indices = @transform_0, window_bounds = array<i64: 128, 1024>}, {transform_indices = @transform_1, window_bounds = array<i64: 128, 1024>}, {transform_indices = @transform_2, window_bounds = array<i64: 1, 128>}]} {
    %c0 = arith.constant 0 : index
    %c0_0 = arith.constant 0 : index
    %0 = vector.load %arg1[%c0, %c0_0] : memref<128x1024xf32, #tpu.memory_space<vmem>>, vector<128x1024xf32>
    %c0_1 = arith.constant 0 : index
    %c0_2 = arith.constant 0 : index
    %1 = vector.load %arg2[%c0_1, %c0_2] : memref<128x1024xf32, #tpu.memory_space<vmem>>, vector<128x1024xf32>
    %2 = arith.mulf %0, %1 : vector<128x1024xf32>
    %cst = arith.constant 1.000000e+00 : f32
    %3 = vector.broadcast %cst : f32 to vector<8x1024xf32>
    %cst_3 = arith.constant dense<0.000000e+00> : vector<8x128xf32>
    %4 = tpu.matmul %3, %2, %cst_3 {dimension_numbers = #tpu.dot_dimension_numbers<[1], [1], [0], [0], [0, 0, 1, 0], [], []>, precision = #tpu.contract_precision<fp32>} : vector<8x1024xf32>, vector<128x1024xf32>, vector<8x128xf32> -> vector<8x128xf32>
    %5 = vector.extract_strided_slice %4 {offsets = [0, 0], sizes = [1, 128], strides = [1, 1]} : vector<8x128xf32> to vector<1x128xf32>
    %c0_4 = arith.constant 0 : index
    %c0_5 = arith.constant 0 : index
    %6 = vector.load %arg3[%c0_4, %c0_5] : memref<1x128xf32, #tpu.memory_space<vmem>>, vector<1x128xf32>
    tpu.vector_store %arg3[%c0_4, %c0_5], %5 {strides = array<i32>} : memref<1x128xf32, #tpu.memory_space<vmem>>, vector<1x128xf32>,
    return
  }
  func.func @transform_0(%arg0: i32) -> (i32, i32) {
    %c0_i32 = arith.constant 0 : i32
    %c0_i32_0 = arith.constant 0 : i32
    return %arg0, %c0_i32 : i32, i32
  }
  func.func @transform_1(%arg0: i32) -> (i32, i32) {
    %c0_i32 = arith.constant 0 : i32
    %c0_i32_0 = arith.constant 0 : i32
    return %arg0, %c0_i32 : i32, i32
  }
  func.func @transform_2(%arg0: i32) -> (i32, i32) {
    %c0_i32 = arith.constant 0 : i32
    %c0_i32_0 = arith.constant 0 : i32
    return %c0_i32, %arg0 : i32, i32
  }
}

</mosaic_0001>

<bundles_post_ra>
// kernel: tpu_custom_call.1
= control target key start
LH: loop header
LB: loop body
LE: loop exit
PB: predicated region body
PF: predicated region fallthrough
CT: control target
= control target key end

     0   :  { %7 = vsyncpa [#allocation3], 0  ;;  %s7504_s0 = inlined_call_operand.hbm [shape: f32[256,1024], index: 0, kind: input, shape index: {}]   ;;  %s7505_s1 = inlined_call_operand.hbm [shape: f32[256,1024], index: 1, kind: input, shape index: {}]   ;;  %s7506_s2 = inlined_call_operand.hbm [shape: f32[1,256], index: 2, kind: output, shape index: {}]  }
   0x1   :  { %9 = vsyncpa [#allocation3 + $0x1], 0 }
   0x2   :  { %10 = vsyncpa [#allocation6], 0 }
   0x3   :  { %12 = vsyncpa [#allocation6 + $0x1], 0 }
   0x4   :  { %13 = vsyncpa [#allocation4], 0 }
   0x5   :  { %15 = vsyncpa [#allocation4 + $0x1], 0  ;;  %s5079_s9 = smov 0   ;;  %s5081_s10 = smov 0  }
   0x6   :  { %s5083_s11 = smov 0   ;;  %s5085_s12 = smov 0  }
   0x7 LB: > { %s5100_s13 = sadd.s32 4294967295, %s5055_s12   ;;  %s4036_s14 = sadd.s32 4294967294, %s5055_s12   ;;  %s5055_s12 = sphi %s5085_s12, %s8605_s12   ;;  %s5051_s11 = sphi %s5083_s11, %s8604_s11   ;;  %s5047_s10 = sphi %s5081_s10, %s8603_s10   ;;  %s5043_s9 = sphi %s5079_s9, %s8602_s9  }
   0x8   : > { %s5104_s15 = sadd.s32 1, %s5055_s12   ;;  %s28_s16 = sadd.s32 1, %s5051_s11 }
   0x9   : > { %s25_s17 = ssub.s32 %s5055_s12, %s5104_s15  ;;  %p35_p0 = scmp.ne.s32.totalorder %s5051_s11, %s5047_s10 }
   0xa   : > { %p26_p1 = scmp.eq.s32.totalorder %s25_s17, 0  ;;  %p36_p2 = scmp.eq.s32.totalorder %s5055_s12, 0 }
   0xb   : > { %p41_p3 = scmp.ne.s32.totalorder %s5047_s10, %s5043_s9  ;;  %p42_p4 = scmp.eq.s32.totalorder %s5100_s13, 0 }
   0xc   : > { %s5116_s18 = scalar_select %p26_p1, %s5051_s11, %s28_s16  }
   0xd   : > { %p5118_p5 = por %p36_p2, %p35_p0  ;;  %p5122_p6 = por %p42_p4, %p41_p3 }
   0xe   : > { %p91_p7 = scmp.eq.s32.totalorder %s5100_s13, 1  ;;  %p97_p8 = scmp.eq.s32.totalorder %s4036_s14, 1 }
   0xf   : > { %s7917_s20 = scalar_select %p5122_p6, 1, 0 }
  0x10   : > { %p4887_p10 = scmp.lt.s32.totalorder %s5055_s12, 2  ;;  %p5129_p11 = por %p91_p7, %p35_p0 }
  0x11   : > { %p5133_p12 = por %p97_p8, %p41_p3  ;;  %s5138_s23 = sand.u32 1, %s5051_s11  }
  0x12   : > { %s7918_s21 = scalar_select %p5129_p11, 1, 0 }
  0x13   : > { %s7919_s22 = scalar_select %p5133_p12, 1, 0 }
  0x14   : > { %s4054_s24 = sshll.u32 %s5055_s12, 14  ;;  %s4039_s25 = sshll.u32 %s5138_s23, 10 }
  0x15   : > { %s5147_s28 = scalar_lea.hbm %s7504_s0, %s4054_s24  ;;  %s121_s29 = scalar_lea.vmem [#allocation2], %s4039_s25 }
  0x16   : > { %s129_s30 = sshll.u32 %s121_s29, 4  ;;  %p5153_p13 = pnand %p4887_p10, %p5118_p5  ;;  %s5157_s30 = int_to_ptr.vmem [resolvable:$true] %s129_s30 }
  0x17   : > { %s118_s4 = scalar_lea.sflag [#allocation3], %s5138_s23  ;;  %s4925_s5 = scalar_lea.hbm %s5147_s28, 16384 }
  0x18   : > { %p4926_p0 = scmp.ne.s32.totalorder %s5147_s28, %s4925_s5  ;;  %p4927_p1 = pneg %p5153_p13 }
  0x19   : > { %s4930_s8 = scalar_lea.hbm %s7504_s0, 32768  ;;  %p4931_p4 = scmp.lt.u32.totalorder %s5147_s28, %s7504_s0 }
  0x1a   : > { %p4928_p2 = pnand %p4927_p1, %p4926_p0  ;;  %p4932_p5 = scmp.lt.u32.totalorder %s4930_s8, %s4925_s5 }
  0x1b   : > { %p4934_p8 = scmp.lt.u32.totalorder %s4925_s5, %s5147_s28 }
  0x1c   : > { %p4929_p3 = pneg %p4928_p2  ;;  %p4933_p7 = por %p4932_p5, %p4931_p4 }
  0x1e   : > { %p4935_p10 = por %p4934_p8, %p4933_p7 }
  0x20   : > { %p4936_p9 = pnand %p4935_p10, %p4929_p3 }
  0x22   : > { %4939 = shalt.err (!%p4936_p9)
}
  0x23   : > { %s4940_s17 = scalar_lea.vmem %s5157_s30, 16384  ;;  %s5057_s19 = smov [#allocation2]  }
  0x24   : > { %p4941_p0 = scmp.ne.s32.totalorder %s5157_s30, %s4940_s17  ;;  %s4945_s26 = sshll.u32 %s5057_s19, 4  ;;  %s4946_s26 = int_to_ptr.vmem [resolvable:$false] %s4945_s26 }
  0x25   : > { %s4947_s27 = scalar_lea.vmem %s4946_s26, 32768  ;;  %p4948_p11 = scmp.lt.s32.totalorder %s5157_s30, %s4946_s26 }
  0x26   : > { %p4943_p2 = pnand %p4941_p0, %p4927_p1  ;;  %p4949_p4 = scmp.lt.s32.totalorder %s4947_s27, %s4940_s17 }
  0x28   : > { %p4944_p12 = pneg %p4943_p2  ;;  %p4950_p5 = por %p4949_p4, %p4948_p11 }
  0x2a   : > { %p4951_p7 = pnand %p4950_p5, %p4944_p12 }
  0x2c   : > { %4954 = shalt.err (!%p4951_p7)
}
  0x2d   : > { %s5058_s29 = smov 1024   ;;  %s5059_s5 = smov 64  }
  0x2e   : > { %4879 = dma.hbm_to_vmem [thread:$0]  (!%p5153_p13), %s5147_s28, 16384, %s5157_s30, %s118_s4, %s5058_s29, %s5058_s29, %s5059_s5  }
  0x2f   : > { %p4047_p9 = scmp.ge.s32.totalorder %s5055_s12, 1  ;;  %p159_p11 = scmp.lt.s32.totalorder %s5055_s12, 3 }
  0x30   : > { %s5201_s14 = scalar_lea.hbm %s7505_s1, %s4054_s24  ;;  %s143_s16 = scalar_lea.vmem [#allocation5], %s4039_s25 }
  0x31   : > { %p5192_p12 = pnand %p4047_p9, %p159_p11  ;;  %s151_s17 = sshll.u32 %s143_s16, 4  ;;  %s5205_s17 = int_to_ptr.vmem [resolvable:$true] %s151_s17 }
  0x32   : > { %s140_s28 = scalar_lea.sflag [#allocation6], %s5138_s23  ;;  %s4955_s30 = scalar_lea.hbm %s5201_s14, 16384 }
  0x33   : > { %p4956_p3 = scmp.ne.s32.totalorder %s5201_s14, %s4955_s30  ;;  %s4960_s24 = scalar_lea.hbm %s7505_s1, 32768 }
  0x34   : > { %p4961_p0 = scmp.lt.u32.totalorder %s5201_s14, %s7505_s1  ;;  %p4962_p2 = scmp.lt.u32.totalorder %s4960_s24, %s4955_s30 }
  0x35   : > { %p4958_p8 = pnand %p4956_p3, %p4927_p1  ;;  %p4964_p5 = scmp.lt.u32.totalorder %s4955_s30, %s5201_s14 }
  0x36   : > { %p4963_p4 = por %p4962_p2, %p4961_p0 }
  0x37   : > { %p4959_p10 = pneg %p4958_p8 }
  0x38   : > { %p4965_p7 = por %p4964_p5, %p4963_p4 }
  0x3a   : > { %p4966_p9 = pnand %p4965_p7, %p4959_p10 }
  0x3c   : > { %4969 = shalt.err (!%p4966_p9)
}
  0x3d   : > { %s4970_s25 = scalar_lea.vmem %s5205_s17, 16384  ;;  %s5060_s7 = smov [#allocation5]  }
  0x3e   : > { %p4971_p11 = scmp.ne.s32.totalorder %s5205_s17, %s4970_s25  ;;  %s4975_s8 = sshll.u32 %s5060_s7, 4  ;;  %s4976_s8 = int_to_ptr.vmem [resolvable:$false] %s4975_s8 }
  0x3f   : > { %s4977_s16 = scalar_lea.vmem %s4976_s8, 32768  ;;  %p4978_p6 = scmp.lt.s32.totalorder %s5205_s17, %s4976_s8 }
  0x40   : > { %p4973_p3 = pnand %p4971_p11, %p4927_p1  ;;  %p4979_p0 = scmp.lt.s32.totalorder %s4977_s16, %s4970_s25 }
  0x42   : > { %p4974_p8 = pneg %p4973_p3  ;;  %p4980_p2 = por %p4979_p0, %p4978_p6 }
  0x44   : > { %p4981_p4 = pnand %p4980_p2, %p4974_p8 }
  0x46   : > { %4984 = shalt.err (!%p4981_p4)
}
  0x47   : > { %4882 = dma.hbm_to_vmem [thread:$0]  (!%p5153_p13), %s5201_s14, 16384, %s5205_s17, %s140_s28, %s5058_s29, %s5058_s29, %s5059_s5  }
  0x48   : > { %163 = sbr.rel (%p5192_p12) target bundleno = 1109 (0x455), region = 28 }
  0x4f   : > { %s5239_s30 = sand.u32 1, %s5047_s10   ;;  %p7922_p6 = scmp.ne.s32.totalorder %s7917_s20, 0 }
  0x50   : > { %s4048_s4 = sshll.u32 %s5239_s30, 10  ;;  %s166_s19 = scalar_lea.sflag [#allocation3], %s5239_s30 }
  0x51   : > { %s5243_s3 = scalar_lea.vmem [#allocation2], %s4048_s4 }
  0x52   : > { %5030 = dma.done.wait (%p7922_p6), %s166_s19, 16384  }
  0x53   : > { %5032 = vsyncadd (%p7922_p6), %s166_s19, 4294950912  ;;  %s175_s23 = scalar_lea.sflag [#allocation6], %s5239_s30  ;;  %s5250_s29 = scalar_lea.vmem [#allocation5], %s4048_s4 }
  0x54   : > { %5034 = dma.done.wait (%p7922_p6), %s175_s23, 16384  }
  0x55   : > { %5036 = vsyncadd (%p7922_p6), %s175_s23, 4294950912  ;;  %v7509_v0 = vmov 0.0   ;;  %v206_v1 = vld [vmem:[%s5243_s3 + $0x8] sm:$0xff]  ;;  %v205_v11 = vld [vmem:[%s5243_s3] sm:$0xff]  ;;  %s4050_s20 = sshll.u32 %s5100_s13, 4  ;;  %s202_s5 = scalar_lea.vmem [#allocation7], %s5239_s30 }
  0x56   : > { %685 = vmatprep.mubr.f32.mxu1 %v7509_v0  ;;  %2357 = vmatprep.mubr.f32.mxu0 %v7509_v0  ;;  %v214_v2 = vld [vmem:[%s5243_s3 + $0x48] sm:$0xff]  ;;  %v213_v15 = vld [vmem:[%s5243_s3 + $0x40] sm:$0xff]  ;;  %s3947_s6 = sshll.u32 %s202_s5, 4  ;;  %s7460_s28 = scalar_lea.hbm %s7506_s2, %s4050_s20  ;;  %s7462_s6 = int_to_ptr.vmem [resolvable:$true] %s3947_s6 }
  0x57   : > { %v334_v3 = vld [vmem:[%s5250_s29 + $0x8] sm:$0xff]  ;;  %v333_v16 = vld [vmem:[%s5250_s29] sm:$0xff]  ;;  %s3935_s24 = scalar_lea.sflag [#allocation4], %s5239_s30  ;;  %s4985_s26 = scalar_lea.vmem %s7462_s6, 16 }
  0x58   : > { %v342_v4 = vld [vmem:[%s5250_s29 + $0x48] sm:$0xff]  ;;  %v462_v5 = vmul.f32 %v334_v3, %v206_v1  ;;  %v341_v17 = vld [vmem:[%s5250_s29 + $0x40] sm:$0xff]  ;;  %v461_v19 = vmul.f32 %v333_v16, %v205_v11  ;;  %p4986_p13 = scmp.ne.s32.totalorder %s7462_s6, %s4985_s26  ;;  %p8599_p1 = scmp.ne.s32.totalorder %s7918_s21, 0 }
  0x59   : > { %v210_v6 = vld [vmem:[%s5243_s3 + $0x28] sm:$0xff]  ;;  %v470_v8 = vmul.f32 %v342_v4, %v214_v2  ;;  %v469_v20 = vmul.f32 %v341_v17, %v213_v15  ;;  %v209_v21 = vld [vmem:[%s5243_s3 + $0x20] sm:$0xff]  ;;  %s5063_s13 = smov [#allocation7]  }
  0x5a   : > { %v218_v7 = vld [vmem:[%s5243_s3 + $0x68] sm:$0xff]  ;;  %v589_v12 = vand.u32 4294901760, %v462_v5  ;;  %v217_v22 = vld [vmem:[%s5243_s3 + $0x60] sm:$0xff]  ;;  %v591_v31 = vand.u32 4294901760, %v461_v19  ;;  %p4987_p12 = pnand %p4986_p13, %p8599_p1  ;;  %s4989_s27 = sshll.u32 %s5063_s13, 4  ;;  %s4990_s27 = int_to_ptr.vmem [resolvable:$false] %s4989_s27 }
  0x5b   : > { %v338_v9 = vld [vmem:[%s5250_s29 + $0x28] sm:$0xff]  ;;  %v593_v18 = vand.u32 4294901760, %v470_v8  ;;  %v337_v23 = vld [vmem:[%s5250_s29 + $0x20] sm:$0xff]  ;;  %v595_v32 = vand.u32 4294901760, %v469_v20  ;;  %s4991_s25 = scalar_lea.vmem %s4990_s27, 32  ;;  %p4992_p5 = scmp.lt.s32.totalorder %s7462_s6, %s4990_s27 }
  0x5c   : > { %v346_v10 = vld [vmem:[%s5250_s29 + $0x68] sm:$0xff]  ;;  %v466_v13 = vmul.f32 %v338_v9, %v210_v6  ;;  %v345_v26 = vld [vmem:[%s5250_s29 + $0x60] sm:$0xff]  ;;  %v465_v27 = vmul.f32 %v337_v23, %v209_v21  ;;  %v5281_v36 = vsub.f32 %v462_v5, %v589_v12  ;;  %v5309_v62 = vsub.f32 %v461_v19, %v591_v31  ;;  %p4988_p10 = pneg %p4987_p12  ;;  %p4993_p7 = scmp.lt.s32.totalorder %s4991_s25, %s4985_s26 }
  0x5d   : > { %v474_v14 = vmul.f32 %v346_v10, %v218_v7  ;;  %v222_v28 = vld [vmem:[%s5243_s3 + $0x88] sm:$0xff]  ;;  %v5276_v30 = vpack.c.bf16 %v593_v18, %v589_v12  ;;  %v473_v38 = vmul.f32 %v345_v26, %v217_v22  ;;  %v5289_v42 = vsub.f32 %v470_v8, %v593_v18  ;;  %v221_v46 = vld [vmem:[%s5243_s3 + $0x80] sm:$0xff] }
  0x5e   : > { %v2261_v24 = vand.u32 4294901760, %v466_v13  ;;  %v230_v29 = vld [vmem:[%s5243_s3 + $0xc8] sm:$0xff]  ;;  %7924 = vst [vmem:[#allocation12_spill] sm:$0xff] %v5281_v36  ;;  %v5293_v44 = vpack.c.bf16 %v595_v32, %v591_v31  ;;  %v2263_v45 = vand.u32 4294901760, %v465_v27  ;;  %v229_v47 = vld [vmem:[%s5243_s3 + $0xc0] sm:$0xff]  ;;  %p4994_p9 = por %p4993_p7, %p4992_p5 }
  0x5f   : > { %v2265_v25 = vand.u32 4294901760, %v474_v14  ;;  %7923 = vst [vmem:[#allocation11_spill] sm:$0xff] %v5276_v30  ;;  %v350_v33 = vld [vmem:[%s5250_s29 + $0x88] sm:$0xff]  ;;  %4058 = vmatprep.subr.bf16.mxu1 %v5276_v30  ;;  %7926 = vst [vmem:[#allocation14_spill] sm:$0xff] %v5289_v42  ;;  %v349_v48 = vld [vmem:[%s5250_s29 + $0x80] sm:$0xff]  ;;  %v2267_v49 = vand.u32 4294901760, %v473_v38 }
  0x60   : > { %v358_v34 = vld [vmem:[%s5250_s29 + $0xc8] sm:$0xff]  ;;  %v5291_v43 = vsub.f32 %v466_v13, %v2261_v24  ;;  %7927 = vst [vmem:[#allocation15_spill] sm:$0xff] %v5293_v44  ;;  %v478_v50 = vmul.f32 %v350_v33, %v222_v28  ;;  %v357_v53 = vld [vmem:[%s5250_s29 + $0xc0] sm:$0xff]  ;;  %4060 = vmatpush1.bf16.xpose.msra.mxu1 %v5293_v44  ;;  %v477_v57 = vmul.f32 %v349_v48, %v221_v46  ;;  %p4995_p11 = pnand %p4994_p9, %p4988_p10 }
  0x61   : > { %v226_v35 = vld [vmem:[%s5243_s3 + $0xa8] sm:$0xff]  ;;  %v5283_v37 = vpack.c.bf16 %v2265_v25, %v2261_v24  ;;  %v486_v51 = vmul.f32 %v358_v34, %v230_v29  ;;  %v225_v54 = vld [vmem:[%s5243_s3 + $0xa0] sm:$0xff]  ;;  %v5301_v55 = vsub.f32 %v474_v14, %v2265_v25  ;;  %v5304_v58 = vmul.f32 %v357_v53, %v229_v47 }
  0x62   : > { %v234_v39 = vld [vmem:[%s5243_s3 + $0xe8] sm:$0xff]  ;;  %v233_v59 = vld [vmem:[%s5243_s3 + $0xe0] sm:$0xff]  ;;  %v5311_v63 = vpack.c.bf16 %v2267_v49, %v2263_v45  ;;  %v597_v1 = vand.u32 4294901760, %v478_v50  ;;  %v599_v9 = vand.u32 4294901760, %v477_v57  ;;  %v5320_v13 = vsub.f32 %v469_v20, %v595_v32 }
  0x63   : > { %7925 = vst [vmem:[#allocation13_spill] sm:$0xff] %v5283_v37  ;;  %v354_v40 = vld [vmem:[%s5250_s29 + $0xa8] sm:$0xff]  ;;  %4442 = vmatprep.subr.bf16.mxu0 %v5283_v37  ;;  %v353_v60 = vld [vmem:[%s5250_s29 + $0xa0] sm:$0xff]  ;;  %v601_v2 = vand.u32 4294901760, %v486_v51  ;;  %v603_v10 = vand.u32 4294901760, %v5304_v58  ;;  %v5323_v14 = vsub.f32 %v465_v27, %v2263_v45  ;;  %v5330_v21 = vsub.f32 %v473_v38, %v2267_v49 }
  0x64   : > { %v362_v41 = vld [vmem:[%s5250_s29 + $0xe8] sm:$0xff]  ;;  %v482_v52 = vmul.f32 %v354_v40, %v226_v35  ;;  %v361_v61 = vld [vmem:[%s5250_s29 + $0xe0] sm:$0xff]  ;;  %7928 = vst [vmem:[#allocation16_spill] sm:$0xff] %v5311_v63  ;;  %7929 = vst [vmem:[#allocation17_spill] sm:$0xff] %v5320_v13  ;;  %4444 = vmatpush1.bf16.xpose.msra.mxu0 %v5311_v63  ;;  %v481_v16 = vmul.f32 %v353_v60, %v225_v54  ;;  %v5332_v22 = vsub.f32 %v478_v50, %v597_v1 }
  0x65   : > { %v490_v56 = vmul.f32 %v362_v41, %v234_v39  ;;  %v238_v3 = vld [vmem:[%s5243_s3 + $0x108] sm:$0xff]  ;;  %7930 = vst [vmem:[#allocation18_spill] sm:$0xff] %v5323_v14  ;;  %v5325_v15 = vpack.c.bf16 %v601_v2, %v597_v1  ;;  %v237_v19 = vld [vmem:[%s5243_s3 + $0x100] sm:$0xff]  ;;  %7932 = vst [vmem:[#allocation20_spill] sm:$0xff] %v5330_v21  ;;  %v5336_v24 = vpack.c.bf16 %v603_v10, %v599_v9 }
  0x66   : > { %v246_v4 = vld [vmem:[%s5243_s3 + $0x148] sm:$0xff]  ;;  %v2269_v7 = vand.u32 4294901760, %v482_v52  ;;  %7933 = vst [vmem:[#allocation21_spill] sm:$0xff] %v5332_v22  ;;  %v245_v20 = vld [vmem:[%s5243_s3 + $0x140] sm:$0xff]  ;;  %v5342_v27 = vsub.f32 %v486_v51, %v601_v2  ;;  %v489_v29 = vmul.f32 %v361_v61, %v233_v59  ;;  %v2271_v31 = vand.u32 4294901760, %v481_v16 }
  0x67   : > { %v366_v5 = vld [vmem:[%s5250_s29 + $0x108] sm:$0xff]  ;;  %v2273_v8 = vand.u32 4294901760, %v490_v56  ;;  %7931 = vst [vmem:[#allocation19_spill] sm:$0xff] %v5325_v15  ;;  %7935 = vst [vmem:[#allocation23_spill] sm:$0xff] %v5336_v24  ;;  %v365_v25 = vld [vmem:[%s5250_s29 + $0x100] sm:$0xff]  ;;  %4062 = vmatprep.subr.bf16.mxu1 %v5325_v15  ;;  %v5359_v59 = vsub.f32 %v477_v57, %v599_v9 }
  0x68   : > { %v374_v6 = vld [vmem:[%s5250_s29 + $0x148] sm:$0xff]  ;;  %v373_v26 = vld [vmem:[%s5250_s29 + $0x140] sm:$0xff]  ;;  %7936 = vst [vmem:[#allocation24_spill] sm:$0xff] %v5342_v27  ;;  %v5344_v28 = vsub.f32 %v482_v52, %v2269_v7  ;;  %v494_v32 = vmul.f32 %v366_v5, %v238_v3  ;;  %v2275_v39 = vand.u32 4294901760, %v489_v29  ;;  %v493_v40 = vmul.f32 %v365_v25, %v237_v19  ;;  %4064 = vmatpush1.bf16.xpose.msra.mxu1 %v5336_v24 }
  0x69   : > { %v242_v11 = vld [vmem:[%s5243_s3 + $0x128] sm:$0xff]  ;;  %v5334_v23 = vpack.c.bf16 %v2273_v8, %v2269_v7  ;;  %v502_v33 = vmul.f32 %v374_v6, %v246_v4  ;;  %v5347_v38 = vsub.f32 %v490_v56, %v2273_v8  ;;  %v5349_v41 = vmul.f32 %v373_v26, %v245_v20  ;;  %v241_v45 = vld [vmem:[%s5243_s3 + $0x120] sm:$0xff]  ;;  %7939 = vst [vmem:[#allocation27_spill] sm:$0xff] %v5359_v59 }
  0x6a   : > { %v250_v12 = vld [vmem:[%s5243_s3 + $0x168] sm:$0xff]  ;;  %7937 = vst [vmem:[#allocation25_spill] sm:$0xff] %v5344_v28  ;;  %v249_v46 = vld [vmem:[%s5243_s3 + $0x160] sm:$0xff]  ;;  %v605_v49 = vand.u32 4294901760, %v494_v32  ;;  %v5361_v60 = vpack.c.bf16 %v2275_v39, %v2271_v31  ;;  %v607_v61 = vand.u32 4294901760, %v493_v40  ;;  %v5368_v5 = vsub.f32 %v5304_v58, %v603_v10 }
  0x6b   : > { %v370_v17 = vld [vmem:[%s5250_s29 + $0x128] sm:$0xff]  ;;  %7934 = vst [vmem:[#allocation22_spill] sm:$0xff] %v5334_v23  ;;  %4446 = vmatprep.subr.bf16.mxu0 %v5334_v23  ;;  %7938 = vst [vmem:[#allocation26_spill] sm:$0xff] %v5347_v38  ;;  %v369_v47 = vld [vmem:[%s5250_s29 + $0x120] sm:$0xff]  ;;  %v609_v50 = vand.u32 4294901760, %v502_v33  ;;  %v611_v1 = vand.u32 4294901760, %v5349_v41  ;;  %v5370_v6 = vsub.f32 %v481_v16, %v2271_v31 }
  0x6c   : > { %v378_v18 = vld [vmem:[%s5250_s29 + $0x168] sm:$0xff]  ;;  %v498_v34 = vmul.f32 %v370_v17, %v242_v11  ;;  %v377_v48 = vld [vmem:[%s5250_s29 + $0x160] sm:$0xff]  ;;  %7940 = vst [vmem:[#allocation28_spill] sm:$0xff] %v5361_v60  ;;  %7941 = vst [vmem:[#allocation29_spill] sm:$0xff] %v5368_v5  ;;  %4448 = vmatpush1.bf16.xpose.msra.mxu0 %v5361_v60  ;;  %v5382_v17 = vsub.f32 %v494_v32, %v605_v49  ;;  %v497_v25 = vmul.f32 %v369_v47, %v241_v45 }
  0x6d   : > { %v506_v35 = vmul.f32 %v378_v18, %v250_v12  ;;  %v254_v53 = vld [vmem:[%s5243_s3 + $0x188] sm:$0xff]  ;;  %7942 = vst [vmem:[#allocation30_spill] sm:$0xff] %v5370_v6  ;;  %v5372_v7 = vpack.c.bf16 %v609_v50, %v605_v49  ;;  %v253_v11 = vld [vmem:[%s5243_s3 + $0x180] sm:$0xff]  ;;  %v5380_v12 = vsub.f32 %v489_v29, %v2275_v39  ;;  %v5384_v18 = vsub.f32 %v502_v33, %v609_v50 }
  0x6e   : > { %v2277_v51 = vand.u32 4294901760, %v498_v34  ;;  %v262_v54 = vld [vmem:[%s5243_s3 + $0x1c8] sm:$0xff]  ;;  %7946 = vst [vmem:[#allocation34_spill] sm:$0xff] %v5382_v17  ;;  %v261_v58 = vld [vmem:[%s5243_s3 + $0x1c0] sm:$0xff]  ;;  %v5393_v20 = vpack.c.bf16 %v611_v1, %v607_v61  ;;  %v505_v26 = vmul.f32 %v377_v48, %v249_v46 }
  0x6f   : > { %v2281_v52 = vand.u32 4294901760, %v506_v35  ;;  %v382_v56 = vld [vmem:[%s5250_s29 + $0x188] sm:$0xff]  ;;  %7943 = vst [vmem:[#allocation31_spill] sm:$0xff] %v5372_v7  ;;  %7945 = vst [vmem:[#allocation33_spill] sm:$0xff] %v5380_v12  ;;  %v381_v10 = vld [vmem:[%s5250_s29 + $0x180] sm:$0xff]  ;;  %4066 = vmatprep.subr.bf16.mxu1 %v5372_v7 }
  0x70   : > { %v390_v2 = vld [vmem:[%s5250_s29 + $0x1c8] sm:$0xff]  ;;  %7947 = vst [vmem:[#allocation35_spill] sm:$0xff] %v5384_v18  ;;  %v5386_v19 = vsub.f32 %v498_v34, %v2277_v51  ;;  %v389_v16 = vld [vmem:[%s5250_s29 + $0x1c0] sm:$0xff]  ;;  %7949 = vst [vmem:[#allocation37_spill] sm:$0xff] %v5393_v20  ;;  %v510_v29 = vmul.f32 %v382_v56, %v254_v53  ;;  %v2279_v34 = vand.u32 4294901760, %v497_v25  ;;  %v2283_v39 = vand.u32 4294901760, %v505_v26  ;;  %4068 = vmatpush1.bf16.xpose.msra.mxu1 %v5393_v20 }
  0x71   : > { %v258_v3 = vld [vmem:[%s5243_s3 + $0x1a8] sm:$0xff]  ;;  %v5374_v57 = vpack.c.bf16 %v2281_v52, %v2277_v51  ;;  %v518_v31 = vmul.f32 %v390_v2, %v262_v54  ;;  %v509_v49 = vmul.f32 %v381_v10, %v253_v11  ;;  %v5395_v50 = vmul.f32 %v389_v16, %v261_v58  ;;  %v257_v51 = vld [vmem:[%s5243_s3 + $0x1a0] sm:$0xff] }
  0x72   : > { %v266_v4 = vld [vmem:[%s5243_s3 + $0x1e8] sm:$0xff]  ;;  %7948 = vst [vmem:[#allocation36_spill] sm:$0xff] %v5386_v19  ;;  %v265_v0 = vld [vmem:[%s5243_s3 + $0x1e0] sm:$0xff]  ;;  %v5401_v53 = vsub.f32 %v506_v35, %v2281_v52  ;;  %v5404_v54 = vsub.f32 %v493_v40, %v607_v61  ;;  %v5406_v56 = vpack.c.bf16 %v2283_v39, %v2279_v34  ;;  %v5414_v11 = vsub.f32 %v497_v25, %v2279_v34 }
  0x73   : > { %7944 = vst [vmem:[#allocation32_spill] sm:$0xff] %v5374_v57  ;;  %v386_v8 = vld [vmem:[%s5250_s29 + $0x1a8] sm:$0xff]  ;;  %4450 = vmatprep.subr.bf16.mxu0 %v5374_v57  ;;  %v613_v57 = vand.u32 4294901760, %v510_v29  ;;  %v617_v60 = vand.u32 4294901760, %v518_v31  ;;  %v385_v47 = vld [vmem:[%s5250_s29 + $0x1a0] sm:$0xff]  ;;  %v615_v2 = vand.u32 4294901760, %v509_v49  ;;  %v5423_v10 = vsub.f32 %v505_v26, %v2283_v39 }
  0x74   : > { %v394_v9 = vld [vmem:[%s5250_s29 + $0x1e8] sm:$0xff]  ;;  %v514_v32 = vmul.f32 %v386_v8, %v258_v3  ;;  %v393_v48 = vld [vmem:[%s5250_s29 + $0x1e0] sm:$0xff]  ;;  %7950 = vst [vmem:[#allocation38_spill] sm:$0xff] %v5401_v53  ;;  %7951 = vst [vmem:[#allocation39_spill] sm:$0xff] %v5404_v54  ;;  %4452 = vmatpush1.bf16.xpose.msra.mxu0 %v5406_v56  ;;  %v513_v7 = vmul.f32 %v385_v47, %v257_v51 }
  0x75   : > { %v522_v33 = vmul.f32 %v394_v9, %v266_v4  ;;  %7952 = vst [vmem:[#allocation40_spill] sm:$0xff] %v5406_v56  ;;  %v270_v3 = vld [vmem:[%s5243_s3 + $0x208] sm:$0xff]  ;;  %v5412_v9 = vsub.f32 %v5349_v41, %v611_v1  ;;  %7954 = vst [vmem:[#allocation42_spill] sm:$0xff] %v5414_v11  ;;  %v5416_v35 = vpack.c.bf16 %v617_v60, %v613_v57  ;;  %v619_v41 = vand.u32 4294901760, %v5395_v50  ;;  %v269_v34 = vld [vmem:[%s5243_s3 + $0x200] sm:$0xff] }
  0x76   : > { %v2285_v45 = vand.u32 4294901760, %v514_v32  ;;  %v278_v4 = vld [vmem:[%s5243_s3 + $0x248] sm:$0xff]  ;;  %7957 = vst [vmem:[#allocation45_spill] sm:$0xff] %v5423_v10  ;;  %v5425_v16 = vsub.f32 %v510_v29, %v613_v57  ;;  %v5427_v20 = vsub.f32 %v518_v31, %v617_v60  ;;  %v521_v24 = vmul.f32 %v393_v48, %v265_v0  ;;  %v277_v26 = vld [vmem:[%s5243_s3 + $0x240] sm:$0xff] }
  0x77   : > { %v2289_v46 = vand.u32 4294901760, %v522_v33  ;;  %v398_v8 = vld [vmem:[%s5250_s29 + $0x208] sm:$0xff]  ;;  %7953 = vst [vmem:[#allocation41_spill] sm:$0xff] %v5412_v9  ;;  %7955 = vst [vmem:[#allocation43_spill] sm:$0xff] %v5416_v35  ;;  %4070 = vmatprep.subr.bf16.mxu1 %v5416_v35  ;;  %v397_v39 = vld [vmem:[%s5250_s29 + $0x200] sm:$0xff]  ;;  %v5442_v31 = vpack.c.bf16 %v619_v41, %v615_v2  ;;  %v2287_v47 = vand.u32 4294901760, %v513_v7 }
  0x78   : > { %v406_v40 = vld [vmem:[%s5250_s29 + $0x248] sm:$0xff]  ;;  %7958 = vst [vmem:[#allocation46_spill] sm:$0xff] %v5425_v16  ;;  %7959 = vst [vmem:[#allocation47_spill] sm:$0xff] %v5427_v20  ;;  %v526_v23 = vmul.f32 %v398_v8, %v270_v3  ;;  %v405_v57 = vld [vmem:[%s5250_s29 + $0x240] sm:$0xff]  ;;  %v5440_v29 = vsub.f32 %v514_v32, %v2285_v45  ;;  %v2291_v0 = vand.u32 4294901760, %v521_v24 }
  0x79   : > { %v5418_v52 = vpack.c.bf16 %v2289_v46, %v2285_v45  ;;  %v274_v61 = vld [vmem:[%s5243_s3 + $0x228] sm:$0xff]  ;;  %7961 = vst [vmem:[#allocation49_spill] sm:$0xff] %v5442_v31  ;;  %v534_v56 = vmul.f32 %v406_v40, %v278_v4  ;;  %v273_v8 = vld [vmem:[%s5243_s3 + $0x220] sm:$0xff]  ;;  %v533_v15 = vmul.f32 %v405_v57, %v277_v26  ;;  %v5449_v4 = vsub.f32 %v522_v33, %v2289_v46 }
  0x7a   : > { %v402_v58 = vld [vmem:[%s5250_s29 + $0x228] sm:$0xff]  ;;  %7960 = vst [vmem:[#allocation48_spill] sm:$0xff] %v5440_v29  ;;  %v621_v48 = vand.u32 4294901760, %v526_v23  ;;  %v281_v60 = vld [vmem:[%s5243_s3 + $0x260] sm:$0xff]  ;;  %v5451_v40 = vsub.f32 %v509_v49, %v615_v2  ;;  %4072 = vmatpush1.bf16.xpose.msra.mxu1 %v5442_v31  ;;  %v5461_v26 = vsub.f32 %v5395_v50, %v619_v41  ;;  %v5472_v29 = vsub.f32 %v521_v24, %v2291_v0 }
  0x7b   : > { %7956 = vst [vmem:[#allocation44_spill] sm:$0xff] %v5418_v52  ;;  %v282_v1 = vld [vmem:[%s5243_s3 + $0x268] sm:$0xff]  ;;  %4454 = vmatprep.subr.bf16.mxu0 %v5418_v52  ;;  %v530_v51 = vmul.f32 %v402_v58, %v274_v61  ;;  %v625_v35 = vand.u32 4294901760, %v534_v56  ;;  %v525_v52 = vmul.f32 %v397_v39, %v269_v34  ;;  %v401_v32 = vld [vmem:[%s5250_s29 + $0x220] sm:$0xff]  ;;  %7962 = vst [vmem:[#allocation50_spill] sm:$0xff] %v5449_v4  ;;  %v627_v37 = vand.u32 4294901760, %v533_v15 }
  0x7c   : > { %v410_v25 = vld [vmem:[%s5250_s29 + $0x268] sm:$0xff]  ;;  %v409_v45 = vld [vmem:[%s5250_s29 + $0x260] sm:$0xff]  ;;  %7963 = vst [vmem:[#allocation51_spill] sm:$0xff] %v5451_v40  ;;  %v5453_v61 = vpack.c.bf16 %v2291_v0, %v2287_v47  ;;  %7965 = vst [vmem:[#allocation53_spill] sm:$0xff] %v5461_v26  ;;  %v5463_v39 = vsub.f32 %v513_v7, %v2287_v47  ;;  %v529_v30 = vmul.f32 %v401_v32, %v273_v8 }
  0x7d   : > { %v538_v3 = vmul.f32 %v410_v25, %v282_v1  ;;  %v2293_v63 = vand.u32 4294901760, %v530_v51  ;;  %v286_v44 = vld [vmem:[%s5243_s3 + $0x288] sm:$0xff]  ;;  %v5465_v33 = vpack.c.bf16 %v625_v35, %v621_v48  ;;  %v623_v57 = vand.u32 4294901760, %v525_v52  ;;  %v285_v31 = vld [vmem:[%s5243_s3 + $0x280] sm:$0xff]  ;;  %7968 = vst [vmem:[#allocation56_spill] sm:$0xff] %v5472_v29 }
  0x7e   : > { %7964 = vst [vmem:[#allocation52_spill] sm:$0xff] %v5453_v61  ;;  %v294_v58 = vld [vmem:[%s5243_s3 + $0x2c8] sm:$0xff]  ;;  %7966 = vst [vmem:[#allocation54_spill] sm:$0xff] %v5463_v39  ;;  %v537_v40 = vmul.f32 %v409_v45, %v281_v60  ;;  %v293_v47 = vld [vmem:[%s5243_s3 + $0x2c0] sm:$0xff]  ;;  %4456 = vmatpush1.bf16.xpose.msra.mxu0 %v5453_v61  ;;  %v5481_v60 = vsub.f32 %v526_v23, %v621_v48  ;;  %v5483_v8 = vsub.f32 %v534_v56, %v625_v35 }
  0x7f   : > { %v414_v1 = vld [vmem:[%s5250_s29 + $0x288] sm:$0xff]  ;;  %7967 = vst [vmem:[#allocation55_spill] sm:$0xff] %v5465_v33  ;;  %v2297_v49 = vand.u32 4294901760, %v538_v3  ;;  %4074 = vmatprep.subr.bf16.mxu1 %v5465_v33  ;;  %v413_v39 = vld [vmem:[%s5250_s29 + $0x280] sm:$0xff]  ;;  %v5485_v24 = vpack.c.bf16 %v627_v37, %v623_v57  ;;  %v2295_v0 = vand.u32 4294901760, %v529_v30  ;;  %v5491_v23 = vsub.f32 %v530_v51, %v2293_v63 }
  0x80   : > { %v422_v25 = vld [vmem:[%s5250_s29 + $0x2c8] sm:$0xff]  ;;  %v542_v50 = vmul.f32 %v414_v1, %v286_v44  ;;  %v421_v26 = vld [vmem:[%s5250_s29 + $0x2c0] sm:$0xff]  ;;  %7970 = vst [vmem:[#allocation58_spill] sm:$0xff] %v5481_v60  ;;  %7971 = vst [vmem:[#allocation59_spill] sm:$0xff] %v5483_v8  ;;  %v2299_v44 = vand.u32 4294901760, %v537_v40  ;;  %v541_v35 = vmul.f32 %v413_v39, %v285_v31 }
  0x81   : > { %v290_v46 = vld [vmem:[%s5243_s3 + $0x2a8] sm:$0xff]  ;;  %v5475_v7 = vpack.c.bf16 %v2297_v49, %v2293_v63  ;;  %v550_v41 = vmul.f32 %v422_v25, %v294_v58  ;;  %7972 = vst [vmem:[#allocation60_spill] sm:$0xff] %v5485_v24  ;;  %v289_v1 = vld [vmem:[%s5243_s3 + $0x2a0] sm:$0xff]  ;;  %7973 = vst [vmem:[#allocation61_spill] sm:$0xff] %v5491_v23  ;;  %v549_v48 = vmul.f32 %v421_v26, %v293_v47 }
  0x82   : > { %v298_v2 = vld [vmem:[%s5243_s3 + $0x2e8] sm:$0xff]  ;;  %v629_v32 = vand.u32 4294901760, %v542_v50  ;;  %v297_v25 = vld [vmem:[%s5243_s3 + $0x2e0] sm:$0xff]  ;;  %v5496_v29 = vsub.f32 %v538_v3, %v2297_v49  ;;  %v5504_v63 = vpack.c.bf16 %v2299_v44, %v2295_v0  ;;  %v631_v31 = vand.u32 4294901760, %v541_v35  ;;  %4076 = vmatpush1.bf16.xpose.msra.mxu1 %v5485_v24 }
  0x83   : > { %v418_v34 = vld [vmem:[%s5250_s29 + $0x2a8] sm:$0xff]  ;;  %7969 = vst [vmem:[#allocation57_spill] sm:$0xff] %v5475_v7  ;;  %4458 = vmatprep.subr.bf16.mxu0 %v5475_v7  ;;  %v633_v45 = vand.u32 4294901760, %v550_v41  ;;  %v417_v33 = vld [vmem:[%s5250_s29 + $0x2a0] sm:$0xff]  ;;  %v5498_v7 = vsub.f32 %v525_v52, %v623_v57  ;;  %v635_v52 = vand.u32 4294901760, %v549_v48 }
  0x84   : > { %v426_v4 = vld [vmem:[%s5250_s29 + $0x2e8] sm:$0xff]  ;;  %v546_v58 = vmul.f32 %v418_v34, %v290_v46  ;;  %v425_v61 = vld [vmem:[%s5250_s29 + $0x2e0] sm:$0xff]  ;;  %7974 = vst [vmem:[#allocation62_spill] sm:$0xff] %v5496_v29  ;;  %v5500_v34 = vsub.f32 %v533_v15, %v627_v37  ;;  %7978 = vst [vmem:[#allocation66_spill] sm:$0xff] %v5504_v63  ;;  %v545_v49 = vmul.f32 %v417_v33, %v289_v1 }
  0x85   : > { %v554_v56 = vmul.f32 %v426_v4, %v298_v2  ;;  %v302_v8 = vld [vmem:[%s5243_s3 + $0x308] sm:$0xff]  ;;  %7975 = vst [vmem:[#allocation63_spill] sm:$0xff] %v5498_v7  ;;  %v5502_v46 = vpack.c.bf16 %v633_v45, %v629_v32  ;;  %v553_v2 = vmul.f32 %v425_v61, %v297_v25  ;;  %v5515_v7 = vsub.f32 %v537_v40, %v2299_v44  ;;  %v301_v61 = vld [vmem:[%s5243_s3 + $0x300] sm:$0xff] }
  0x86   : > { %v430_v60 = vld [vmem:[%s5250_s29 + $0x308] sm:$0xff]  ;;  %7976 = vst [vmem:[#allocation64_spill] sm:$0xff] %v5500_v34  ;;  %v2301_v51 = vand.u32 4294901760, %v546_v58  ;;  %v5513_v34 = vsub.f32 %v529_v30, %v2295_v0  ;;  %v5518_v29 = vsub.f32 %v542_v50, %v629_v32  ;;  %v429_v33 = vld [vmem:[%s5250_s29 + $0x300] sm:$0xff]  ;;  %v2303_v1 = vand.u32 4294901760, %v545_v49  ;;  %4460 = vmatpush1.bf16.xpose.msra.mxu0 %v5504_v63 }
  0x87   : > { %7977 = vst [vmem:[#allocation65_spill] sm:$0xff] %v5502_v46  ;;  %v2305_v4 = vand.u32 4294901760, %v554_v56  ;;  %v310_v26 = vld [vmem:[%s5243_s3 + $0x348] sm:$0xff]  ;;  %v558_v37 = vmul.f32 %v430_v60, %v302_v8  ;;  %7980 = vst [vmem:[#allocation68_spill] sm:$0xff] %v5515_v7  ;;  %4078 = vmatprep.subr.bf16.mxu1 %v5502_v46  ;;  %v5524_v60 = vsub.f32 %v550_v41, %v633_v45  ;;  %v2307_v30 = vand.u32 4294901760, %v553_v2  ;;  %v309_v0 = vld [vmem:[%s5243_s3 + $0x340] sm:$0xff] }
  0x88   : > { %v438_v39 = vld [vmem:[%s5250_s29 + $0x348] sm:$0xff]  ;;  %7979 = vst [vmem:[#allocation67_spill] sm:$0xff] %v5513_v34  ;;  %7981 = vst [vmem:[#allocation69_spill] sm:$0xff] %v5518_v29  ;;  %v5526_v8 = vsub.f32 %v546_v58, %v2301_v51  ;;  %v437_v40 = vld [vmem:[%s5250_s29 + $0x340] sm:$0xff]  ;;  %v5538_v58 = vpack.c.bf16 %v635_v52, %v631_v31 }
  0x89   : > { %v306_v3 = vld [vmem:[%s5243_s3 + $0x328] sm:$0xff]  ;;  %v5520_v24 = vpack.c.bf16 %v2305_v4, %v2301_v51  ;;  %7983 = vst [vmem:[#allocation71_spill] sm:$0xff] %v5524_v60  ;;  %v305_v44 = vld [vmem:[%s5243_s3 + $0x320] sm:$0xff]  ;;  %v566_v50 = vmul.f32 %v438_v39, %v310_v26  ;;  %v637_v32 = vand.u32 4294901760, %v558_v37  ;;  %v5536_v45 = vsub.f32 %v554_v56, %v2305_v4 }
  0x8a   : > { %v314_v15 = vld [vmem:[%s5243_s3 + $0x368] sm:$0xff]  ;;  %7984 = vst [vmem:[#allocation72_spill] sm:$0xff] %v5526_v8  ;;  %v313_v29 = vld [vmem:[%s5243_s3 + $0x360] sm:$0xff]  ;;  %7986 = vst [vmem:[#allocation74_spill] sm:$0xff] %v5538_v58  ;;  %v5540_v51 = vsub.f32 %v541_v35, %v631_v31  ;;  %v557_v26 = vmul.f32 %v429_v33, %v301_v61  ;;  %v5542_v39 = vsub.f32 %v549_v48, %v635_v52  ;;  %4080 = vmatpush1.bf16.xpose.msra.mxu1 %v5538_v58 }
  0x8b   : > { %v434_v57 = vld [vmem:[%s5250_s29 + $0x328] sm:$0xff]  ;;  %7982 = vst [vmem:[#allocation70_spill] sm:$0xff] %v5520_v24  ;;  %v433_v7 = vld [vmem:[%s5250_s29 + $0x320] sm:$0xff]  ;;  %4462 = vmatprep.subr.bf16.mxu0 %v5520_v24  ;;  %7985 = vst [vmem:[#allocation73_spill] sm:$0xff] %v5536_v45  ;;  %v5547_v8 = vpack.c.bf16 %v2307_v30, %v2303_v1  ;;  %v565_v56 = vmul.f32 %v437_v40, %v309_v0  ;;  %v5552_v61 = vsub.f32 %v545_v49, %v2303_v1 }
  0x8c   : > { %v442_v47 = vld [vmem:[%s5250_s29 + $0x368] sm:$0xff]  ;;  %v562_v25 = vmul.f32 %v434_v57, %v306_v3  ;;  %v441_v41 = vld [vmem:[%s5250_s29 + $0x360] sm:$0xff]  ;;  %7987 = vst [vmem:[#allocation75_spill] sm:$0xff] %v5540_v51  ;;  %7988 = vst [vmem:[#allocation76_spill] sm:$0xff] %v5542_v39  ;;  %v641_v3 = vand.u32 4294901760, %v566_v50  ;;  %v561_v4 = vmul.f32 %v433_v7, %v305_v44  ;;  %v5554_v48 = vsub.f32 %v553_v2, %v2307_v30 }
  0x8d   : > { %v570_v46 = vmul.f32 %v442_v47, %v314_v15  ;;  %v318_v47 = vld [vmem:[%s5243_s3 + $0x388] sm:$0xff]  ;;  %7989 = vst [vmem:[#allocation77_spill] sm:$0xff] %v5547_v8  ;;  %v569_v45 = vmul.f32 %v441_v41, %v313_v29  ;;  %7990 = vst [vmem:[#allocation78_spill] sm:$0xff] %v5552_v61  ;;  %v639_v33 = vand.u32 4294901760, %v557_v26  ;;  %v5561_v7 = vsub.f32 %v558_v37, %v637_v32  ;;  %v317_v2 = vld [vmem:[%s5243_s3 + $0x380] sm:$0xff] }
  0x8e   : > { %v2309_v57 = vand.u32 4294901760, %v562_v25  ;;  %v326_v63 = vld [vmem:[%s5243_s3 + $0x3c8] sm:$0xff]  ;;  %7991 = vst [vmem:[#allocation79_spill] sm:$0xff] %v5554_v48  ;;  %v5556_v52 = vpack.c.bf16 %v641_v3, %v637_v32  ;;  %v5563_v29 = vsub.f32 %v566_v50, %v641_v3  ;;  %v643_v49 = vand.u32 4294901760, %v565_v56  ;;  %v325_v41 = vld [vmem:[%s5243_s3 + $0x3c0] sm:$0xff]  ;;  %4464 = vmatpush1.bf16.xpose.msra.mxu0 %v5547_v8 }
  0x8f   : > { %v2313_v15 = vand.u32 4294901760, %v570_v46  ;;  %v446_v24 = vld [vmem:[%s5250_s29 + $0x388] sm:$0xff]  ;;  %7993 = vst [vmem:[#allocation81_spill] sm:$0xff] %v5561_v7  ;;  %v445_v48 = vld [vmem:[%s5250_s29 + $0x380] sm:$0xff]  ;;  %v2311_v50 = vand.u32 4294901760, %v561_v4  ;;  %v2315_v32 = vand.u32 4294901760, %v569_v45 }
  0x90   : > { %v454_v60 = vld [vmem:[%s5250_s29 + $0x3c8] sm:$0xff]  ;;  %7992 = vst [vmem:[#allocation80_spill] sm:$0xff] %v5556_v52  ;;  %7994 = vst [vmem:[#allocation82_spill] sm:$0xff] %v5563_v29  ;;  %4082 = vmatprep.subr.bf16.mxu1 %v5556_v52  ;;  %v5569_v1 = vsub.f32 %v562_v25, %v2309_v57  ;;  %v574_v30 = vmul.f32 %v446_v24, %v318_v47  ;;  %v453_v58 = vld [vmem:[%s5250_s29 + $0x3c0] sm:$0xff]  ;;  %v5579_v52 = vpack.c.bf16 %v643_v49, %v639_v33 }
  0x91   : > { %v322_v35 = vld [vmem:[%s5243_s3 + $0x3a8] sm:$0xff]  ;;  %v5565_v0 = vpack.c.bf16 %v2313_v15, %v2309_v57  ;;  %v582_v40 = vmul.f32 %v454_v60, %v326_v63  ;;  %v5574_v37 = vsub.f32 %v570_v46, %v2313_v15  ;;  %v321_v29 = vld [vmem:[%s5243_s3 + $0x3a0] sm:$0xff]  ;;  %v5581_v25 = vsub.f32 %v557_v26, %v639_v33 }
  0x92   : > { %v450_v31 = vld [vmem:[%s5250_s29 + $0x3a8] sm:$0xff]  ;;  %7996 = vst [vmem:[#allocation84_spill] sm:$0xff] %v5569_v1  ;;  %v449_v7 = vld [vmem:[%s5250_s29 + $0x3a0] sm:$0xff]  ;;  %7998 = vst [vmem:[#allocation86_spill] sm:$0xff] %v5579_v52  ;;  %v645_v24 = vand.u32 4294901760, %v574_v30  ;;  %v573_v57 = vmul.f32 %v445_v48, %v317_v2  ;;  %v581_v15 = vmul.f32 %v453_v58, %v325_v41  ;;  %v5594_v26 = vpack.c.bf16 %v2315_v32, %v2311_v50 }
  0x93   : > { %v330_v39 = vld [vmem:[%s5243_s3 + $0x3e8] sm:$0xff]  ;;  %7995 = vst [vmem:[#allocation83_spill] sm:$0xff] %v5565_v0  ;;  %v578_v44 = vmul.f32 %v450_v31, %v322_v35  ;;  %7997 = vst [vmem:[#allocation85_spill] sm:$0xff] %v5574_v37  ;;  %v649_v63 = vand.u32 4294901760, %v582_v40  ;;  %4466 = vmatprep.subr.bf16.mxu0 %v5565_v0  ;;  %v329_v47 = vld [vmem:[%s5243_s3 + $0x3e0] sm:$0xff]  ;;  %v5586_v31 = vsub.f32 %v565_v56, %v643_v49  ;;  %v8005_v56 = vand.u32 4294901760, %v5281_v36 }
  0x94   : > { %v458_v51 = vld [vmem:[%s5250_s29 + $0x3e8] sm:$0xff]  ;;  %7999 = vst [vmem:[#allocation87_spill] sm:$0xff] %v5581_v25  ;;  %v457_v35 = vld [vmem:[%s5250_s29 + $0x3e0] sm:$0xff]  ;;  %v5592_v8 = vmul.f32 %v449_v7, %v321_v29  ;;  %8003 = vst [vmem:[#allocation91_spill] sm:$0xff] %v5594_v26  ;;  %v5596_v33 = vsub.f32 %v569_v45, %v2315_v32  ;;  %v5598_v25 = vsub.f32 %v574_v30, %v645_v24  ;;  %v647_v48 = vand.u32 4294901760, %v573_v57 }
  0x95   : > { %v586_v3 = vmul.f32 %v458_v51, %v330_v39  ;;  %v2317_v60 = vand.u32 4294901760, %v578_v44  ;;  %8000 = vst [vmem:[#allocation88_spill] sm:$0xff] %v5586_v31  ;;  %v5588_v51 = vsub.f32 %v561_v4, %v2311_v50  ;;  %v5590_v39 = vpack.c.bf16 %v649_v63, %v645_v24  ;;  %4084 = vmatpush1.bf16.xpose.msra.mxu1 %v5579_v52 }
  0x96   : > { %8004 = vst [vmem:[#allocation92_spill] sm:$0xff] %v5596_v33  ;;  %v5600_v0 = vsub.f32 %v582_v40, %v649_v63  ;;  %v651_v58 = vand.u32 4294901760, %v581_v15  ;;  %v5602_v2 = vmul.f32 %v457_v35, %v329_v47  ;;  %v694_v4 = vsub.f32 %v5281_v36, %v8005_v56  ;;  %4468 = vmatpush1.bf16.xpose.msra.mxu0 %v5594_v26 }
  0x97   : > { %v2321_v46 = vand.u32 4294901760, %v586_v3  ;;  %8001 = vst [vmem:[#allocation89_spill] sm:$0xff] %v5588_v51  ;;  %8002 = vst [vmem:[#allocation90_spill] sm:$0xff] %v5590_v39  ;;  %v8007_v29 = vand.u32 4294901760, %v5289_v42  ;;  %v7586_v49 = vand.u32 4294901760, %v5291_v43  ;;  %v7585_v30 = vand.u32 4294901760, %v5301_v55  ;;  %4086 = vmatprep.subr.bf16.mxu1 %v5590_v39 }
  0x98   : > { %v5616_v40 = vsub.f32 %v578_v44, %v2317_v60  ;;  %v7596_v50 = vand.u32 4294901760, %v5592_v8  ;;  %v7593_v32 = vand.u32 4294901760, %v5602_v2  ;;  %v695_v24 = vand.u32 4294901760, %v694_v4 }
  0x99   : > { %v5608_v7 = vpack.c.bf16 %v2321_v46, %v2317_v60  ;;  %v706_v45 = vsub.f32 %v5289_v42, %v8007_v29  ;;  %v5618_v41 = vsub.f32 %v586_v3, %v2321_v46  ;;  %v2366_v47 = vsub.f32 %v5291_v43, %v7586_v49 }
  0x9a   : > { %v2378_v35 = vsub.f32 %v5301_v55, %v7585_v30  ;;  %v5629_v44 = vpack.c.bf16 %v651_v58, %v647_v48  ;;  %v5631_v3 = vsub.f32 %v573_v57, %v647_v48  ;;  %v7587_v60 = vand.u32 4294901760, %v5309_v62 }
  0x9b   : > { %8006 = vst [vmem:[#allocation93_spill] sm:$0xff] %v5608_v7  ;;  %8008 = vst [vmem:[#allocation94_spill] sm:$0xff] %v5618_v41  ;;  %v707_v63 = vand.u32 4294901760, %v706_v45  ;;  %v7588_v46 = vand.u32 4294901760, %v5320_v13  ;;  %4470 = vmatprep.subr.bf16.mxu0 %v5608_v7  ;;  %v2367_v4 = vand.u32 4294901760, %v2366_v47  ;;  %v7594_v45 = vand.u32 4294901760, %v5323_v14 }
  0x9c   : > { %8009 = vst [vmem:[#allocation95_spill] sm:$0xff] %v5629_v44  ;;  %v2379_v29 = vand.u32 4294901760, %v2378_v35  ;;  %v700_v30 = vsub.f32 %v5309_v62, %v7587_v60  ;;  %v7595_v48 = vand.u32 4294901760, %v5330_v21  ;;  %v7601_v47 = vand.u32 4294901760, %v5342_v27 }
  0x9d   : > { %v4089_v56 = vpack.c.bf16 %v707_v63, %v695_v24  ;;  %v712_v57 = vsub.f32 %v5320_v13, %v7588_v46  ;;  %v5649_v24 = vpack.c.bf16 %v7593_v32, %v7596_v50  ;;  %v2372_v63 = vsub.f32 %v5323_v14, %v7594_v45  ;;  %4088 = vmatpush1.bf16.xpose.msra.mxu1 %v5629_v44 }
  0x9e   : > { %v7602_v35 = vand.u32 4294901760, %v5344_v28  ;;  %v4473_v60 = vpack.c.bf16 %v2379_v29, %v2367_v4  ;;  %v701_v46 = vand.u32 4294901760, %v700_v30  ;;  %v2384_v49 = vsub.f32 %v5330_v21, %v7595_v48 }
  0x9f   : > { %8010 = vst [vmem:[#allocation96_spill] sm:$0xff] %v5649_v24  ;;  %v8011_v7 = vand.u32 4294901760, %v5332_v22  ;;  %v713_v32 = vand.u32 4294901760, %v712_v57  ;;  %v730_v45 = vsub.f32 %v5342_v27, %v7601_v47  ;;  %v7603_v30 = vand.u32 4294901760, %v5347_v38  ;;  %4090 = vmatprep.subr.bf16.mxu1 %v4089_v56  ;;  %4472 = vmatpush1.bf16.xpose.msra.mxu0 %v5649_v24 }
  0xa0   : > { %v2390_v4 = vsub.f32 %v5344_v28, %v7602_v35  ;;  %v5670_v29 = vsub.f32 %v581_v15, %v651_v58  ;;  %v2373_v48 = vand.u32 4294901760, %v2372_v63  ;;  %v2385_v39 = vand.u32 4294901760, %v2384_v49  ;;  %4474 = vmatprep.subr.bf16.mxu0 %v4473_v60 }
  0xa1   : > { %v718_v26 = vsub.f32 %v5332_v22, %v8011_v7  ;;  %v7604_v7 = vand.u32 4294901760, %v5359_v59  ;;  %v731_v44 = vand.u32 4294901760, %v730_v45  ;;  %v2402_v57 = vsub.f32 %v5347_v38, %v7603_v30 }
  0xa2   : > { %v7607_v47 = vand.u32 4294901760, %v5368_v5  ;;  %v2391_v35 = vand.u32 4294901760, %v2390_v4  ;;  %v7608_v58 = vand.u32 4294901760, %v5370_v6  ;;  %v4091_v49 = vpack.c.bf16 %v713_v32, %v701_v46 }
  0xa3   : > { %v719_v50 = vand.u32 4294901760, %v718_v26  ;;  %v724_v15 = vsub.f32 %v5359_v59, %v7604_v7  ;;  %v7609_v26 = vand.u32 4294901760, %v5380_v12  ;;  %v2403_v56 = vand.u32 4294901760, %v2402_v57 }
  0xa4   : > { %v736_v45 = vsub.f32 %v5368_v5, %v7607_v47  ;;  %v7612_v63 = vand.u32 4294901760, %v5382_v17  ;;  %v2396_v4 = vsub.f32 %v5370_v6, %v7608_v58  ;;  %v7619_v24 = vand.u32 4294901760, %v5384_v18 }
  0xa5   : > { %v4093_v30 = vpack.c.bf16 %v731_v44, %v719_v50  ;;  %v2408_v7 = vsub.f32 %v5380_v12, %v7609_v26  ;;  %v4475_v60 = vpack.c.bf16 %v2385_v39, %v2373_v48  ;;  %v725_v32 = vand.u32 4294901760, %v724_v15 }
  0xa6   : > { %v742_v46 = vsub.f32 %v5382_v17, %v7612_v63  ;;  %v7616_v57 = vand.u32 4294901760, %v5386_v19  ;;  %v8012_v47 = vmov 0.0   ;;  %v4477_v50 = vpack.c.bf16 %v2403_v56, %v2391_v35 }
  0xa7   : > { %686 = vmatmul.mubr.f32.vlgmr.msra.gmra.mrb[0].mxu1 %v8012_v47  ;;  %v737_v44 = vand.u32 4294901760, %v736_v45  ;;  %v754_v58 = vsub.f32 %v5384_v18, %v7619_v24  ;;  %v7615_v26 = vand.u32 4294901760, %v5401_v53  ;;  %v2397_v52 = vand.u32 4294901760, %v2396_v4  ;;  %2358 = vmatmul.mubr.f32.vlgmr.msra.gmra.mrb[0].mxu0 %v8012_v47 }
  0xa8   : > { %4092 = vmatpush1.bf16.xpose.msra.mxu1 %v4091_v49  ;;  %v2409_v39 = vand.u32 4294901760, %v2408_v7  ;;  %v2414_v48 = vsub.f32 %v5386_v19, %v7616_v57  ;;  %v7617_v15 = vand.u32 4294901760, %v5404_v54  ;;  %v743_v63 = vand.u32 4294901760, %v742_v46  ;;  %4476 = vmatpush1.bf16.xpose.msra.mxu0 %v4475_v60 }
  0xa9   : > { %4094 = vmatprep.subr.bf16.mxu1 %v4093_v30  ;;  %v755_v42 = vand.u32 4294901760, %v754_v58  ;;  %v2426_v35 = vsub.f32 %v5401_v53, %v7615_v26  ;;  %v7618_v56 = vand.u32 4294901760, %v5412_v9  ;;  %v7620_v45 = vand.u32 4294901760, %v5414_v11  ;;  %4478 = vmatprep.subr.bf16.mxu0 %v4477_v50 }
  0xaa   : > { %v2415_v49 = vand.u32 4294901760, %v2414_v48  ;;  %v748_v7 = vsub.f32 %v5404_v54, %v7617_v15  ;;  %v7624_v4 = vand.u32 4294901760, %v5423_v10  ;;  %v4095_v30 = vpack.c.bf16 %v737_v44, %v725_v32 }
  0xab   : > { %v2427_v58 = vand.u32 4294901760, %v2426_v35  ;;  %v760_v46 = vsub.f32 %v5412_v9, %v7618_v56  ;;  %v7625_v26 = vand.u32 4294901760, %v5425_v16  ;;  %v4479_v57 = vpack.c.bf16 %v2409_v39, %v2397_v52  ;;  %v8013_v56 = vld [vmem:[#allocation48_spill] sm:$0xff] }
  0xac   : > { %v2420_v48 = vsub.f32 %v5414_v11, %v7620_v45  ;;  %v2432_v15 = vsub.f32 %v5423_v10, %v7624_v4  ;;  %v7628_v60 = vand.u32 4294901760, %v5427_v20  ;;  %v4097_v32 = vpack.c.bf16 %v755_v42, %v743_v63  ;;  %v8014_v45 = vld [vmem:[#allocation50_spill] sm:$0xff]  ;;  %v8015_v63 = vld [vmem:[#allocation51_spill] sm:$0xff] }
  0xad   : > { %v749_v44 = vand.u32 4294901760, %v748_v7  ;;  %v766_v35 = vsub.f32 %v5425_v16, %v7625_v26  ;;  %v7631_v24 = vand.u32 4294901760, %v8013_v56  ;;  %v4481_v50 = vpack.c.bf16 %v2427_v58, %v2415_v49  ;;  %v8016_v58 = vld [vmem:[#allocation53_spill] sm:$0xff]  ;;  %v8021_v10 = vld [vmem:[#allocation59_spill] sm:$0xff] }
  0xae   : > { %v761_v52 = vand.u32 4294901760, %v760_v46  ;;  %v778_v39 = vsub.f32 %v5427_v20, %v7628_v60  ;;  %v7633_v47 = vand.u32 4294901760, %v8014_v45  ;;  %v2421_v36 = vand.u32 4294901760, %v2420_v48  ;;  %v8017_v48 = vld [vmem:[#allocation54_spill] sm:$0xff] }
  0xaf   : > { %v2433_v4 = vand.u32 4294901760, %v2432_v15  ;;  %v2438_v42 = vsub.f32 %v8013_v56, %v7631_v24  ;;  %v7635_v7 = vand.u32 4294901760, %v8015_v63  ;;  %v767_v26 = vand.u32 4294901760, %v766_v35  ;;  %v8018_v24 = vld [vmem:[#allocation56_spill] sm:$0xff] }
  0xb0   : > { %4096 = vmatpush1.bf16.xpose.msra.mxu1 %v4095_v30  ;;  %v779_v16 = vand.u32 4294901760, %v778_v39  ;;  %v2450_v49 = vsub.f32 %v8014_v45, %v7633_v47  ;;  %v7639_v46 = vand.u32 4294901760, %v8016_v58  ;;  %v7640_v20 = vand.u32 4294901760, %v8017_v48  ;;  %4480 = vmatpush1.bf16.xpose.msra.mxu0 %v4479_v57 }
  0xb1   : > { %4098 = vmatprep.subr.bf16.mxu1 %v4097_v32  ;;  %v2439_v60 = vand.u32 4294901760, %v2438_v42  ;;  %v772_v15 = vsub.f32 %v8015_v63, %v7635_v7  ;;  %v7643_v56 = vand.u32 4294901760, %v8018_v24  ;;  %v8019_v30 = vand.u32 4294901760, %v5592_v8  ;;  %v8020_v32 = vld [vmem:[#allocation58_spill] sm:$0xff]  ;;  %4482 = vmatprep.subr.bf16.mxu0 %v4481_v50 }
  0xb2   : > { %v2451_v39 = vand.u32 4294901760, %v2450_v49  ;;  %v784_v47 = vsub.f32 %v8016_v58, %v7639_v46  ;;  %v7646_v42 = vand.u32 4294901760, %v8020_v32  ;;  %v4099_v45 = vpack.c.bf16 %v761_v52, %v749_v44 }
  0xb3   : > { %v5752_v35 = vsub.f32 %v5592_v8, %v8019_v30  ;;  %v2444_v7 = vsub.f32 %v8017_v48, %v7640_v20  ;;  %v2456_v63 = vsub.f32 %v8018_v24, %v7643_v56  ;;  %v7645_v8 = vand.u32 4294901760, %v8021_v10  ;;  %v8022_v48 = vld [vmem:[#allocation62_spill] sm:$0xff] }
  0xb4   : > { %v4483_v49 = vpack.c.bf16 %v2433_v4, %v2421_v36  ;;  %v4101_v30 = vpack.c.bf16 %v779_v16, %v767_v26  ;;  %v790_v46 = vsub.f32 %v8020_v32, %v7646_v42  ;;  %v7647_v57 = vand.u32 4294901760, %v5491_v23  ;;  %v8023_v16 = vld [vmem:[#allocation63_spill] sm:$0xff]  ;;  %v8025_v42 = vld [vmem:[#allocation68_spill] sm:$0xff] }
  0xb5   : > { %v4485_v44 = vpack.c.bf16 %v2451_v39, %v2439_v60  ;;  %v773_v52 = vand.u32 4294901760, %v772_v15  ;;  %v802_v20 = vsub.f32 %v8021_v10, %v7645_v8  ;;  %v7650_v58 = vand.u32 4294901760, %v8022_v48  ;;  %v8024_v15 = vld [vmem:[#allocation64_spill] sm:$0xff] }
  0xb6   : > { %v785_v56 = vand.u32 4294901760, %v784_v47  ;;  %v2445_v24 = vand.u32 4294901760, %v2444_v7  ;;  %v2462_v36 = vsub.f32 %v5491_v23, %v7647_v57  ;;  %v7652_v26 = vand.u32 4294901760, %v8023_v16  ;;  %v8029_v10 = vld [vmem:[#allocation72_spill] sm:$0xff] }
  0xb7   : > { %v2457_v4 = vand.u32 4294901760, %v2456_v63  ;;  %v791_v50 = vand.u32 4294901760, %v790_v46  ;;  %v2474_v60 = vsub.f32 %v8022_v48, %v7650_v58  ;;  %v7654_v39 = vand.u32 4294901760, %v8024_v15  ;;  %v8026_v58 = vld [vmem:[#allocation69_spill] sm:$0xff] }
  0xb8   : > { %4100 = vmatpush1.bf16.xpose.msra.mxu1 %v4099_v45  ;;  %v803_v8 = vand.u32 4294901760, %v802_v20  ;;  %v796_v47 = vsub.f32 %v8023_v16, %v7652_v26  ;;  %v7658_v7 = vand.u32 4294901760, %v5513_v34  ;;  %v7661_v57 = vand.u32 4294901760, %v8025_v42  ;;  %4484 = vmatpush1.bf16.xpose.msra.mxu0 %v4483_v49 }
  0xb9   : > { %4102 = vmatprep.subr.bf16.mxu1 %v4101_v30  ;;  %v2463_v23 = vand.u32 4294901760, %v2462_v36  ;;  %v2475_v63 = vand.u32 4294901760, %v2474_v60  ;;  %v808_v46 = vsub.f32 %v8024_v15, %v7654_v39  ;;  %v7667_v48 = vand.u32 4294901760, %v8026_v58  ;;  %v8028_v36 = vld [vmem:[#allocation71_spill] sm:$0xff]  ;;  %4486 = vmatprep.subr.bf16.mxu0 %v4485_v44  ;;  %v8032_v44 = vld [vmem:[#allocation76_spill] sm:$0xff] }
  0xba   : > { %v8027_v45 = vand.u32 4294901760, %v5602_v2  ;;  %v2468_v26 = vsub.f32 %v5513_v34, %v7658_v7  ;;  %v2480_v30 = vsub.f32 %v8025_v42, %v7661_v57  ;;  %v7665_v60 = vand.u32 4294901760, %v8028_v36  ;;  %v8030_v34 = vld [vmem:[#allocation73_spill] sm:$0xff] }
  0xbb   : > { %v4103_v16 = vpack.c.bf16 %v785_v56, %v773_v52  ;;  %v4487_v39 = vpack.c.bf16 %v2457_v4, %v2445_v24  ;;  %v814_v15 = vsub.f32 %v8026_v58, %v7667_v48  ;;  %v797_v32 = vand.u32 4294901760, %v796_v47  ;;  %v8031_v56 = vld [vmem:[#allocation75_spill] sm:$0xff] }
  0xbc   : > { %v5793_v20 = vsub.f32 %v5602_v2, %v8027_v45  ;;  %v7666_v2 = vand.u32 4294901760, %v8029_v10  ;;  %v4105_v45 = vpack.c.bf16 %v803_v8, %v791_v50  ;;  %v826_v7 = vsub.f32 %v8028_v36, %v7665_v60 }
  0xbd   : > { %v7668_v57 = vand.u32 4294901760, %v8030_v34  ;;  %v4489_v42 = vpack.c.bf16 %v2475_v63, %v2463_v23  ;;  %v809_v11 = vand.u32 4294901760, %v808_v46  ;;  %v7670_v49 = vand.u32 4294901760, %v8031_v56  ;;  %v8033_v46 = vld [vmem:[#allocation79_spill] sm:$0xff] }
  0xbe   : > { %v2486_v24 = vsub.f32 %v8029_v10, %v7666_v2  ;;  %v2469_v52 = vand.u32 4294901760, %v2468_v26  ;;  %v2481_v4 = vand.u32 4294901760, %v2480_v30  ;;  %v7674_v50 = vand.u32 4294901760, %v8032_v44  ;;  %v8034_v30 = vld [vmem:[#allocation81_spill] sm:$0xff] }
  0xbf   : > { %v2498_v8 = vsub.f32 %v8030_v34, %v7668_v57  ;;  %v815_v47 = vand.u32 4294901760, %v814_v15  ;;  %v820_v23 = vsub.f32 %v8031_v56, %v7670_v49  ;;  %v7675_v63 = vand.u32 4294901760, %v5552_v61  ;;  %v8035_v56 = vld [vmem:[#allocation82_spill] sm:$0xff] }
  0xc0   : > { %v7685_v60 = vand.u32 4294901760, %v8033_v46  ;;  %4104 = vmatpush1.bf16.xpose.msra.mxu1 %v4103_v16  ;;  %v827_v2 = vand.u32 4294901760, %v826_v7  ;;  %v2487_v48 = vand.u32 4294901760, %v2486_v24  ;;  %v832_v26 = vsub.f32 %v8032_v44, %v7674_v50  ;;  %4488 = vmatpush1.bf16.xpose.msra.mxu0 %v4487_v39 }
  0xc1   : > { %4106 = vmatprep.subr.bf16.mxu1 %v4105_v45  ;;  %v2499_v34 = vand.u32 4294901760, %v2498_v8  ;;  %v2492_v15 = vsub.f32 %v5552_v61, %v7675_v63  ;;  %v7689_v16 = vand.u32 4294901760, %v8035_v56  ;;  %v4107_v7 = vpack.c.bf16 %v809_v11, %v797_v32  ;;  %4490 = vmatprep.subr.bf16.mxu0 %v4489_v42  ;;  %v8037_v32 = vld [vmem:[#allocation87_spill] sm:$0xff] }
  0xc2   : > { %v2504_v49 = vsub.f32 %v8033_v46, %v7685_v60  ;;  %v821_v24 = vand.u32 4294901760, %v820_v23  ;;  %v833_v10 = vand.u32 4294901760, %v832_v26  ;;  %v7683_v36 = vand.u32 4294901760, %v5569_v1 }
  0xc3   : > { %v2493_v50 = vand.u32 4294901760, %v2492_v15  ;;  %v8036_v45 = vand.u32 4294901760, %v8034_v30  ;;  %v7679_v63 = vand.u32 4294901760, %v5574_v37  ;;  %v4491_v61 = vpack.c.bf16 %v2481_v4, %v2469_v52 }
  0xc4   : > { %v2505_v57 = vand.u32 4294901760, %v2504_v49  ;;  %v4109_v44 = vpack.c.bf16 %v827_v2, %v815_v47  ;;  %v850_v11 = vsub.f32 %v8035_v56, %v7689_v16  ;;  %v7680_v23 = vand.u32 4294901760, %v8037_v32 }
  0xc5   : > { %v838_v8 = vsub.f32 %v8034_v30, %v8036_v45  ;;  %v4493_v26 = vpack.c.bf16 %v2499_v34, %v2487_v48  ;;  %v2510_v39 = vsub.f32 %v5569_v1, %v7683_v36  ;;  %v2522_v49 = vsub.f32 %v5574_v37, %v7679_v63 }
  0xc6   : > { %v7681_v15 = vand.u32 4294901760, %v5586_v31  ;;  %v4111_v42 = vpack.c.bf16 %v833_v10, %v821_v24  ;;  %v844_v2 = vsub.f32 %v8037_v32, %v7680_v23  ;;  %v7682_v52 = vand.u32 4294901760, %v5588_v51 }
  0xc7   : > { %v7684_v4 = vand.u32 4294901760, %v5596_v33  ;;  %v4495_v34 = vpack.c.bf16 %v2505_v57, %v2493_v50  ;;  %v839_v48 = vand.u32 4294901760, %v838_v8  ;;  %v7686_v45 = vand.u32 4294901760, %v5598_v25 }
  0xc8   : > { %v856_v47 = vsub.f32 %v5586_v31, %v7681_v15  ;;  %4108 = vmatpush1.bf16.xpose.msra.mxu1 %v4107_v7  ;;  %v851_v63 = vand.u32 4294901760, %v850_v11  ;;  %v2516_v10 = vsub.f32 %v5588_v51, %v7682_v52  ;;  %v7687_v23 = vand.u32 4294901760, %v5600_v0  ;;  %4492 = vmatpush1.bf16.xpose.msra.mxu0 %v4491_v61 }
  0xc9   : > { %v2528_v24 = vsub.f32 %v5596_v33, %v7684_v4  ;;  %4110 = vmatprep.subr.bf16.mxu1 %v4109_v44  ;;  %v2511_v57 = vand.u32 4294901760, %v2510_v39  ;;  %v2523_v50 = vand.u32 4294901760, %v2522_v49  ;;  %v862_v8 = vsub.f32 %v5598_v25, %v7686_v45  ;;  %4494 = vmatprep.subr.bf16.mxu0 %v4493_v26 }
  0xca   : > { %v7688_v7 = vand.u32 4294901760, %v5616_v40  ;;  %v845_v11 = vand.u32 4294901760, %v844_v2  ;;  %v857_v15 = vand.u32 4294901760, %v856_v47  ;;  %v874_v52 = vsub.f32 %v5600_v0, %v7687_v23 }
  0xcb   : > { %v7690_v36 = vand.u32 4294901760, %v5618_v41  ;;  %v2517_v4 = vand.u32 4294901760, %v2516_v10  ;;  %v2529_v60 = vand.u32 4294901760, %v2528_v24  ;;  %v7693_v39 = vand.u32 4294901760, %v5631_v3 }
  0xcc   : > { %v2534_v44 = vsub.f32 %v5616_v40, %v7688_v7  ;;  %v863_v49 = vand.u32 4294901760, %v862_v8  ;;  %v875_v45 = vand.u32 4294901760, %v874_v52  ;;  %v7696_v47 = vand.u32 4294901760, %v5670_v29 }
  0xcd   : > { %v2546_v2 = vsub.f32 %v5618_v41, %v7690_v36  ;;  %v4113_v23 = vpack.c.bf16 %v851_v63, %v839_v48  ;;  %v868_v61 = vsub.f32 %v5631_v3, %v7693_v39  ;;  %v7695_v10 = vand.u32 4294901760, %v5752_v35 }
  0xce   : > { %v7694_v24 = vand.u32 4294901760, %v5793_v20  ;;  %v4497_v7 = vpack.c.bf16 %v2523_v50, %v2511_v57  ;;  %v2535_v16 = vand.u32 4294901760, %v2534_v44  ;;  %v4115_v8 = vpack.c.bf16 %v857_v15, %v845_v11 }
  0xcf   : > { %v2547_v26 = vand.u32 4294901760, %v2546_v2  ;;  %v4499_v52 = vpack.c.bf16 %v2529_v60, %v2517_v4  ;;  %v880_v36 = vsub.f32 %v5670_v29, %v7696_v47  ;;  %v7697_v41 = vmov 1.0   ;;  %v8041_v47 = vld [vmem:[#allocation47_spill] sm:$0xff] }
  0xd0   : > { %915 = vmatprep.mubr.f32.mxu1 %v7697_v41  ;;  %2587 = vmatprep.mubr.f32.mxu0 %v7697_v41  ;;  %v4117_v63 = vpack.c.bf16 %v875_v45, %v863_v49  ;;  %v869_v48 = vand.u32 4294901760, %v868_v61  ;;  %v4505_v39 = vpack.c.bf16 %v5301_v55, %v5291_v43  ;;  %v4123_v57 = vpack.c.bf16 %v5320_v13, %v5309_v62  ;;  %v8038_v61 = vld [vmem:[#allocation42_spill] sm:$0xff] }
  0xd1   : > { %4112 = vmatpush1.bf16.xpose.msra.mxu1 %v4111_v42  ;;  %v2540_v60 = vsub.f32 %v5752_v35, %v7695_v10  ;;  %v2552_v15 = vsub.f32 %v5793_v20, %v7694_v24  ;;  %v4507_v42 = vpack.c.bf16 %v5330_v21, %v5323_v14  ;;  %v4125_v4 = vpack.c.bf16 %v5342_v27, %v5332_v22  ;;  %v8040_v10 = vld [vmem:[#allocation46_spill] sm:$0xff]  ;;  %v8052_v21 = vld [vmem:[#allocation63_spill] sm:$0xff]  ;;  %v8057_v27 = vld [vmem:[#allocation72_spill] sm:$0xff] }
  0xd2   : > { %4114 = vmatprep.subr.bf16.mxu1 %v4113_v23  ;;  %v4501_v45 = vpack.c.bf16 %v2547_v26, %v2535_v16  ;;  %v4509_v50 = vpack.c.bf16 %v5347_v38, %v5344_v28  ;;  %v4127_v23 = vpack.c.bf16 %v5368_v5, %v5359_v59  ;;  %v4511_v11 = vpack.c.bf16 %v5380_v12, %v5370_v6  ;;  %v8039_v26 = vld [vmem:[#allocation45_spill] sm:$0xff]  ;;  %v8042_v5 = vld [vmem:[#allocation48_spill] sm:$0xff]  ;;  %v8043_v12 = vld [vmem:[#allocation50_spill] sm:$0xff] }
  0xd3   : > { %4496 = vmatpush1.bf16.xpose.msra.mxu0 %v4495_v34  ;;  %v881_v44 = vand.u32 4294901760, %v880_v36  ;;  %v4129_v49 = vpack.c.bf16 %v5384_v18, %v5382_v17  ;;  %v4513_v2 = vpack.c.bf16 %v5401_v53, %v5386_v19  ;;  %v4131_v16 = vpack.c.bf16 %v5412_v9, %v5404_v54  ;;  %v8044_v36 = vld [vmem:[#allocation51_spill] sm:$0xff]  ;;  %v8045_v6 = vld [vmem:[#allocation53_spill] sm:$0xff]  ;;  %v8046_v18 = vld [vmem:[#allocation54_spill] sm:$0xff] }
  0xd4   : > { %4498 = vmatprep.subr.bf16.mxu0 %v4497_v7  ;;  %v4515_v24 = vpack.c.bf16 %v8039_v26, %v8038_v61  ;;  %v4133_v41 = vpack.c.bf16 %v8041_v47, %v8040_v10  ;;  %v4517_v34 = vpack.c.bf16 %v8043_v12, %v8042_v5  ;;  %v4135_v59 = vpack.c.bf16 %v8045_v6, %v8044_v36  ;;  %v8047_v17 = vld [vmem:[#allocation56_spill] sm:$0xff]  ;;  %v8048_v53 = vld [vmem:[#allocation58_spill] sm:$0xff]  ;;  %v8049_v19 = vld [vmem:[#allocation59_spill] sm:$0xff] }
  0xd5   : > { %v4519_v38 = vpack.c.bf16 %v8047_v17, %v8046_v18  ;;  %v4137_v28 = vpack.c.bf16 %v8049_v19, %v8048_v53  ;;  %v8050_v9 = vld [vmem:[#allocation61_spill] sm:$0xff]  ;;  %v8051_v7 = vld [vmem:[#allocation62_spill] sm:$0xff]  ;;  %v8053_v26 = vld [vmem:[#allocation64_spill] sm:$0xff] }
  0xd6   : > { %v4521_v54 = vpack.c.bf16 %v8051_v7, %v8050_v9  ;;  %v4139_v61 = vpack.c.bf16 %v8053_v26, %v8052_v21  ;;  %v8054_v14 = vld [vmem:[#allocation67_spill] sm:$0xff]  ;;  %v8055_v47 = vld [vmem:[#allocation68_spill] sm:$0xff]  ;;  %v8058_v6 = vld [vmem:[#allocation73_spill] sm:$0xff]  ;;  %v4145_v7 = vpack.c.bf16 %v8035_v56, %v8034_v30  ;;  %v4529_v26 = vpack.c.bf16 %v5574_v37, %v5569_v1 }
  0xd7   : > { %v4523_v10 = vpack.c.bf16 %v8055_v47, %v8054_v14  ;;  %v8056_v12 = vld [vmem:[#allocation71_spill] sm:$0xff]  ;;  %v4525_v36 = vpack.c.bf16 %v8058_v6, %v8057_v27  ;;  %v8060_v17 = vld [vmem:[#allocation76_spill] sm:$0xff]  ;;  %v8061_v13 = vld [vmem:[#allocation78_spill] sm:$0xff]  ;;  %v4147_v47 = vpack.c.bf16 %v5586_v31, %v8037_v32  ;;  %v4531_v14 = vpack.c.bf16 %v5596_v33, %v5588_v51 }
  0xd8   : > { %v4141_v5 = vpack.c.bf16 %v8056_v12, %v8026_v58  ;;  %v8059_v22 = vld [vmem:[#allocation75_spill] sm:$0xff]  ;;  %v4527_v19 = vpack.c.bf16 %v8033_v46, %v8061_v13  ;;  %v4149_v6 = vpack.c.bf16 %v5600_v0, %v5598_v25  ;;  %v4151_v46 = vpack.c.bf16 %v5670_v29, %v5631_v3  ;;  %v8063_v32 = vld [vmem:[#allocation12_spill] sm:$0xff]  ;;  %v8064_v33 = vld [vmem:[#allocation14_spill] sm:$0xff] }
  0xd9   : > { %v4143_v18 = vpack.c.bf16 %v8060_v17, %v8059_v22  ;;  %4116 = vmatpush1.bf16.xpose.msra.mxu1 %v4115_v8  ;;  %v8062_v17 = vld [vmem:[#allocation94_spill] sm:$0xff]  ;;  %v4535_v37 = vpack.c.bf16 %v5793_v20, %v5752_v35  ;;  %v2541_v1 = vand.u32 4294901760, %v2540_v60  ;;  %v2553_v31 = vand.u32 4294901760, %v2552_v15  ;;  %v8091_v60 = vld [vmem:[#allocation77_spill] sm:$0xff]  ;;  %v8092_v15 = vld [vmem:[#allocation83_spill] sm:$0xff] }
  0xda   : > { %v4533_v22 = vpack.c.bf16 %v8062_v17, %v5616_v40  ;;  %4118 = vmatprep.subr.bf16.mxu1 %v4117_v63  ;;  %v4119_v8 = vpack.c.bf16 %v881_v44, %v869_v48  ;;  %v4121_v51 = vpack.c.bf16 %v8064_v33, %v8063_v32  ;;  %v8065_v17 = vmov 1.0   ;;  %v8089_v48 = vld [vmem:[#allocation74_spill] sm:$0xff] }
  0xdb   : > { %4500 = vmatpush1.bf16.xpose.msra.mxu0 %v4499_v52  ;;  %v4503_v13 = vpack.c.bf16 %v2553_v31, %v2541_v1  ;;  %v8066_v63 = vmov 0.0   ;;  %v8078_v1 = vld [vmem:[#allocation43_spill] sm:$0xff]  ;;  %v8080_v31 = vld [vmem:[#allocation44_spill] sm:$0xff]  ;;  %v8088_v52 = vld [vmem:[#allocation70_spill] sm:$0xff] }
  0xdc   : > { %4502 = vmatprep.subr.bf16.mxu0 %v4501_v45  ;;  %v8095_v45 = vld [vmem:[#allocation91_spill] sm:$0xff] }
  0xe1   : > { %4120 = vmatpush1.bf16.xpose.msra.mxu1 %v4119_v8 }
  0xe2   : > { %4122 = vmatprep.subr.bf16.mxu1 %v4121_v51  ;;  %v8081_v51 = vld [vmem:[#allocation49_spill] sm:$0xff] }
  0xe3   : > { %4504 = vmatpush1.bf16.xpose.msra.mxu0 %v4503_v13  ;;  %v8067_v13 = vld [vmem:[#allocation11_spill] sm:$0xff] }
  0xe4   : > { %4506 = vmatprep.subr.bf16.mxu0 %v4505_v39  ;;  %v8084_v39 = vld [vmem:[#allocation57_spill] sm:$0xff] }
  0xe8   : > { %916 = vmatmul.mubr.f32.vlgmr.msra.gmra.mrb[0].mxu1 %v8065_v17 }
  0xe9   : > { %4124 = vmatpush1.bf16.xpose.msra.mxu1 %v4123_v57  ;;  %1049 = vmatprep.mubr.f32.mxu1 %v8066_v63  ;;  %v8090_v57 = vld [vmem:[#allocation80_spill] sm:$0xff] }
  0xea   : > { %4126 = vmatprep.subr.bf16.mxu1 %v4125_v4  ;;  %2588 = vmatmul.mubr.f32.vlgmr.msra.gmra.mrb[0].mxu0 %v8065_v17  ;;  %v8094_v4 = vld [vmem:[#allocation90_spill] sm:$0xff] }
  0xeb   : > { %4508 = vmatpush1.bf16.xpose.msra.mxu0 %v4507_v42  ;;  %2721 = vmatprep.mubr.f32.mxu0 %v8066_v63  ;;  %v8093_v42 = vld [vmem:[#allocation86_spill] sm:$0xff] }
  0xec   : > { %4510 = vmatprep.subr.bf16.mxu0 %v4509_v50  ;;  %v8096_v50 = vld [vmem:[#allocation93_spill] sm:$0xff] }
  0xf1   : > { %4128 = vmatpush1.bf16.xpose.msra.mxu1 %v4127_v23  ;;  %v8097_v23 = vand.u32 4294901760, %v8063_v32  ;;  %v8106_v32 = vld [vmem:[#allocation21_spill] sm:$0xff] }
  0xf2   : > { %4130 = vmatprep.subr.bf16.mxu1 %v4129_v49  ;;  %v8099_v49 = vld [vmem:[#allocation95_spill] sm:$0xff] }
  0xf3   : > { %4512 = vmatpush1.bf16.xpose.msra.mxu0 %v4511_v11  ;;  %v8098_v11 = vand.u32 4294901760, %v8064_v33  ;;  %v8108_v33 = vld [vmem:[#allocation24_spill] sm:$0xff] }
  0xf4   : > { %4514 = vmatprep.subr.bf16.mxu0 %v4513_v2  ;;  %v8100_v2 = vand.u32 4294901760, %v5291_v43  ;;  %v8110_v43 = vld [vmem:[#allocation18_spill] sm:$0xff] }
  0xf5   : > { %v4185_v44 = vpack.c.bf16 %v8098_v11, %v8097_v23  ;;  %v8109_v23 = vand.u32 4294901760, %v8108_v33  ;;  %v8124_v33 = vld [vmem:[#allocation35_spill] sm:$0xff] }
  0xf9   : > { %4132 = vmatpush1.bf16.xpose.msra.mxu1 %v4131_v16  ;;  %v8101_v16 = vand.u32 4294901760, %v5301_v55  ;;  %v8112_v55 = vld [vmem:[#allocation20_spill] sm:$0xff] }
  0xfa   : > { %4134 = vmatprep.subr.bf16.mxu1 %v4133_v41  ;;  %v8082_v41 = vld [vmem:[#allocation55_spill] sm:$0xff] }
  0xfb   : > { %4516 = vmatpush1.bf16.xpose.msra.mxu0 %v4515_v24  ;;  %v8087_v24 = vld [vmem:[#allocation66_spill] sm:$0xff] }
  0xfc   : > { %4518 = vmatprep.subr.bf16.mxu0 %v4517_v34  ;;  %v8103_v34 = vand.u32 4294901760, %v5309_v62 }
 0x101   : > { %4136 = vmatpush1.bf16.xpose.msra.mxu1 %v4135_v59  ;;  %v8068_v59 = vld [vmem:[#allocation13_spill] sm:$0xff] }
 0x102   : > { %4138 = vmatprep.subr.bf16.mxu1 %v4137_v28  ;;  %v8069_v28 = vld [vmem:[#allocation15_spill] sm:$0xff] }
 0x103   : > { %4520 = vmatpush1.bf16.xpose.msra.mxu0 %v4519_v38  ;;  %v8070_v38 = vld [vmem:[#allocation19_spill] sm:$0xff] }
 0x104   : > { %4522 = vmatprep.subr.bf16.mxu0 %v4521_v54  ;;  %v8077_v54 = vld [vmem:[#allocation37_spill] sm:$0xff] }
 0x109   : > { %4140 = vmatpush1.bf16.xpose.msra.mxu1 %v4139_v61  ;;  %v4569_v61 = vpack.c.bf16 %v8101_v16, %v8100_v2  ;;  %v8113_v2 = vand.u32 4294901760, %v8112_v55  ;;  %v8114_v16 = vld [vmem:[#allocation25_spill] sm:$0xff] }
 0x10a   : > { %4142 = vmatprep.subr.bf16.mxu1 %v4141_v5  ;;  %v8071_v5 = vld [vmem:[#allocation16_spill] sm:$0xff] }
 0x10b   : > { %4524 = vmatpush1.bf16.xpose.msra.mxu0 %v4523_v10  ;;  %v8086_v10 = vld [vmem:[#allocation65_spill] sm:$0xff] }
 0x10c   : > { %4526 = vmatprep.subr.bf16.mxu0 %v4525_v36  ;;  %v8104_v36 = vld [vmem:[#allocation17_spill] sm:$0xff] }
 0x111   : > { %4144 = vmatpush1.bf16.xpose.msra.mxu1 %v4143_v18  ;;  %v8075_v18 = vld [vmem:[#allocation28_spill] sm:$0xff] }
 0x112   : > { %4146 = vmatprep.subr.bf16.mxu1 %v4145_v7  ;;  %v8105_v7 = vand.u32 4294901760, %v8104_v36  ;;  %v8120_v36 = vld [vmem:[#allocation29_spill] sm:$0xff] }
 0x113   : > { %4528 = vmatpush1.bf16.xpose.msra.mxu0 %v4527_v19  ;;  %v8076_v19 = vld [vmem:[#allocation32_spill] sm:$0xff] }
 0x114   : > { %4530 = vmatprep.subr.bf16.mxu0 %v4529_v26  ;;  %v8102_v26 = vld [vmem:[#allocation96_spill] sm:$0xff]  ;;  %v4187_v8 = vpack.c.bf16 %v8105_v7, %v8103_v34  ;;  %v8121_v7 = vand.u32 4294901760, %v8120_v36  ;;  %v8136_v36 = vld [vmem:[#allocation41_spill] sm:$0xff] }
 0x119   : > { %4148 = vmatpush1.bf16.xpose.msra.mxu1 %v4147_v47  ;;  %v8085_v47 = vld [vmem:[#allocation60_spill] sm:$0xff] }
 0x11a   : > { %4150 = vmatprep.subr.bf16.mxu1 %v4149_v6  ;;  %v8074_v6 = vld [vmem:[#allocation31_spill] sm:$0xff] }
 0x11b   : > { %4532 = vmatpush1.bf16.xpose.msra.mxu0 %v4531_v14  ;;  %v8072_v14 = vld [vmem:[#allocation22_spill] sm:$0xff] }
 0x11c   : > { %4534 = vmatprep.subr.bf16.mxu0 %v4533_v22  ;;  %v8073_v22 = vld [vmem:[#allocation23_spill] sm:$0xff] }
 0x121   : > { %4152 = vmatpush1.bf16.xpose.msra.mxu1 %v4151_v46  ;;  %v8083_v46 = vld [vmem:[#allocation52_spill] sm:$0xff] }
 0x122   : > { %4154 = vmatprep.subr.bf16.mxu1 %v8067_v13 }
 0x123   : > { %4536 = vmatpush1.bf16.xpose.msra.mxu0 %v4535_v37  ;;  %v8079_v37 = vld [vmem:[#allocation40_spill] sm:$0xff] }
 0x124   : > { %4538 = vmatprep.subr.bf16.mxu0 %v8068_v59 }
 0x128   : > { %1050 = vmatmul.mubr.f32.vlgmr.msra.gmra.mrb[0].mxu1 %v8066_v63 }
 0x129   : > { %4156 = vmatpush1.bf16.xpose.msra.mxu1 %v8069_v28  ;;  %1151 = vmatprep.mubr.f32.mxu1 %v8066_v63 }
 0x12a   : > { %4158 = vmatprep.subr.bf16.mxu1 %v8070_v38  ;;  %2722 = vmatmul.mubr.f32.vlgmr.msra.gmra.mrb[0].mxu0 %v8066_v63 }
 0x12b   : > { %4540 = vmatpush1.bf16.xpose.msra.mxu0 %v8071_v5  ;;  %2823 = vmatprep.mubr.f32.mxu0 %v8066_v63 }
 0x12c   : > { %4542 = vmatprep.subr.bf16.mxu0 %v8072_v14 }
 0x131   : > { %4160 = vmatpush1.bf16.xpose.msra.mxu1 %v8073_v22 }
 0x132   : > { %4162 = vmatprep.subr.bf16.mxu1 %v8074_v6 }
 0x133   : > { %4544 = vmatpush1.bf16.xpose.msra.mxu0 %v8075_v18 }
 0x134   : > { %4546 = vmatprep.subr.bf16.mxu0 %v8076_v19 }
 0x139   : > { %4164 = vmatpush1.bf16.xpose.msra.mxu1 %v8077_v54 }
 0x13a   : > { %4166 = vmatprep.subr.bf16.mxu1 %v8078_v1 }
 0x13b   : > { %4548 = vmatpush1.bf16.xpose.msra.mxu0 %v8079_v37 }
 0x13c   : > { %4550 = vmatprep.subr.bf16.mxu0 %v8080_v31 }
 0x141   : > { %4168 = vmatpush1.bf16.xpose.msra.mxu1 %v8081_v51 }
 0x142   : > { %4170 = vmatprep.subr.bf16.mxu1 %v8082_v41 }
 0x143   : > { %4552 = vmatpush1.bf16.xpose.msra.mxu0 %v8083_v46 }
 0x144   : > { %4554 = vmatprep.subr.bf16.mxu0 %v8084_v39 }
 0x149   : > { %4172 = vmatpush1.bf16.xpose.msra.mxu1 %v8085_v47 }
 0x14a   : > { %4174 = vmatprep.subr.bf16.mxu1 %v8086_v10 }
 0x14b   : > { %4556 = vmatpush1.bf16.xpose.msra.mxu0 %v8087_v24 }
 0x14c   : > { %4558 = vmatprep.subr.bf16.mxu0 %v8088_v52 }
 0x151   : > { %4176 = vmatpush1.bf16.xpose.msra.mxu1 %v8089_v48 }
 0x152   : > { %4178 = vmatprep.subr.bf16.mxu1 %v8090_v57 }
 0x153   : > { %4560 = vmatpush1.bf16.xpose.msra.mxu0 %v8091_v60 }
 0x154   : > { %4562 = vmatprep.subr.bf16.mxu0 %v8092_v15 }
 0x159   : > { %4180 = vmatpush1.bf16.xpose.msra.mxu1 %v8093_v42 }
 0x15a   : > { %4182 = vmatprep.subr.bf16.mxu1 %v8094_v4 }
 0x15b   : > { %4564 = vmatpush1.bf16.xpose.msra.mxu0 %v8095_v45 }
 0x15c   : > { %4566 = vmatprep.subr.bf16.mxu0 %v8096_v50  ;;  %v8107_v50 = vand.u32 4294901760, %v8106_v32 }
 0x15e   : > { %v4189_v11 = vpack.c.bf16 %v8109_v23, %v8107_v50  ;;  %v8118_v50 = vld [vmem:[#allocation27_spill] sm:$0xff]  ;;  %v8125_v23 = vand.u32 4294901760, %v8124_v33 }
 0x15f   : > { %v8119_v34 = vand.u32 4294901760, %v8118_v50  ;;  %v8134_v50 = vld [vmem:[#allocation39_spill] sm:$0xff] }
 0x161   : > { %4184 = vmatpush1.bf16.xpose.msra.mxu1 %v8099_v49  ;;  %v8111_v49 = vand.u32 4294901760, %v8110_v43  ;;  %v8126_v43 = vld [vmem:[#allocation30_spill] sm:$0xff] }
 0x162   : > { %4186 = vmatprep.subr.bf16.mxu1 %v4185_v44  ;;  %v8127_v55 = vand.u32 4294901760, %v8126_v43 }
 0x163   : > { %4568 = vmatpush1.bf16.xpose.msra.mxu0 %v8102_v26  ;;  %v4571_v44 = vpack.c.bf16 %v8113_v2, %v8111_v49  ;;  %v8116_v26 = vld [vmem:[#allocation26_spill] sm:$0xff]  ;;  %v4191_v49 = vpack.c.bf16 %v8121_v7, %v8119_v34  ;;  %v8128_v2 = vld [vmem:[#allocation33_spill] sm:$0xff]  ;;  %v8135_v34 = vand.u32 4294901760, %v8134_v50  ;;  %v8137_v7 = vand.u32 4294901760, %v8136_v36 }
 0x164   : > { %4570 = vmatprep.subr.bf16.mxu0 %v4569_v61  ;;  %v8115_v61 = vand.u32 4294901760, %v8114_v16  ;;  %v8117_v62 = vand.u32 4294901760, %v8116_v26 }
 0x166   : > { %v4573_v45 = vpack.c.bf16 %v8117_v62, %v8115_v61  ;;  %v8132_v62 = vld [vmem:[#allocation38_spill] sm:$0xff] }
 0x168   : > { %1152 = vmatmul.mubr.f32.vlgmr.msra.gmra.mrb[0].mxu1 %v8066_v63 }
 0x169   : > { %4188 = vmatpush1.bf16.xpose.msra.mxu1 %v4187_v8  ;;  %1317 = vmatprep.mubr.f32.mxu1 %v8065_v17  ;;  %v8122_v8 = vld [vmem:[#allocation34_spill] sm:$0xff] }
 0x16a   : > { %4190 = vmatprep.subr.bf16.mxu1 %v4189_v11  ;;  %2824 = vmatmul.mubr.f32.vlgmr.msra.gmra.mrb[0].mxu0 %v8066_v63  ;;  %v8123_v32 = vand.u32 4294901760, %v8122_v8  ;;  %v8129_v11 = vand.u32 4294901760, %v8128_v2  ;;  %v4195_v8 = vpack.c.bf16 %v8137_v7, %v8135_v34  ;;  %v8152_v34 = vld [vmem:[#allocation53_spill] sm:$0xff] }
 0x16b   : > { %4572 = vmatpush1.bf16.xpose.msra.mxu0 %v4571_v44  ;;  %2989 = vmatprep.mubr.f32.mxu0 %v8065_v17  ;;  %v8130_v44 = vld [vmem:[#allocation36_spill] sm:$0xff]  ;;  %v8153_v36 = vand.u32 4294901760, %v8152_v34 }
 0x16c   : > { %4574 = vmatprep.subr.bf16.mxu0 %v4573_v45  ;;  %v4193_v26 = vpack.c.bf16 %v8125_v23, %v8123_v32  ;;  %v4575_v16 = vpack.c.bf16 %v8129_v11, %v8127_v55  ;;  %v8131_v61 = vand.u32 4294901760, %v8130_v44  ;;  %v8133_v45 = vand.u32 4294901760, %v8132_v62  ;;  %v8138_v32 = vld [vmem:[#allocation46_spill] sm:$0xff]  ;;  %v8140_v23 = vld [vmem:[#allocation47_spill] sm:$0xff]  ;;  %v8144_v11 = vld [vmem:[#allocation45_spill] sm:$0xff] }
 0x16d   : > { %v8139_v33 = vand.u32 4294901760, %v8138_v32  ;;  %v8141_v43 = vand.u32 4294901760, %v8140_v23  ;;  %v8142_v55 = vld [vmem:[#allocation42_spill] sm:$0xff]  ;;  %v8145_v44 = vand.u32 4294901760, %v8144_v11  ;;  %v8154_v32 = vand.u32 4294901760, %v8048_v53  ;;  %v8165_v53 = vld [vmem:[#allocation64_spill] sm:$0xff] }
 0x16e   : > { %v4577_v63 = vpack.c.bf16 %v8133_v45, %v8131_v61  ;;  %v8146_v61 = vld [vmem:[#allocation48_spill] sm:$0xff]  ;;  %v8150_v45 = vld [vmem:[#allocation51_spill] sm:$0xff] }
 0x16f   : > { %v4197_v2 = vpack.c.bf16 %v8141_v43, %v8139_v33  ;;  %v8151_v50 = vand.u32 4294901760, %v8150_v45  ;;  %v8155_v33 = vld [vmem:[#allocation59_spill] sm:$0xff]  ;;  %v8167_v45 = vand.u32 4294901760, %v8026_v58  ;;  %v8178_v58 = vld [vmem:[#allocation76_spill] sm:$0xff] }
 0x170   : > { %v8156_v23 = vand.u32 4294901760, %v8155_v33 }
 0x171   : > { %4192 = vmatpush1.bf16.xpose.msra.mxu1 %v4191_v49  ;;  %v8143_v49 = vand.u32 4294901760, %v8142_v55  ;;  %v4199_v7 = vpack.c.bf16 %v8153_v36, %v8151_v50  ;;  %v8157_v55 = vld [vmem:[#allocation54_spill] sm:$0xff]  ;;  %v8168_v50 = vand.u32 4294901760, %v8056_v12  ;;  %v8169_v36 = vld [vmem:[#allocation67_spill] sm:$0xff] }
 0x172   : > { %4194 = vmatprep.subr.bf16.mxu1 %v4193_v26  ;;  %v8147_v26 = vand.u32 4294901760, %v8146_v61  ;;  %v4201_v43 = vpack.c.bf16 %v8156_v23, %v8154_v32  ;;  %v8171_v32 = vld [vmem:[#allocation68_spill] sm:$0xff]  ;;  %v8173_v23 = vand.u32 4294901760, %v8057_v27 }
 0x173   : > { %4576 = vmatpush1.bf16.xpose.msra.mxu0 %v4575_v16  ;;  %v4579_v4 = vpack.c.bf16 %v8145_v44, %v8143_v49  ;;  %v8148_v16 = vld [vmem:[#allocation50_spill] sm:$0xff]  ;;  %v8159_v49 = vld [vmem:[#allocation56_spill] sm:$0xff]  ;;  %v4205_v34 = vpack.c.bf16 %v8168_v50, %v8167_v45  ;;  %v8188_v45 = vld [vmem:[#allocation85_spill] sm:$0xff] }
 0x174   : > { %4578 = vmatprep.subr.bf16.mxu0 %v4577_v63  ;;  %v8149_v63 = vand.u32 4294901760, %v8148_v16  ;;  %v8160_v11 = vand.u32 4294901760, %v8159_v49  ;;  %v8164_v16 = vand.u32 4294901760, %v8052_v21  ;;  %v8176_v21 = vld [vmem:[#allocation75_spill] sm:$0xff]  ;;  %v8189_v50 = vand.u32 4294901760, %v8188_v45  ;;  %v236_v45 = vld [vmem:[%s5243_s3 + $0xf8] sm:$0xff] }
 0x175   : > { %v8177_v49 = vand.u32 4294901760, %v8176_v21 }
 0x176   : > { %v4581_v62 = vpack.c.bf16 %v8149_v63, %v8147_v26  ;;  %v8166_v63 = vand.u32 4294901760, %v8165_v53 }
 0x179   : > { %4196 = vmatpush1.bf16.xpose.msra.mxu1 %v4195_v8  ;;  %v8158_v8 = vand.u32 4294901760, %v8157_v55 }
 0x17a   : > { %4198 = vmatprep.subr.bf16.mxu1 %v4197_v2  ;;  %v8161_v2 = vand.u32 4294901760, %v8050_v9  ;;  %v8172_v9 = vand.u32 4294901760, %v8171_v32 }
 0x17b   : > { %4580 = vmatpush1.bf16.xpose.msra.mxu0 %v4579_v4  ;;  %v4583_v44 = vpack.c.bf16 %v8160_v11, %v8158_v8  ;;  %v8162_v4 = vld [vmem:[#allocation62_spill] sm:$0xff]  ;;  %v8179_v11 = vand.u32 4294901760, %v8178_v58  ;;  %v8200_v58 = vand.u32 4294901760, %v5616_v40 }
 0x17c   : > { %4582 = vmatprep.subr.bf16.mxu0 %v4581_v62  ;;  %v8163_v61 = vand.u32 4294901760, %v8162_v4  ;;  %v4203_v62 = vpack.c.bf16 %v8166_v63, %v8164_v16  ;;  %v8184_v16 = vld [vmem:[#allocation79_spill] sm:$0xff]  ;;  %v8186_v63 = vld [vmem:[#allocation84_spill] sm:$0xff]  ;;  %v208_v40 = vld [vmem:[%s5243_s3 + $0x18] sm:$0xff] }
 0x17d   : > { %v4207_v12 = vpack.c.bf16 %v8179_v11, %v8177_v49  ;;  %v8185_v27 = vand.u32 4294901760, %v8184_v16  ;;  %v8201_v11 = vld [vmem:[#allocation94_spill] sm:$0xff] }
 0x17e   : > { %v4585_v26 = vpack.c.bf16 %v8163_v61, %v8161_v2  ;;  %v8181_v2 = vand.u32 4294901760, %v8035_v56  ;;  %v8182_v61 = vld [vmem:[#allocation78_spill] sm:$0xff] }
 0x181   : > { %4200 = vmatpush1.bf16.xpose.msra.mxu1 %v4199_v7  ;;  %v8170_v7 = vand.u32 4294901760, %v8169_v36  ;;  %v8190_v36 = vld [vmem:[#allocation87_spill] sm:$0xff] }
 0x182   : > { %4202 = vmatprep.subr.bf16.mxu1 %v4201_v43  ;;  %v8174_v43 = vld [vmem:[#allocation73_spill] sm:$0xff] }
 0x183   : > { %4584 = vmatpush1.bf16.xpose.msra.mxu0 %v4583_v44  ;;  %v4587_v33 = vpack.c.bf16 %v8172_v9, %v8170_v7  ;;  %v8175_v55 = vand.u32 4294901760, %v8174_v43  ;;  %v8180_v44 = vand.u32 4294901760, %v8034_v30  ;;  %v8191_v7 = vand.u32 4294901760, %v8190_v36  ;;  %v8192_v30 = vld [vmem:[#allocation88_spill] sm:$0xff]  ;;  %v8196_v43 = vld [vmem:[#allocation89_spill] sm:$0xff] }
 0x184   : > { %4586 = vmatprep.subr.bf16.mxu0 %v4585_v26  ;;  %v8183_v26 = vand.u32 4294901760, %v8182_v61  ;;  %v8193_v32 = vand.u32 4294901760, %v8192_v30  ;;  %v8194_v9 = vand.u32 4294901760, %v5598_v25  ;;  %v8204_v25 = vand.u32 4294901760, %v5670_v29  ;;  %v336_v29 = vld [vmem:[%s5250_s29 + $0x18] sm:$0xff] }
 0x185   : > { %v4589_v8 = vpack.c.bf16 %v8175_v55, %v8173_v23  ;;  %v4209_v4 = vpack.c.bf16 %v8181_v2, %v8180_v44  ;;  %v8197_v55 = vand.u32 4294901760, %v8196_v43  ;;  %v8203_v2 = vand.u32 4294901760, %v5631_v3  ;;  %v216_v3 = vld [vmem:[%s5243_s3 + $0x58] sm:$0xff] }
 0x186   : > { %v4591_v53 = vpack.c.bf16 %v8185_v27, %v8183_v26  ;;  %v4211_v56 = vpack.c.bf16 %v8193_v32, %v8191_v7  ;;  %v8206_v61 = vand.u32 4294901760, %v5793_v20  ;;  %v212_v20 = vld [vmem:[%s5243_s3 + $0x38] sm:$0xff] }
 0x187   : > { %v228_v27 = vld [vmem:[%s5243_s3 + $0xb8] sm:$0xff] }
 0x189   : > { %4204 = vmatpush1.bf16.xpose.msra.mxu1 %v4203_v62  ;;  %v8187_v62 = vand.u32 4294901760, %v8186_v63 }
 0x18a   : > { %4206 = vmatprep.subr.bf16.mxu1 %v4205_v34 }
 0x18b   : > { %4588 = vmatpush1.bf16.xpose.msra.mxu0 %v4587_v33  ;;  %v4593_v34 = vpack.c.bf16 %v8189_v50, %v8187_v62  ;;  %v8195_v33 = vand.u32 4294901760, %v5600_v0  ;;  %v4215_v0 = vpack.c.bf16 %v8204_v25, %v8203_v2  ;;  %v356_v50 = vld [vmem:[%s5250_s29 + $0xb8] sm:$0xff]  ;;  %v359_v2 = vld [vmem:[%s5250_s29 + $0xd0] sm:$0xff] }
 0x18c   : > { %4590 = vmatprep.subr.bf16.mxu0 %v4589_v8  ;;  %v8198_v8 = vld [vmem:[#allocation92_spill] sm:$0xff]  ;;  %v484_v43 = vmul.f32 %v356_v50, %v228_v27  ;;  %v240_v25 = vld [vmem:[%s5243_s3 + $0x118] sm:$0xff] }
 0x18d   : > { %v4213_v23 = vpack.c.bf16 %v8195_v33, %v8194_v9  ;;  %v8199_v21 = vand.u32 4294901760, %v8198_v8  ;;  %v8212_v9 = vld [vmem:[#allocation95_spill] sm:$0xff]  ;;  %v223_v8 = vld [vmem:[%s5243_s3 + $0x90] sm:$0xff] }
 0x18e   : > { %v367_v50 = vld [vmem:[%s5250_s29 + $0x110] sm:$0xff] }
 0x18f   : > { %v4595_v49 = vpack.c.bf16 %v8199_v21, %v8197_v55  ;;  %v351_v21 = vld [vmem:[%s5250_s29 + $0x90] sm:$0xff] }
 0x191   : > { %4208 = vmatpush1.bf16.xpose.msra.mxu1 %v4207_v12  ;;  %v8202_v12 = vand.u32 4294901760, %v8201_v11 }
 0x192   : > { %4210 = vmatprep.subr.bf16.mxu1 %v4209_v4  ;;  %v8205_v4 = vand.u32 4294901760, %v5752_v35  ;;  %v344_v35 = vld [vmem:[%s5250_s29 + $0x58] sm:$0xff] }
 0x193   : > { %4592 = vmatpush1.bf16.xpose.msra.mxu0 %v4591_v53  ;;  %v4597_v44 = vpack.c.bf16 %v8202_v12, %v8200_v58 }
 0x194   : > { %4594 = vmatprep.subr.bf16.mxu0 %v4593_v34  ;;  %v4599_v26 = vpack.c.bf16 %v8206_v61, %v8205_v4  ;;  %v364_v34 = vld [vmem:[%s5250_s29 + $0xf8] sm:$0xff] }
 0x195   : > { %v492_v55 = vmul.f32 %v364_v34, %v236_v45  ;;  %v248_v61 = vld [vmem:[%s5243_s3 + $0x158] sm:$0xff]  ;;  %v247_v45 = vld [vmem:[%s5243_s3 + $0x150] sm:$0xff] }
 0x196   : > { %v375_v34 = vld [vmem:[%s5250_s29 + $0x150] sm:$0xff] }
 0x199   : > { %4212 = vmatpush1.bf16.xpose.msra.mxu1 %v4211_v56 }
 0x19a   : > { %4214 = vmatprep.subr.bf16.mxu1 %v4213_v23 }
 0x19b   : > { %4596 = vmatpush1.bf16.xpose.msra.mxu0 %v4595_v49 }
 0x19c   : > { %4598 = vmatprep.subr.bf16.mxu0 %v4597_v44  ;;  %v231_v44 = vld [vmem:[%s5243_s3 + $0xd0] sm:$0xff] }
 0x1a1   : > { %4216 = vmatpush1.bf16.xpose.msra.mxu1 %v4215_v0 }
 0x1a2   : > { %4218 = vmatprep.subr.bf16.mxu1 %v8067_v13  ;;  %v464_v13 = vmul.f32 %v336_v29, %v208_v40  ;;  %v376_v40 = vld [vmem:[%s5250_s29 + $0x158] sm:$0xff]  ;;  %v479_v29 = vmul.f32 %v351_v21, %v223_v8 }
 0x1a3   : > { %4600 = vmatpush1.bf16.xpose.msra.mxu0 %v4599_v26  ;;  %v368_v26 = vld [vmem:[%s5250_s29 + $0x118] sm:$0xff] }
 0x1a4   : > { %4602 = vmatprep.subr.bf16.mxu0 %v8068_v59  ;;  %v472_v59 = vmul.f32 %v344_v35, %v216_v3  ;;  %v8216_v3 = vld [vmem:[#allocation96_spill] sm:$0xff]  ;;  %v256_v8 = vld [vmem:[%s5243_s3 + $0x198] sm:$0xff] }
 0x1a5   : > { %v227_v35 = vld [vmem:[%s5243_s3 + $0xb0] sm:$0xff] }
 0x1a8   : > { %1318 = vmatmul.mubr.f32.vlgmr.msra.gmra.mrb[0].mxu1 %v8065_v17 }
 0x1a9   : > { %4220 = vmatpush1.bf16.xpose.msra.mxu1 %v8069_v28  ;;  %1419 = vmatprep.mubr.f32.mxu1 %v8065_v17  ;;  %v220_v28 = vld [vmem:[%s5243_s3 + $0x78] sm:$0xff] }
 0x1aa   : > { %4222 = vmatprep.subr.bf16.mxu1 %v8070_v38  ;;  %2990 = vmatmul.mubr.f32.vlgmr.msra.gmra.mrb[0].mxu0 %v8065_v17  ;;  %v340_v38 = vld [vmem:[%s5250_s29 + $0x38] sm:$0xff] }
 0x1ab   : > { %4604 = vmatpush1.bf16.xpose.msra.mxu0 %v8071_v5  ;;  %3091 = vmatprep.mubr.f32.mxu0 %v8065_v17  ;;  %v348_v5 = vld [vmem:[%s5250_s29 + $0x78] sm:$0xff] }
 0x1ac   : > { %4606 = vmatprep.subr.bf16.mxu0 %v8072_v14  ;;  %v468_v14 = vmul.f32 %v340_v38, %v212_v20  ;;  %v355_v20 = vld [vmem:[%s5250_s29 + $0xb0] sm:$0xff]  ;;  %v3105_v38 = vand.u32 4294901760, %v484_v43 }
 0x1b1   : > { %4224 = vmatpush1.bf16.xpose.msra.mxu1 %v8073_v22  ;;  %v476_v22 = vmul.f32 %v348_v5, %v220_v28  ;;  %v3109_v5 = vand.u32 4294901760, %v492_v55 }
 0x1b2   : > { %4226 = vmatprep.subr.bf16.mxu1 %v8074_v6  ;;  %v207_v6 = vld [vmem:[%s5243_s3 + $0x10] sm:$0xff] }
 0x1b3   : > { %4608 = vmatpush1.bf16.xpose.msra.mxu0 %v8075_v18  ;;  %v215_v18 = vld [vmem:[%s5243_s3 + $0x50] sm:$0xff] }
 0x1b4   : > { %4610 = vmatprep.subr.bf16.mxu0 %v8076_v19  ;;  %v335_v19 = vld [vmem:[%s5250_s29 + $0x10] sm:$0xff] }
 0x1b9   : > { %4228 = vmatpush1.bf16.xpose.msra.mxu1 %v8077_v54  ;;  %v8207_v54 = vld [vmem:[#allocation90_spill] sm:$0xff] }
 0x1ba   : > { %4230 = vmatprep.subr.bf16.mxu1 %v8078_v1  ;;  %v1425_v1 = vand.u32 4294901760, %v464_v13 }
 0x1bb   : > { %4612 = vmatpush1.bf16.xpose.msra.mxu0 %v8079_v37  ;;  %v1429_v37 = vand.u32 4294901760, %v472_v59 }
 0x1bc   : > { %4614 = vmatprep.subr.bf16.mxu0 %v8080_v31  ;;  %v343_v31 = vld [vmem:[%s5250_s29 + $0x50] sm:$0xff]  ;;  %v6202_v30 = vsub.f32 %v464_v13, %v1425_v1 }
 0x1bd   : > { %v6190_v16 = vmul.f32 %v343_v31, %v215_v18  ;;  %v6193_v53 = vpack.c.bf16 %v1429_v37, %v1425_v1  ;;  %v6204_v32 = vsub.f32 %v472_v59, %v1429_v37  ;;  %v244_v18 = vld [vmem:[%s5243_s3 + $0x138] sm:$0xff]  ;;  %v6251_v1 = vmul.f32 %v376_v40, %v248_v61  ;;  %v263_v59 = vld [vmem:[%s5243_s3 + $0x1d0] sm:$0xff] }
 0x1be   : > { %8211 = vst [vmem:[#allocation81_spill] sm:$0xff] %v6202_v30  ;;  %v252_v37 = vld [vmem:[%s5243_s3 + $0x178] sm:$0xff]  ;;  %v503_v40 = vmul.f32 %v375_v34, %v247_v45  ;;  %v391_v13 = vld [vmem:[%s5250_s29 + $0x1d0] sm:$0xff] }
 0x1bf   : > { %8210 = vst [vmem:[#allocation69_spill] sm:$0xff] %v6193_v53  ;;  %v7730_v23 = vand.u32 4294901760, %v6190_v16  ;;  %v372_v31 = vld [vmem:[%s5250_s29 + $0x138] sm:$0xff] }
 0x1c1   : > { %4232 = vmatpush1.bf16.xpose.msra.mxu1 %v8081_v51  ;;  %v211_v51 = vld [vmem:[%s5243_s3 + $0x30] sm:$0xff] }
 0x1c2   : > { %4234 = vmatprep.subr.bf16.mxu1 %v8082_v41  ;;  %v224_v41 = vld [vmem:[%s5243_s3 + $0x98] sm:$0xff] }
 0x1c3   : > { %4616 = vmatpush1.bf16.xpose.msra.mxu0 %v8083_v46  ;;  %v232_v46 = vld [vmem:[%s5243_s3 + $0xd8] sm:$0xff] }
 0x1c4   : > { %4618 = vmatprep.subr.bf16.mxu0 %v8084_v39  ;;  %v352_v39 = vld [vmem:[%s5250_s29 + $0x98] sm:$0xff] }
 0x1c5   : > { %v6195_v63 = vmul.f32 %v352_v39, %v224_v41  ;;  %v6260_v39 = vmul.f32 %v355_v20, %v227_v35 }
 0x1c7   : > { %v7729_v11 = vand.u32 4294901760, %v6195_v63 }
 0x1c9   : > { %4236 = vmatpush1.bf16.xpose.msra.mxu1 %v8085_v47  ;;  %v360_v47 = vld [vmem:[%s5250_s29 + $0xd8] sm:$0xff] }
 0x1ca   : > { %4238 = vmatprep.subr.bf16.mxu1 %v8086_v10  ;;  %v8208_v10 = vld [vmem:[#allocation91_spill] sm:$0xff]  ;;  %v6197_v62 = vmul.f32 %v360_v47, %v232_v46 }
 0x1cb   : > { %4620 = vmatpush1.bf16.xpose.msra.mxu0 %v8087_v24  ;;  %v6184_v24 = vmul.f32 %v335_v19, %v207_v6  ;;  %v363_v6 = vld [vmem:[%s5250_s29 + $0xf0] sm:$0xff] }
 0x1cc   : > { %4622 = vmatprep.subr.bf16.mxu0 %v8088_v52  ;;  %v219_v52 = vld [vmem:[%s5243_s3 + $0x70] sm:$0xff]  ;;  %v7728_v12 = vand.u32 4294901760, %v6197_v62 }
 0x1cd   : > { %v7731_v56 = vand.u32 4294901760, %v6184_v24 }
 0x1ce   : > { %v6247_v19 = vpack.c.bf16 %v7728_v12, %v7729_v11  ;;  %v6366_v11 = vmul.f32 %v391_v13, %v263_v59  ;;  %v284_v13 = vld [vmem:[%s5243_s3 + $0x278] sm:$0xff] }
 0x1cf   : > { %v6238_v28 = vpack.c.bf16 %v7730_v23, %v7731_v56  ;;  %v276_v23 = vld [vmem:[%s5243_s3 + $0x238] sm:$0xff] }
 0x1d0   : > { %8218 = vst [vmem:[#allocation71_spill] sm:$0xff] %v6247_v19  ;;  %v404_v59 = vld [vmem:[%s5250_s29 + $0x238] sm:$0xff] }
 0x1d1   : > { %4240 = vmatpush1.bf16.xpose.msra.mxu1 %v8089_v48  ;;  %v339_v48 = vld [vmem:[%s5250_s29 + $0x30] sm:$0xff]  ;;  %8217 = vst [vmem:[#allocation63_spill] sm:$0xff] %v6238_v28 }
 0x1d2   : > { %4242 = vmatprep.subr.bf16.mxu1 %v8090_v57  ;;  %v347_v57 = vld [vmem:[%s5250_s29 + $0x70] sm:$0xff]  ;;  %v467_v36 = vmul.f32 %v339_v48, %v211_v51  ;;  %v380_v51 = vld [vmem:[%s5250_s29 + $0x178] sm:$0xff] }
 0x1d3   : > { %4624 = vmatpush1.bf16.xpose.msra.mxu0 %v8091_v60  ;;  %v8209_v60 = vld [vmem:[#allocation93_spill] sm:$0xff]  ;;  %v475_v7 = vmul.f32 %v347_v57, %v219_v52  ;;  %v1435_v52 = vand.u32 4294901760, %v479_v29  ;;  %v508_v27 = vmul.f32 %v380_v51, %v252_v37 }
 0x1d4   : > { %4626 = vmatprep.subr.bf16.mxu0 %v8092_v15  ;;  %v3097_v15 = vand.u32 4294901760, %v468_v14  ;;  %v3099_v0 = vand.u32 4294901760, %v467_v36  ;;  %v239_v57 = vld [vmem:[%s5243_s3 + $0x110] sm:$0xff] }
 0x1d5   : > { %v3103_v4 = vand.u32 4294901760, %v475_v7 }
 0x1d6   : > { %v6214_v49 = vsub.f32 %v468_v14, %v3097_v15  ;;  %v487_v14 = vmul.f32 %v359_v2, %v231_v44  ;;  %v6258_v46 = vsub.f32 %v467_v36, %v3099_v0  ;;  %v8223_v36 = vmov 0.0  }
 0x1d7   : > { %v6256_v41 = vpack.c.bf16 %v3103_v4, %v3099_v0  ;;  %v6263_v47 = vsub.f32 %v475_v7, %v3103_v4  ;;  %v6278_v7 = vsub.f32 %v492_v55, %v3109_v5  ;;  %v6286_v44 = vsub.f32 %v479_v29, %v1435_v52  ;;  %v264_v55 = vld [vmem:[%s5243_s3 + $0x1d8] sm:$0xff]  ;;  %v371_v29 = vld [vmem:[%s5250_s29 + $0x130] sm:$0xff] }
 0x1d8   : > { %8214 = vst [vmem:[#allocation58_spill] sm:$0xff] %v6214_v49  ;;  %8220 = vst [vmem:[#allocation12_spill] sm:$0xff] %v6258_v46  ;;  %v384_v0 = vld [vmem:[%s5250_s29 + $0x198] sm:$0xff] }
 0x1d9   : > { %4244 = vmatpush1.bf16.xpose.msra.mxu1 %v8093_v42  ;;  %v3101_v42 = vand.u32 4294901760, %v476_v22  ;;  %8219 = vst [vmem:[#allocation72_spill] sm:$0xff] %v6256_v41  ;;  %8224 = vst [vmem:[#allocation13_spill] sm:$0xff] %v6278_v7  ;;  %v392_v4 = vld [vmem:[%s5250_s29 + $0x1d8] sm:$0xff] }
 0x1da   : > { %4246 = vmatprep.subr.bf16.mxu1 %v8207_v54  ;;  %v6249_v54 = vmul.f32 %v368_v26, %v240_v25  ;;  %8225 = vst [vmem:[#allocation15_spill] sm:$0xff] %v6286_v44  ;;  %v7727_v25 = vand.u32 4294901760, %v6260_v39  ;;  %v495_v26 = vmul.f32 %v367_v50, %v239_v57  ;;  %v6317_v51 = vmul.f32 %v392_v4, %v264_v55  ;;  %v388_v57 = vld [vmem:[%s5250_s29 + $0x1b8] sm:$0xff] }
 0x1db   : > { %4628 = vmatpush1.bf16.xpose.msra.mxu0 %v8208_v10  ;;  %v6208_v33 = vpack.c.bf16 %v3101_v42, %v3097_v15  ;;  %v6216_v58 = vsub.f32 %v476_v22, %v3101_v42  ;;  %v235_v22 = vld [vmem:[%s5243_s3 + $0xf0] sm:$0xff]  ;;  %v6265_v10 = vsub.f32 %v484_v43, %v3105_v38  ;;  %v1439_v15 = vand.u32 4294901760, %v487_v14 }
 0x1dc   : > { %4630 = vmatprep.subr.bf16.mxu0 %v8209_v60  ;;  %v6267_v48 = vmul.f32 %v363_v6, %v235_v22  ;;  %v6271_v60 = vpack.c.bf16 %v3109_v5, %v3105_v38  ;;  %v500_v42 = vmul.f32 %v372_v31, %v244_v18  ;;  %v7724_v43 = vand.u32 4294901760, %v6251_v1  ;;  %v379_v22 = vld [vmem:[%s5250_s29 + $0x170] sm:$0xff]  ;;  %v260_v6 = vld [vmem:[%s5243_s3 + $0x1b8] sm:$0xff] }
 0x1dd   : > { %8213 = vst [vmem:[#allocation82_spill] sm:$0xff] %v6208_v33  ;;  %8215 = vst [vmem:[#allocation61_spill] sm:$0xff] %v6216_v58  ;;  %v6288_v2 = vsub.f32 %v487_v14, %v1439_v15  ;;  %v6302_v20 = vpack.c.bf16 %v1439_v15, %v1435_v52  ;;  %v3117_v5 = vand.u32 4294901760, %v508_v27  ;;  %v251_v14 = vld [vmem:[%s5243_s3 + $0x170] sm:$0xff]  ;;  %v6315_v31 = vmul.f32 %v384_v0, %v256_v8  ;;  %v268_v52 = vld [vmem:[%s5243_s3 + $0x1f8] sm:$0xff] }
 0x1de   : > { %8221 = vst [vmem:[#allocation14_spill] sm:$0xff] %v6265_v10  ;;  %8222 = vst [vmem:[#allocation11_spill] sm:$0xff] %v6271_v60  ;;  %v7726_v61 = vand.u32 4294901760, %v6267_v48  ;;  %v3113_v38 = vand.u32 4294901760, %v500_v42  ;;  %v396_v15 = vld [vmem:[%s5250_s29 + $0x1f8] sm:$0xff]  ;;  %v1443_v34 = vand.u32 4294901760, %v495_v26  ;;  %v6330_v8 = vmul.f32 %v379_v22, %v251_v14 }
 0x1df   : > { %8226 = vst [vmem:[#allocation19_spill] sm:$0xff] %v6288_v2  ;;  %8227 = vst [vmem:[#allocation16_spill] sm:$0xff] %v6302_v20  ;;  %v1447_v18 = vand.u32 4294901760, %v503_v40  ;;  %v516_v0 = vmul.f32 %v388_v57, %v260_v6  ;;  %v524_v4 = vmul.f32 %v396_v15, %v268_v52  ;;  %v6340_v21 = vsub.f32 %v508_v27, %v3117_v5  ;;  %v272_v6 = vld [vmem:[%s5243_s3 + $0x218] sm:$0xff] }
 0x1e0   : > { %v6328_v50 = vpack.c.bf16 %v7726_v61, %v7727_v25  ;;  %v6333_v55 = vpack.c.bf16 %v3117_v5, %v3113_v38  ;;  %v6338_v35 = vsub.f32 %v500_v42, %v3113_v38  ;;  %v7737_v14 = vand.u32 4294901760, %v6315_v31  ;;  %v280_v42 = vld [vmem:[%s5243_s3 + $0x258] sm:$0xff] }
 0x1e1   : > { %4248 = vmatpush1.bf16.xpose.msra.mxu1 %v8212_v9  ;;  %v7725_v9 = vand.u32 4294901760, %v6249_v54  ;;  %8232 = vst [vmem:[#allocation32_spill] sm:$0xff] %v6340_v21  ;;  %v7736_v22 = vand.u32 4294901760, %v6317_v51  ;;  %v6347_v57 = vsub.f32 %v495_v26, %v1443_v34  ;;  %v6349_v52 = vsub.f32 %v503_v40, %v1447_v18  ;;  %v400_v27 = vld [vmem:[%s5250_s29 + $0x218] sm:$0xff]  ;;  %v259_v26 = vld [vmem:[%s5243_s3 + $0x1b0] sm:$0xff] }
 0x1e2   : > { %4250 = vmatprep.subr.bf16.mxu1 %v6193_v53  ;;  %8229 = vst [vmem:[#allocation23_spill] sm:$0xff] %v6328_v50  ;;  %8230 = vst [vmem:[#allocation31_spill] sm:$0xff] %v6333_v55  ;;  %v408_v38 = vld [vmem:[%s5250_s29 + $0x258] sm:$0xff]  ;;  %v6356_v5 = vpack.c.bf16 %v1447_v18, %v1443_v34  ;;  %v267_v40 = vld [vmem:[%s5243_s3 + $0x1f0] sm:$0xff]  ;;  %v3121_v25 = vand.u32 4294901760, %v516_v0  ;;  %v3125_v12 = vand.u32 4294901760, %v524_v4  ;;  %v6379_v61 = vmul.f32 %v400_v27, %v272_v6 }
 0x1e3   : > { %4632 = vmatpush1.bf16.xpose.msra.mxu0 %v8216_v3  ;;  %v243_v3 = vld [vmem:[%s5243_s3 + $0x130] sm:$0xff]  ;;  %v6313_v37 = vpack.c.bf16 %v7724_v43, %v7725_v9  ;;  %8231 = vst [vmem:[#allocation28_spill] sm:$0xff] %v6338_v35  ;;  %8233 = vst [vmem:[#allocation37_spill] sm:$0xff] %v6347_v57  ;;  %v6381_v56 = vmul.f32 %v408_v38, %v280_v42  ;;  %v412_v43 = vld [vmem:[%s5250_s29 + $0x278] sm:$0xff]  ;;  %v7757_v27 = vand.u32 4294901760, %v6366_v11 }
 0x1e4   : > { %4634 = vmatprep.subr.bf16.mxu0 %v6208_v33  ;;  %v6322_v45 = vmul.f32 %v371_v29, %v243_v3  ;;  %v255_v3 = vld [vmem:[%s5243_s3 + $0x190] sm:$0xff]  ;;  %8234 = vst [vmem:[#allocation43_spill] sm:$0xff] %v6349_v52  ;;  %8235 = vst [vmem:[#allocation40_spill] sm:$0xff] %v6356_v5  ;;  %v6398_v42 = vpack.c.bf16 %v3125_v12, %v3121_v25  ;;  %v540_v38 = vmul.f32 %v412_v43, %v284_v13  ;;  %v416_v43 = vld [vmem:[%s5250_s29 + $0x298] sm:$0xff] }
 0x1e5   : > { %8228 = vst [vmem:[#allocation22_spill] sm:$0xff] %v6313_v37  ;;  %v383_v29 = vld [vmem:[%s5250_s29 + $0x190] sm:$0xff]  ;;  %v424_v13 = vld [vmem:[%s5250_s29 + $0x2d8] sm:$0xff] }
 0x1e6   : > { %v7738_v15 = vand.u32 4294901760, %v6322_v45  ;;  %v6359_v9 = vmul.f32 %v383_v29, %v255_v3  ;;  %v387_v18 = vld [vmem:[%s5250_s29 + $0x1b0] sm:$0xff]  ;;  %v6377_v29 = vpack.c.bf16 %v7736_v22, %v7737_v14  ;;  %8239 = vst [vmem:[#allocation55_spill] sm:$0xff] %v6398_v42 }
 0x1e7   : > { %v395_v34 = vld [vmem:[%s5250_s29 + $0x1f0] sm:$0xff]  ;;  %v6393_v22 = vmul.f32 %v387_v18, %v259_v26  ;;  %v6404_v26 = vsub.f32 %v516_v0, %v3121_v25 }
 0x1e8   : > { %1420 = vmatmul.mubr.f32.vlgmr.msra.gmra.mrb[0].mxu1 %v8065_v17  ;;  %8236 = vst [vmem:[#allocation44_spill] sm:$0xff] %v6377_v29  ;;  %v6395_v6 = vmul.f32 %v395_v34, %v267_v40  ;;  %v271_v14 = vld [vmem:[%s5243_s3 + $0x210] sm:$0xff]  ;;  %v6406_v40 = vsub.f32 %v524_v4, %v3125_v12  ;;  %v8242_v18 = vand.u32 4294901760, %v6359_v9  ;;  %v3133_v12 = vand.u32 4294901760, %v540_v38 }
 0x1e9   : > { %4252 = vmatpush1.bf16.xpose.msra.mxu1 %v6238_v28  ;;  %1521 = vmatprep.mubr.f32.mxu1 %v8223_v36  ;;  %8240 = vst [vmem:[#allocation52_spill] sm:$0xff] %v6404_v26  ;;  %v275_v4 = vld [vmem:[%s5243_s3 + $0x230] sm:$0xff]  ;;  %v428_v28 = vld [vmem:[%s5250_s29 + $0x2f8] sm:$0xff] }
 0x1ea   : > { %4254 = vmatprep.subr.bf16.mxu1 %v6247_v19  ;;  %3092 = vmatmul.mubr.f32.vlgmr.msra.gmra.mrb[0].mxu0 %v8065_v17  ;;  %8241 = vst [vmem:[#allocation57_spill] sm:$0xff] %v6406_v40  ;;  %v295_v53 = vld [vmem:[%s5243_s3 + $0x2d0] sm:$0xff]  ;;  %v308_v26 = vld [vmem:[%s5243_s3 + $0x338] sm:$0xff] }
 0x1eb   : > { %4636 = vmatpush1.bf16.xpose.msra.mxu0 %v6256_v41  ;;  %3193 = vmatprep.mubr.f32.mxu0 %v8223_v36  ;;  %v8245_v41 = vand.u32 4294901760, %v6381_v56  ;;  %v427_v40 = vld [vmem:[%s5250_s29 + $0x2f0] sm:$0xff]  ;;  %v8275_v36 = vand.u32 4294901760, %v6195_v63 }
 0x1ec   : > { %4638 = vmatprep.subr.bf16.mxu0 %v6271_v60  ;;  %v8244_v60 = vand.u32 4294901760, %v6379_v61  ;;  %v435_v57 = vld [vmem:[%s5250_s29 + $0x330] sm:$0xff] }
 0x1ee   : > { %v6441_v34 = vpack.c.bf16 %v8245_v41, %v8244_v60 }
 0x1f0   : > { %8246 = vst [vmem:[#allocation65_spill] sm:$0xff] %v6441_v34 }
 0x1f1   : > { %4256 = vmatpush1.bf16.xpose.msra.mxu1 %v6302_v20  ;;  %v292_v20 = vld [vmem:[%s5243_s3 + $0x2b8] sm:$0xff] }
 0x1f2   : > { %4258 = vmatprep.subr.bf16.mxu1 %v6313_v37  ;;  %v288_v37 = vld [vmem:[%s5243_s3 + $0x298] sm:$0xff] }
 0x1f3   : > { %4640 = vmatpush1.bf16.xpose.msra.mxu0 %v6328_v50  ;;  %v279_v50 = vld [vmem:[%s5243_s3 + $0x250] sm:$0xff] }
 0x1f4   : > { %4642 = vmatprep.subr.bf16.mxu0 %v6333_v55  ;;  %v8237_v55 = vand.u32 4294901760, %v6330_v8 }
 0x1f6   : > { %v6390_v3 = vpack.c.bf16 %v8237_v55, %v7738_v15  ;;  %v532_v55 = vmul.f32 %v404_v59, %v276_v23  ;;  %v399_v15 = vld [vmem:[%s5250_s29 + $0x210] sm:$0xff]  ;;  %v296_v23 = vld [vmem:[%s5243_s3 + $0x2d8] sm:$0xff] }
 0x1f7   : > { %v6419_v0 = vmul.f32 %v399_v15, %v271_v14  ;;  %v283_v59 = vld [vmem:[%s5243_s3 + $0x270] sm:$0xff]  ;;  %v6445_v19 = vmul.f32 %v424_v13, %v296_v23 }
 0x1f8   : > { %8238 = vst [vmem:[#allocation49_spill] sm:$0xff] %v6390_v3  ;;  %v3129_v25 = vand.u32 4294901760, %v532_v55  ;;  %v403_v14 = vld [vmem:[%s5250_s29 + $0x230] sm:$0xff] }
 0x1f9   : > { %4260 = vmatpush1.bf16.xpose.msra.mxu1 %v6356_v5  ;;  %v407_v5 = vld [vmem:[%s5250_s29 + $0x250] sm:$0xff]  ;;  %v6457_v41 = vmul.f32 %v403_v14, %v275_v4 }
 0x1fa   : > { %4262 = vmatprep.subr.bf16.mxu1 %v6377_v29  ;;  %v6432_v29 = vmul.f32 %v407_v5, %v279_v50  ;;  %v411_v15 = vld [vmem:[%s5250_s29 + $0x270] sm:$0xff]  ;;  %v8247_v50 = vand.u32 4294901760, %v6393_v22  ;;  %v8248_v5 = vand.u32 4294901760, %v6395_v6  ;;  %v6472_v4 = vsub.f32 %v532_v55, %v3129_v25 }
 0x1fb   : > { %4644 = vmatpush1.bf16.xpose.msra.mxu0 %v6390_v3  ;;  %v6430_v3 = vpack.c.bf16 %v7757_v27, %v8242_v18  ;;  %v300_v18 = vld [vmem:[%s5243_s3 + $0x2f8] sm:$0xff]  ;;  %v6459_v60 = vmul.f32 %v411_v15, %v283_v59  ;;  %v6474_v59 = vsub.f32 %v540_v38, %v3133_v12  ;;  %v423_v23 = vld [vmem:[%s5250_s29 + $0x2d0] sm:$0xff]  ;;  %v8266_v17 = vand.u32 4294901760, %v6457_v41 }
 0x1fc   : > { %4646 = vmatprep.subr.bf16.mxu0 %v6398_v42  ;;  %v6443_v42 = vmul.f32 %v416_v43, %v288_v37  ;;  %v420_v27 = vld [vmem:[%s5250_s29 + $0x2b8] sm:$0xff]  ;;  %v6454_v33 = vpack.c.bf16 %v8248_v5, %v8247_v50  ;;  %v6462_v37 = vpack.c.bf16 %v3133_v12, %v3129_v25  ;;  %v6467_v13 = vmul.f32 %v428_v28, %v300_v18  ;;  %v287_v50 = vld [vmem:[%s5243_s3 + $0x290] sm:$0xff] }
 0x1fd   : > { %8243 = vst [vmem:[#allocation60_spill] sm:$0xff] %v6430_v3  ;;  %v6465_v43 = vmul.f32 %v420_v27, %v292_v20  ;;  %v415_v5 = vld [vmem:[%s5250_s29 + $0x290] sm:$0xff]  ;;  %8253 = vst [vmem:[#allocation77_spill] sm:$0xff] %v6472_v4  ;;  %v304_v20 = vld [vmem:[%s5243_s3 + $0x318] sm:$0xff] }
 0x1fe   : > { %8249 = vst [vmem:[#allocation66_spill] sm:$0xff] %v6454_v33  ;;  %8250 = vst [vmem:[#allocation70_spill] sm:$0xff] %v6462_v37  ;;  %v312_v28 = vld [vmem:[%s5243_s3 + $0x358] sm:$0xff]  ;;  %v6487_v25 = vmul.f32 %v415_v5, %v287_v50  ;;  %v291_v12 = vld [vmem:[%s5243_s3 + $0x2b0] sm:$0xff]  ;;  %v6502_v5 = vmul.f32 %v423_v23, %v295_v53  ;;  %v8260_v14 = vand.u32 4294901760, %v6443_v42  ;;  %v8265_v23 = vand.u32 4294901760, %v6184_v24 }
 0x1ff   : > { %8251 = vst [vmem:[#allocation74_spill] sm:$0xff] %v6465_v43  ;;  %8252 = vst [vmem:[#allocation80_spill] sm:$0xff] %v6467_v13  ;;  %v432_v27 = vld [vmem:[%s5250_s29 + $0x318] sm:$0xff]  ;;  %v299_v15 = vld [vmem:[%s5243_s3 + $0x2f0] sm:$0xff] }
 0x200   : > { %8254 = vst [vmem:[#allocation83_spill] sm:$0xff] %v6474_v59  ;;  %v440_v18 = vld [vmem:[%s5250_s29 + $0x358] sm:$0xff]  ;;  %8255 = vst [vmem:[#allocation86_spill] sm:$0xff] %v6487_v25  ;;  %v419_v55 = vld [vmem:[%s5250_s29 + $0x2b0] sm:$0xff]  ;;  %v6513_v4 = vmul.f32 %v432_v27, %v304_v20  ;;  %v6523_v38 = vsub.f32 %v6184_v24, %v8265_v23  ;;  %v6534_v27 = vmul.f32 %v427_v40, %v299_v15  ;;  %v8269_v24 = vand.u32 4294901760, %v6465_v43 }
 0x201   : > { %4264 = vmatpush1.bf16.xpose.msra.mxu1 %v6430_v3  ;;  %8259 = vst [vmem:[#allocation21_spill] sm:$0xff] %v6502_v5  ;;  %v436_v50 = vld [vmem:[%s5250_s29 + $0x338] sm:$0xff]  ;;  %v8270_v23 = vand.u32 4294901760, %v6467_v13  ;;  %v311_v40 = vld [vmem:[%s5243_s3 + $0x350] sm:$0xff]  ;;  %v8274_v20 = vand.u32 4294901760, %v6190_v16  ;;  %v8289_v13 = vand.u32 4294901760, %v6251_v1 }
 0x202   : > { %4266 = vmatprep.subr.bf16.mxu1 %v6441_v34  ;;  %v8256_v34 = vand.u32 4294901760, %v6419_v0  ;;  %8263 = vst [vmem:[#allocation18_spill] sm:$0xff] %v6513_v4  ;;  %v444_v53 = vld [vmem:[%s5250_s29 + $0x378] sm:$0xff]  ;;  %v431_v15 = vld [vmem:[%s5250_s29 + $0x310] sm:$0xff] }
 0x203   : > { %4648 = vmatpush1.bf16.xpose.msra.mxu0 %v6454_v33  ;;  %v8257_v33 = vand.u32 4294901760, %v6432_v29  ;;  %v6542_v52 = vpack.c.bf16 %v8270_v23, %v8269_v24  ;;  %v6560_v24 = vsub.f32 %v6195_v63, %v8275_v36  ;;  %v8277_v23 = vand.u32 4294901760, %v6197_v62 }
 0x204   : > { %4650 = vmatprep.subr.bf16.mxu0 %v6462_v37  ;;  %v8261_v37 = vand.u32 4294901760, %v6445_v19  ;;  %v8281_v36 = vand.u32 4294901760, %v6267_v48  ;;  %v6615_v43 = vsub.f32 %v6251_v1, %v8289_v13  ;;  %v8295_v1 = vand.u32 4294901760, %v6330_v8 }
 0x205   : > { %v6498_v3 = vpack.c.bf16 %v8257_v33, %v8256_v34  ;;  %v6515_v33 = vmul.f32 %v440_v18, %v312_v28  ;;  %v316_v34 = vld [vmem:[%s5243_s3 + $0x378] sm:$0xff]  ;;  %v6532_v28 = vmul.f32 %v419_v55, %v291_v12  ;;  %v303_v18 = vld [vmem:[%s5243_s3 + $0x310] sm:$0xff]  ;;  %8271 = vst [vmem:[#allocation26_spill] sm:$0xff] %v6542_v52  ;;  %8276 = vst [vmem:[#allocation34_spill] sm:$0xff] %v6560_v24 }
 0x206   : > { %v6511_v59 = vpack.c.bf16 %v8261_v37, %v8260_v14  ;;  %v8267_v37 = vand.u32 4294901760, %v6459_v60  ;;  %v6547_v55 = vmul.f32 %v444_v53, %v316_v34  ;;  %v439_v12 = vld [vmem:[%s5250_s29 + $0x350] sm:$0xff]  ;;  %v320_v34 = vld [vmem:[%s5243_s3 + $0x398] sm:$0xff]  ;;  %8290 = vst [vmem:[#allocation41_spill] sm:$0xff] %v6615_v43  ;;  %v6636_v13 = vsub.f32 %v6330_v8, %v8295_v1 }
 0x207   : > { %8258 = vst [vmem:[#allocation17_spill] sm:$0xff] %v6498_v3  ;;  %8264 = vst [vmem:[#allocation20_spill] sm:$0xff] %v6515_v33  ;;  %v448_v53 = vld [vmem:[%s5250_s29 + $0x398] sm:$0xff] }
 0x208   : > { %8262 = vst [vmem:[#allocation24_spill] sm:$0xff] %v6511_v59  ;;  %v6529_v14 = vpack.c.bf16 %v8267_v37, %v8266_v17  ;;  %v6545_v37 = vmul.f32 %v436_v50, %v308_v26  ;;  %8273 = vst [vmem:[#allocation29_spill] sm:$0xff] %v6547_v55  ;;  %v6580_v26 = vsub.f32 %v6267_v48, %v8281_v36  ;;  %v8283_v50 = vand.u32 4294901760, %v6249_v54  ;;  %v307_v36 = vld [vmem:[%s5243_s3 + $0x330] sm:$0xff] }
 0x209   : > { %4268 = vmatpush1.bf16.xpose.msra.mxu1 %v6498_v3  ;;  %v6555_v3 = vsub.f32 %v6190_v16, %v8274_v20  ;;  %v6570_v16 = vsub.f32 %v6197_v62, %v8277_v23  ;;  %v8279_v20 = vand.u32 4294901760, %v6260_v39  ;;  %v456_v62 = vld [vmem:[%s5250_s29 + $0x3d8] sm:$0xff]  ;;  %v6594_v48 = vmul.f32 %v439_v12, %v311_v40  ;;  %v443_v23 = vld [vmem:[%s5250_s29 + $0x370] sm:$0xff]  ;;  %8296 = vst [vmem:[#allocation47_spill] sm:$0xff] %v6636_v13 }
 0x20a   : > { %8268 = vst [vmem:[#allocation25_spill] sm:$0xff] %v6529_v14  ;;  %8272 = vst [vmem:[#allocation27_spill] sm:$0xff] %v6545_v37  ;;  %4270 = vmatprep.subr.bf16.mxu1 %v6511_v59  ;;  %v6585_v17 = vsub.f32 %v6249_v54, %v8283_v50  ;;  %v328_v59 = vld [vmem:[%s5243_s3 + $0x3d8] sm:$0xff]  ;;  %v8286_v54 = vand.u32 4294901760, %v6487_v25  ;;  %v8287_v50 = vand.u32 4294901760, %v6502_v5  ;;  %v6609_v40 = vmul.f32 %v448_v53, %v320_v34 }
 0x20b   : > { %8278 = vst [vmem:[#allocation35_spill] sm:$0xff] %v6570_v16  ;;  %v6575_v63 = vsub.f32 %v6260_v39, %v8279_v20  ;;  %8282 = vst [vmem:[#allocation33_spill] sm:$0xff] %v6580_v26  ;;  %4652 = vmatpush1.bf16.xpose.msra.mxu0 %v6529_v14  ;;  %v6592_v20 = vmul.f32 %v431_v15, %v303_v18  ;;  %v315_v15 = vld [vmem:[%s5243_s3 + $0x370] sm:$0xff]  ;;  %v324_v12 = vld [vmem:[%s5243_s3 + $0x3b8] sm:$0xff]  ;;  %v6628_v39 = vmul.f32 %v456_v62, %v328_v59 }
 0x20c   : > { %8284 = vst [vmem:[#allocation36_spill] sm:$0xff] %v6585_v17  ;;  %8285 = vst [vmem:[#allocation38_spill] sm:$0xff] %v6594_v48  ;;  %4654 = vmatprep.subr.bf16.mxu0 %v6542_v52  ;;  %v6603_v14 = vpack.c.bf16 %v8287_v50, %v8286_v54  ;;  %v8291_v52 = vand.u32 4294901760, %v6322_v45  ;;  %v8292_v54 = vand.u32 4294901760, %v6513_v4  ;;  %v8293_v50 = vand.u32 4294901760, %v6515_v33  ;;  %v332_v34 = vld [vmem:[%s5243_s3 + $0x3f8] sm:$0xff] }
 0x20d   : > { %8280 = vst [vmem:[#allocation30_spill] sm:$0xff] %v6575_v63  ;;  %v452_v53 = vld [vmem:[%s5250_s29 + $0x3b8] sm:$0xff]  ;;  %v8299_v33 = vand.u32 4294901760, %v6317_v51  ;;  %v6648_v62 = vmul.f32 %v435_v57, %v307_v36  ;;  %v8305_v57 = vand.u32 4294901760, %v6547_v55  ;;  %v455_v36 = vld [vmem:[%s5250_s29 + $0x3d0] sm:$0xff] }
 0x20e   : > { %8288 = vst [vmem:[#allocation39_spill] sm:$0xff] %v6603_v14  ;;  %v6620_v5 = vsub.f32 %v6322_v45, %v8291_v52  ;;  %v6626_v18 = vpack.c.bf16 %v8293_v50, %v8292_v54  ;;  %v460_v25 = vld [vmem:[%s5250_s29 + $0x3f8] sm:$0xff]  ;;  %v8297_v45 = vand.u32 4294901760, %v6315_v31  ;;  %v8301_v54 = vand.u32 4294901760, %v6532_v28  ;;  %v459_v55 = vld [vmem:[%s5250_s29 + $0x3f0] sm:$0xff] }
 0x20f   : > { %v6646_v59 = vsub.f32 %v6317_v51, %v8299_v33  ;;  %v8302_v50 = vand.u32 4294901760, %v6534_v27  ;;  %v8304_v51 = vand.u32 4294901760, %v6545_v37  ;;  %v6668_v4 = vmul.f32 %v452_v53, %v324_v12  ;;  %v323_v12 = vld [vmem:[%s5243_s3 + $0x3b0] sm:$0xff] }
 0x210   : > { %8294 = vst [vmem:[#allocation46_spill] sm:$0xff] %v6626_v18  ;;  %v6641_v52 = vsub.f32 %v6315_v31, %v8297_v45  ;;  %v6658_v45 = vmul.f32 %v443_v23, %v315_v15  ;;  %v8307_v31 = vand.u32 4294901760, %v6359_v9  ;;  %v8312_v15 = vand.u32 4294901760, %v6395_v6 }
 0x211   : > { %8300 = vst [vmem:[#allocation45_spill] sm:$0xff] %v6646_v59  ;;  %v6654_v8 = vpack.c.bf16 %v8302_v50, %v8301_v54  ;;  %4272 = vmatpush1.bf16.xpose.msra.mxu1 %v6603_v14  ;;  %v6665_v33 = vpack.c.bf16 %v8305_v57, %v8304_v51  ;;  %v6670_v54 = vmul.f32 %v460_v25, %v332_v34  ;;  %v319_v50 = vld [vmem:[%s5243_s3 + $0x390] sm:$0xff]  ;;  %v8308_v34 = vand.u32 4294901760, %v6366_v11 }
 0x212   : > { %8298 = vst [vmem:[#allocation42_spill] sm:$0xff] %v6641_v52  ;;  %v6676_v23 = vsub.f32 %v6359_v9, %v8307_v31  ;;  %4274 = vmatprep.subr.bf16.mxu1 %v6626_v18  ;;  %v327_v51 = vld [vmem:[%s5243_s3 + $0x3d0] sm:$0xff]  ;;  %v8310_v9 = vand.u32 4294901760, %v6393_v22  ;;  %v6698_v1 = vsub.f32 %v6395_v6, %v8312_v15  ;;  %v8314_v25 = vand.u32 4294901760, %v6592_v20 }
 0x213   : > { %8303 = vst [vmem:[#allocation48_spill] sm:$0xff] %v6654_v8  ;;  %8306 = vst [vmem:[#allocation50_spill] sm:$0xff] %v6665_v33  ;;  %v447_v57 = vld [vmem:[%s5250_s29 + $0x390] sm:$0xff]  ;;  %v6688_v53 = vsub.f32 %v6366_v11, %v8308_v34  ;;  %4656 = vmatpush1.bf16.xpose.msra.mxu0 %v6654_v8  ;;  %v8315_v11 = vand.u32 4294901760, %v6594_v48  ;;  %v6720_v48 = vmul.f32 %v455_v36, %v327_v51  ;;  %v8319_v14 = vand.u32 4294901760, %v6609_v40 }
 0x214   : > { %v6693_v31 = vsub.f32 %v6393_v22, %v8310_v9  ;;  %8313 = vst [vmem:[#allocation59_spill] sm:$0xff] %v6698_v1  ;;  %v331_v22 = vld [vmem:[%s5243_s3 + $0x3f0] sm:$0xff]  ;;  %4658 = vmatprep.subr.bf16.mxu0 %v6665_v33  ;;  %v6718_v8 = vmul.f32 %v447_v57, %v319_v50  ;;  %v8320_v37 = vand.u32 4294901760, %v6628_v39  ;;  %v8322_v33 = vand.u32 4294901760, %v6202_v30 }
 0x215   : > { %8309 = vst [vmem:[#allocation51_spill] sm:$0xff] %v6688_v53  ;;  %v6707_v34 = vpack.c.bf16 %v8315_v11, %v8314_v25  ;;  %v451_v9 = vld [vmem:[%s5250_s29 + $0x3b0] sm:$0xff]  ;;  %v8317_v25 = vand.u32 4294901760, %v6379_v61  ;;  %v8323_v50 = vand.u32 4294901760, %v6204_v32  ;;  %v6741_v57 = vmul.f32 %v459_v55, %v331_v22 }
 0x216   : > { %8311 = vst [vmem:[#allocation53_spill] sm:$0xff] %v6693_v31  ;;  %v6731_v6 = vpack.c.bf16 %v8320_v37, %v8319_v14  ;;  %v1530_v15 = vsub.f32 %v6202_v30, %v8322_v33  ;;  %v6739_v51 = vmul.f32 %v451_v9, %v323_v12  ;;  %v8324_v18 = vand.u32 4294901760, %v6381_v56 }
 0x217   : > { %8316 = vst [vmem:[#allocation54_spill] sm:$0xff] %v6707_v34  ;;  %v6725_v11 = vsub.f32 %v6379_v61, %v8317_v25  ;;  %v1542_v36 = vsub.f32 %v6204_v32, %v8323_v50  ;;  %v8326_v37 = vand.u32 4294901760, %v6648_v62  ;;  %v8327_v33 = vand.u32 4294901760, %v6658_v45 }
 0x218   : > { %8321 = vst [vmem:[#allocation62_spill] sm:$0xff] %v6731_v6  ;;  %v6748_v14 = vsub.f32 %v6381_v56, %v8324_v18  ;;  %v8329_v12 = vand.u32 4294901760, %v6214_v49  ;;  %v8330_v22 = vand.u32 4294901760, %v6216_v58  ;;  %v8331_v50 = vand.u32 4294901760, %v6419_v0 }
 0x219   : > { %8318 = vst [vmem:[#allocation56_spill] sm:$0xff] %v6725_v11  ;;  %v6754_v30 = vpack.c.bf16 %v8327_v33, %v8326_v37  ;;  %4276 = vmatpush1.bf16.xpose.msra.mxu1 %v6707_v34  ;;  %v8332_v56 = vand.u32 4294901760, %v6668_v4  ;;  %v8333_v18 = vand.u32 4294901760, %v6670_v54  ;;  %v7834_v33 = vand.u32 4294901760, %v6718_v8 }
 0x21a   : > { %8325 = vst [vmem:[#allocation64_spill] sm:$0xff] %v6748_v14  ;;  %v3202_v55 = vsub.f32 %v6214_v49, %v8329_v12  ;;  %v3214_v9 = vsub.f32 %v6216_v58, %v8330_v22  ;;  %v6765_v25 = vsub.f32 %v6419_v0, %v8331_v50  ;;  %4278 = vmatprep.subr.bf16.mxu1 %v6731_v6  ;;  %v1531_v22 = vand.u32 4294901760, %v1530_v15 }
 0x21b   : > { %8328 = vst [vmem:[#allocation67_spill] sm:$0xff] %v6754_v30  ;;  %v6772_v37 = vpack.c.bf16 %v8333_v18, %v8332_v56  ;;  %v1543_v61 = vand.u32 4294901760, %v1542_v36  ;;  %v8335_v58 = vand.u32 4294901760, %v6523_v38  ;;  %v8336_v18 = vand.u32 4294901760, %v6555_v3  ;;  %4660 = vmatpush1.bf16.xpose.msra.mxu0 %v6754_v30 }
 0x21c   : > { %v3203_v15 = vand.u32 4294901760, %v3202_v55  ;;  %v3215_v36 = vand.u32 4294901760, %v3214_v9  ;;  %v8337_v50 = vand.u32 4294901760, %v6432_v29  ;;  %v8340_v49 = vand.u32 4294901760, %v6457_v41 }
 0x21d   : > { %8334 = vst [vmem:[#allocation68_spill] sm:$0xff] %v6772_v37  ;;  %v1536_v56 = vsub.f32 %v6523_v38, %v8335_v58  ;;  %v1548_v12 = vsub.f32 %v6555_v3, %v8336_v18  ;;  %4662 = vmatprep.subr.bf16.mxu0 %v6772_v37  ;;  %v8338_v58 = vand.u32 4294901760, %v6720_v48  ;;  %v4281_v30 = vpack.c.bf16 %v1543_v61, %v1531_v22 }
 0x21e   : > { %v6793_v34 = vsub.f32 %v6432_v29, %v8337_v50  ;;  %v6807_v0 = vsub.f32 %v6457_v41, %v8340_v49  ;;  %v8341_v29 = vand.u32 4294901760, %v6560_v24  ;;  %v8342_v37 = vand.u32 4294901760, %v6570_v16 }
 0x21f   : > { %v6800_v18 = vpack.c.bf16 %v8338_v58, %v7834_v33  ;;  %v8343_v58 = vand.u32 4294901760, %v6459_v60  ;;  %v8345_v9 = vand.u32 4294901760, %v6443_v42  ;;  %v1537_v49 = vand.u32 4294901760, %v1536_v56 }
 0x220   : > { %v1554_v50 = vsub.f32 %v6560_v24, %v8341_v29  ;;  %v1566_v6 = vsub.f32 %v6570_v16, %v8342_v37  ;;  %v1549_v41 = vand.u32 4294901760, %v1548_v12  ;;  %v8346_v61 = vand.u32 4294901760, %v6739_v51 }
 0x221   : > { %8339 = vst [vmem:[#allocation73_spill] sm:$0xff] %v6800_v18  ;;  %v6818_v33 = vsub.f32 %v6459_v60, %v8343_v58  ;;  %v6823_v55 = vsub.f32 %v6443_v42, %v8345_v9  ;;  %v8347_v22 = vand.u32 4294901760, %v6741_v57  ;;  %v4665_v24 = vpack.c.bf16 %v3215_v36, %v3203_v15  ;;  %4280 = vmatpush1.bf16.xpose.msra.mxu1 %v6800_v18 }
 0x222   : > { %v8349_v37 = vand.u32 4294901760, %v6258_v46  ;;  %v8350_v60 = vand.u32 4294901760, %v6263_v47  ;;  %v8351_v42 = vand.u32 4294901760, %v6265_v10  ;;  %v8352_v56 = vand.u32 4294901760, %v6278_v7  ;;  %4282 = vmatprep.subr.bf16.mxu1 %v4281_v30 }
 0x223   : > { %8344 = vst [vmem:[#allocation75_spill] sm:$0xff] %v6818_v33  ;;  %v6829_v29 = vpack.c.bf16 %v8347_v22, %v8346_v61  ;;  %v7845_v15 = vand.u32 4294901760, %v6286_v44  ;;  %v1555_v61 = vand.u32 4294901760, %v1554_v50  ;;  %v1567_v22 = vand.u32 4294901760, %v1566_v6  ;;  %v8359_v50 = vld [vmem:[#allocation80_spill] sm:$0xff] }
 0x224   : > { %v3208_v16 = vsub.f32 %v6258_v46, %v8349_v37  ;;  %v3220_v58 = vsub.f32 %v6263_v47, %v8350_v60  ;;  %v3226_v12 = vsub.f32 %v6265_v10, %v8351_v42  ;;  %v3238_v9 = vsub.f32 %v6278_v7, %v8352_v56 }
 0x225   : > { %8348 = vst [vmem:[#allocation76_spill] sm:$0xff] %v6829_v29  ;;  %v8353_v18 = vand.u32 4294901760, %v6445_v19  ;;  %v4283_v42 = vpack.c.bf16 %v1549_v41, %v1537_v49  ;;  %4664 = vmatpush1.bf16.xpose.msra.mxu0 %v6829_v29  ;;  %v8355_v41 = vld [vmem:[#allocation74_spill] sm:$0xff]  ;;  %v8357_v6 = vand.u32 4294901760, %v6585_v17 }
 0x226   : > { %v3209_v36 = vand.u32 4294901760, %v3208_v16  ;;  %v3221_v30 = vand.u32 4294901760, %v3220_v58  ;;  %4666 = vmatprep.subr.bf16.mxu0 %v4665_v24  ;;  %v3227_v60 = vand.u32 4294901760, %v3226_v12  ;;  %v3239_v37 = vand.u32 4294901760, %v3238_v9 }
 0x227   : > { %v6851_v46 = vsub.f32 %v6445_v19, %v8353_v18  ;;  %v1560_v19 = vsub.f32 %v6286_v44, %v7845_v15  ;;  %v8354_v18 = vand.u32 4294901760, %v6288_v2  ;;  %v8356_v56 = vand.u32 4294901760, %v8355_v41 }
 0x228   : > { %v4285_v58 = vpack.c.bf16 %v1567_v22, %v1555_v61  ;;  %v1578_v24 = vsub.f32 %v6585_v17, %v8357_v6  ;;  %v8358_v12 = vand.u32 4294901760, %v6615_v43  ;;  %v8360_v15 = vand.u32 4294901760, %v8359_v50  ;;  %v8363_v22 = vld [vmem:[#allocation37_spill] sm:$0xff] }
 0x229   : > { %v1572_v49 = vsub.f32 %v6288_v2, %v8354_v18  ;;  %v6867_v16 = vsub.f32 %v8355_v41, %v8356_v56  ;;  %v8361_v18 = vand.u32 4294901760, %v6575_v63  ;;  %v8362_v56 = vand.u32 4294901760, %v6580_v26 }
 0x22a   : > { %v1590_v9 = vsub.f32 %v6615_v43, %v8358_v12  ;;  %v6878_v10 = vsub.f32 %v8359_v50, %v8360_v15  ;;  %v8364_v6 = vmov 0.0   ;;  %v4667_v44 = vpack.c.bf16 %v3221_v30, %v3209_v36  ;;  %v8367_v43 = vld [vmem:[#allocation43_spill] sm:$0xff] }
 0x22b   : > { %v3232_v29 = vsub.f32 %v6575_v63, %v8361_v18  ;;  %v3244_v61 = vsub.f32 %v6580_v26, %v8362_v56  ;;  %1522 = vmatmul.mubr.f32.vlgmr.msra.gmra.mrb[0].mxu1 %v8364_v6  ;;  %v8365_v12 = vand.u32 4294901760, %v6338_v35  ;;  %v8366_v15 = vand.u32 4294901760, %v6340_v21  ;;  %v8368_v18 = vld [vmem:[#allocation86_spill] sm:$0xff] }
 0x22c   : > { %v8369_v63 = vand.u32 4294901760, %v8368_v18  ;;  %4284 = vmatpush1.bf16.xpose.msra.mxu1 %v4283_v42  ;;  %v4669_v56 = vpack.c.bf16 %v3239_v37, %v3227_v60  ;;  %v1561_v41 = vand.u32 4294901760, %v1560_v19  ;;  %v1573_v26 = vand.u32 4294901760, %v1572_v49  ;;  %3194 = vmatmul.mubr.f32.vlgmr.msra.gmra.mrb[0].mxu0 %v8364_v6 }
 0x22d   : > { %v3250_v2 = vsub.f32 %v6338_v35, %v8365_v12  ;;  %v3262_v50 = vsub.f32 %v6340_v21, %v8366_v15  ;;  %v8370_v36 = vmov 1.0   ;;  %4286 = vmatprep.subr.bf16.mxu1 %v4285_v58  ;;  %v1579_v30 = vand.u32 4294901760, %v1578_v24  ;;  %4668 = vmatpush1.bf16.xpose.msra.mxu0 %v4667_v44  ;;  %v8376_v44 = vld [vmem:[#allocation57_spill] sm:$0xff] }
 0x22e   : > { %v6898_v7 = vsub.f32 %v8368_v18, %v8369_v63  ;;  %1751 = vmatprep.mubr.f32.mxu1 %v8370_v36  ;;  %v1591_v12 = vand.u32 4294901760, %v1590_v9  ;;  %v7867_v35 = vand.u32 4294901760, %v6641_v52  ;;  %v3233_v17 = vand.u32 4294901760, %v3232_v29  ;;  %3423 = vmatprep.mubr.f32.mxu0 %v8370_v36  ;;  %v8373_v9 = vld [vmem:[#allocation21_spill] sm:$0xff] }
 0x22f   : > { %v3245_v21 = vand.u32 4294901760, %v3244_v61  ;;  %v8371_v63 = vand.u32 4294901760, %v8363_v22  ;;  %v3251_v60 = vand.u32 4294901760, %v3250_v2  ;;  %v3263_v19 = vand.u32 4294901760, %v3262_v50  ;;  %4670 = vmatprep.subr.bf16.mxu0 %v4669_v56  ;;  %v8380_v56 = vld [vmem:[#allocation18_spill] sm:$0xff] }
 0x230   : > { %v8372_v49 = vand.u32 4294901760, %v8367_v43  ;;  %v8374_v29 = vand.u32 4294901760, %v8373_v9  ;;  %v4287_v18 = vpack.c.bf16 %v1573_v26, %v1561_v41  ;;  %v8377_v50 = vand.u32 4294901760, %v6532_v28 }
 0x231   : > { %v1584_v42 = vsub.f32 %v8363_v22, %v8371_v63  ;;  %v8375_v63 = vld [vmem:[#allocation52_spill] sm:$0xff]  ;;  %v1602_v24 = vsub.f32 %v6641_v52, %v7867_v35  ;;  %v8378_v22 = vand.u32 4294901760, %v6646_v59  ;;  %v8379_v26 = vand.u32 4294901760, %v6534_v27 }
 0x232   : > { %v1596_v58 = vsub.f32 %v8367_v43, %v8372_v49  ;;  %v6916_v61 = vsub.f32 %v8373_v9, %v8374_v29  ;;  %v6923_v15 = vsub.f32 %v6532_v28, %v8377_v50  ;;  %v4289_v49 = vpack.c.bf16 %v1591_v12, %v1579_v30 }
 0x233   : > { %v1614_v9 = vsub.f32 %v6646_v59, %v8378_v22  ;;  %v6934_v41 = vsub.f32 %v6534_v27, %v8379_v26  ;;  %v8381_v29 = vand.u32 4294901760, %v8380_v56  ;;  %v4671_v28 = vpack.c.bf16 %v3245_v21, %v3233_v17 }
 0x234   : > { %v8382_v30 = vand.u32 4294901760, %v6620_v5  ;;  %v4673_v50 = vpack.c.bf16 %v3263_v19, %v3251_v60  ;;  %v1585_v35 = vand.u32 4294901760, %v1584_v42  ;;  %v1597_v37 = vand.u32 4294901760, %v1596_v58  ;;  %4288 = vmatpush1.bf16.xpose.msra.mxu1 %v4287_v18  ;;  %v8386_v18 = vld [vmem:[#allocation20_spill] sm:$0xff] }
 0x235   : > { %v6939_v2 = vsub.f32 %v8380_v56, %v8381_v29  ;;  %v8383_v22 = vand.u32 4294901760, %v6636_v13  ;;  %v8384_v27 = vand.u32 4294901760, %v8375_v63  ;;  %v8385_v56 = vand.u32 4294901760, %v8376_v44  ;;  %4290 = vmatprep.subr.bf16.mxu1 %v4289_v49  ;;  %4672 = vmatpush1.bf16.xpose.msra.mxu0 %v4671_v28  ;;  %v8388_v49 = vld [vmem:[#allocation77_spill] sm:$0xff] }
 0x236   : > { %v3256_v12 = vsub.f32 %v6620_v5, %v8382_v30  ;;  %v1603_v42 = vand.u32 4294901760, %v1602_v24  ;;  %v1615_v60 = vand.u32 4294901760, %v1614_v9  ;;  %v8387_v30 = vand.u32 4294901760, %v8386_v18  ;;  %v8389_v9 = vld [vmem:[#allocation83_spill] sm:$0xff]  ;;  %4674 = vmatprep.subr.bf16.mxu0 %v4673_v50 }
 0x237   : > { %v3268_v43 = vsub.f32 %v6636_v13, %v8383_v22  ;;  %v3274_v26 = vsub.f32 %v8375_v63, %v8384_v27  ;;  %v3286_v21 = vsub.f32 %v8376_v44, %v8385_v56  ;;  %v4291_v17 = vpack.c.bf16 %v1597_v37, %v1585_v35  ;;  %v8392_v63 = vld [vmem:[#allocation27_spill] sm:$0xff] }
 0x238   : > { %v6960_v22 = vsub.f32 %v8386_v18, %v8387_v30  ;;  %v3257_v27 = vand.u32 4294901760, %v3256_v12  ;;  %v8390_v13 = vand.u32 4294901760, %v6676_v23  ;;  %v8391_v12 = vand.u32 4294901760, %v6688_v53 }
 0x239   : > { %v3269_v29 = vand.u32 4294901760, %v3268_v43  ;;  %v3275_v19 = vand.u32 4294901760, %v3274_v26  ;;  %v3287_v58 = vand.u32 4294901760, %v3286_v21  ;;  %v8393_v56 = vand.u32 4294901760, %v8392_v63  ;;  %v8396_v21 = vld [vmem:[#allocation29_spill] sm:$0xff] }
 0x23a   : > { %v1608_v18 = vsub.f32 %v6676_v23, %v8390_v13  ;;  %v1620_v30 = vsub.f32 %v6688_v53, %v8391_v12  ;;  %v4293_v43 = vpack.c.bf16 %v1615_v60, %v1603_v42  ;;  %v8394_v37 = vand.u32 4294901760, %v6725_v11 }
 0x23b   : > { %v6975_v35 = vsub.f32 %v8392_v63, %v8393_v56  ;;  %v8395_v50 = vand.u32 4294901760, %v6748_v14  ;;  %v8397_v13 = vand.u32 4294901760, %v8396_v21  ;;  %v8399_v12 = vand.u32 4294901760, %v6693_v31 }
 0x23c   : > { %v1626_v28 = vsub.f32 %v6725_v11, %v8394_v37  ;;  %v8400_v63 = vand.u32 4294901760, %v6698_v1  ;;  %v4675_v56 = vpack.c.bf16 %v3269_v29, %v3257_v27  ;;  %v8401_v37 = vand.u32 4294901760, %v8388_v49  ;;  %4292 = vmatpush1.bf16.xpose.msra.mxu1 %v4291_v17 }
 0x23d   : > { %v1638_v26 = vsub.f32 %v6748_v14, %v8395_v50  ;;  %v6986_v44 = vsub.f32 %v8396_v21, %v8397_v13  ;;  %v3280_v24 = vsub.f32 %v6693_v31, %v8399_v12  ;;  %v8402_v14 = vand.u32 4294901760, %v8389_v9  ;;  %4294 = vmatprep.subr.bf16.mxu1 %v4293_v43 }
 0x23e   : > { %v3292_v42 = vsub.f32 %v6698_v1, %v8400_v63  ;;  %v3298_v50 = vsub.f32 %v8388_v49, %v8401_v37  ;;  %v8403_v11 = vand.u32 4294901760, %v6592_v20  ;;  %v4677_v63 = vpack.c.bf16 %v3287_v58, %v3275_v19  ;;  %4676 = vmatpush1.bf16.xpose.msra.mxu0 %v4675_v56 }
 0x23f   : > { %8398 = vst [vmem:[#allocation78_spill] sm:$0xff] %v6986_v44  ;;  %v3310_v21 = vsub.f32 %v8389_v9, %v8402_v14  ;;  %v1609_v1 = vand.u32 4294901760, %v1608_v18  ;;  %v1621_v60 = vand.u32 4294901760, %v1620_v30  ;;  %v1627_v29 = vand.u32 4294901760, %v1626_v28  ;;  %v8406_v30 = vld [vmem:[#allocation38_spill] sm:$0xff] }
 0x240   : > { %v7005_v12 = vsub.f32 %v6592_v20, %v8403_v11  ;;  %v1639_v27 = vand.u32 4294901760, %v1638_v26  ;;  %v7888_v37 = vand.u32 4294901760, %v6823_v55  ;;  %v7883_v49 = vand.u32 4294901760, %v6851_v46  ;;  %4678 = vmatprep.subr.bf16.mxu0 %v4677_v63 }
 0x241   : > { %v3281_v31 = vand.u32 4294901760, %v3280_v24  ;;  %v3293_v14 = vand.u32 4294901760, %v3292_v42  ;;  %v8404_v13 = vand.u32 4294901760, %v6765_v25  ;;  %v7887_v20 = vand.u32 4294901760, %v6807_v0 }
 0x242   : > { %v3299_v11 = vand.u32 4294901760, %v3298_v50  ;;  %v3311_v17 = vand.u32 4294901760, %v3310_v21  ;;  %v8405_v19 = vand.u32 4294901760, %v6793_v34  ;;  %v7886_v18 = vand.u32 4294901760, %v6818_v33 }
 0x243   : > { %v1632_v9 = vsub.f32 %v6765_v25, %v8404_v13  ;;  %v8407_v43 = vand.u32 4294901760, %v8406_v30  ;;  %v4295_v28 = vpack.c.bf16 %v1621_v60, %v1609_v1  ;;  %v7884_v26 = vand.u32 4294901760, %v6867_v16 }
 0x244   : > { %v1644_v58 = vsub.f32 %v6793_v34, %v8405_v19  ;;  %v7885_v42 = vand.u32 4294901760, %v6878_v10  ;;  %v8408_v56 = vand.u32 4294901760, %v6648_v62  ;;  %v4297_v21 = vpack.c.bf16 %v1639_v27, %v1627_v29 }
 0x245   : > { %v7020_v24 = vsub.f32 %v8406_v30, %v8407_v43  ;;  %v1650_v13 = vsub.f32 %v6823_v55, %v7888_v37  ;;  %v1662_v19 = vsub.f32 %v6851_v46, %v7883_v49  ;;  %v8409_v1 = vand.u32 4294901760, %v6658_v45  ;;  %4296 = vmatpush1.bf16.xpose.msra.mxu1 %v4295_v28 }
 0x246   : > { %v7027_v50 = vsub.f32 %v6648_v62, %v8408_v56  ;;  %v8410_v63 = vand.u32 4294901760, %v6609_v40  ;;  %v4679_v62 = vpack.c.bf16 %v3293_v14, %v3281_v31  ;;  %v3304_v29 = vsub.f32 %v6807_v0, %v7887_v20  ;;  %4298 = vmatprep.subr.bf16.mxu1 %v4297_v21 }
 0x247   : > { %v7038_v60 = vsub.f32 %v6658_v45, %v8409_v1  ;;  %v4681_v27 = vpack.c.bf16 %v3311_v17, %v3299_v11  ;;  %v1633_v43 = vand.u32 4294901760, %v1632_v9  ;;  %v1645_v56 = vand.u32 4294901760, %v1644_v58 }
 0x248   : > { %v7043_v30 = vsub.f32 %v6609_v40, %v8410_v63  ;;  %v3316_v49 = vsub.f32 %v6818_v33, %v7886_v18  ;;  %v3322_v45 = vsub.f32 %v6867_v16, %v7884_v26  ;;  %v3334_v40 = vsub.f32 %v6878_v10, %v7885_v42  ;;  %4680 = vmatpush1.bf16.xpose.msra.mxu0 %v4679_v62 }
 0x249   : > { %v7895_v31 = vand.u32 4294901760, %v6898_v7  ;;  %v7893_v14 = vand.u32 4294901760, %v6916_v61  ;;  %v1651_v9 = vand.u32 4294901760, %v1650_v13  ;;  %v1663_v11 = vand.u32 4294901760, %v1662_v19  ;;  %4682 = vmatprep.subr.bf16.mxu0 %v4681_v27 }
 0x24a   : > { %v7892_v17 = vand.u32 4294901760, %v6939_v2  ;;  %v7889_v58 = vand.u32 4294901760, %v6960_v22  ;;  %v8411_v28 = vand.u32 4294901760, %v6628_v39  ;;  %v3305_v63 = vand.u32 4294901760, %v3304_v29 }
 0x24b   : > { %v7890_v26 = vand.u32 4294901760, %v6923_v15  ;;  %v7891_v42 = vand.u32 4294901760, %v6934_v41  ;;  %v4299_v18 = vpack.c.bf16 %v1645_v56, %v1633_v43  ;;  %v3317_v20 = vand.u32 4294901760, %v3316_v49 }
 0x24c   : > { %v7064_v1 = vsub.f32 %v6628_v39, %v8411_v28  ;;  %v7894_v21 = vand.u32 4294901760, %v6975_v35  ;;  %v7896_v13 = vand.u32 4294901760, %v6986_v44  ;;  %v3323_v19 = vand.u32 4294901760, %v3322_v45 }
 0x24d   : > { %v3335_v37 = vand.u32 4294901760, %v3334_v40  ;;  %v1656_v39 = vsub.f32 %v6898_v7, %v7895_v31  ;;  %v1668_v29 = vsub.f32 %v6916_v61, %v7893_v14  ;;  %v8412_v28 = vand.u32 4294901760, %v6668_v4  ;;  %4300 = vmatpush1.bf16.xpose.msra.mxu1 %v4299_v18 }
 0x24e   : > { %v4301_v49 = vpack.c.bf16 %v1663_v11, %v1651_v9  ;;  %v1674_v27 = vsub.f32 %v6939_v2, %v7892_v17  ;;  %v1686_v43 = vsub.f32 %v6960_v22, %v7889_v58  ;;  %v8413_v56 = vand.u32 4294901760, %v6670_v54 }
 0x24f   : > { %v7079_v62 = vsub.f32 %v6668_v4, %v8412_v28  ;;  %v3328_v40 = vsub.f32 %v6923_v15, %v7890_v26  ;;  %v3340_v4 = vsub.f32 %v6934_v41, %v7891_v42  ;;  %v4683_v11 = vpack.c.bf16 %v3317_v20, %v3305_v63 }
 0x250   : > { %v7090_v45 = vsub.f32 %v6670_v54, %v8413_v56  ;;  %v3346_v28 = vsub.f32 %v6975_v35, %v7894_v21  ;;  %v3358_v54 = vsub.f32 %v6986_v44, %v7896_v13  ;;  %v8414_v58 = vand.u32 4294901760, %v6718_v8  ;;  %4302 = vmatprep.subr.bf16.mxu1 %v4301_v49 }
 0x251   : > { %v4685_v42 = vpack.c.bf16 %v3335_v37, %v3323_v19  ;;  %v1657_v17 = vand.u32 4294901760, %v1656_v39  ;;  %v1669_v14 = vand.u32 4294901760, %v1668_v29  ;;  %v1675_v20 = vand.u32 4294901760, %v1674_v27  ;;  %4684 = vmatpush1.bf16.xpose.msra.mxu0 %v4683_v11 }
 0x252   : > { %v7109_v26 = vsub.f32 %v6718_v8, %v8414_v58  ;;  %v1687_v63 = vand.u32 4294901760, %v1686_v43  ;;  %v7908_v21 = vand.u32 4294901760, %v7043_v30  ;;  %v7907_v31 = vand.u32 4294901760, %v7064_v1 }
 0x253   : > { %v3329_v9 = vand.u32 4294901760, %v3328_v40  ;;  %v3341_v13 = vand.u32 4294901760, %v3340_v4  ;;  %v8415_v56 = vand.u32 4294901760, %v7005_v12  ;;  %v7906_v8 = vand.u32 4294901760, %v7027_v50  ;;  %4686 = vmatprep.subr.bf16.mxu0 %v4685_v42 }
 0x254   : > { %v3347_v18 = vand.u32 4294901760, %v3346_v28  ;;  %v3359_v37 = vand.u32 4294901760, %v3358_v54  ;;  %v8416_v58 = vand.u32 4294901760, %v7020_v24  ;;  %v7900_v39 = vand.u32 4294901760, %v7038_v60 }
 0x255   : > { %v1680_v44 = vsub.f32 %v7005_v12, %v8415_v56  ;;  %v8417_v29 = vand.u32 4294901760, %v6720_v48  ;;  %v4303_v27 = vpack.c.bf16 %v1669_v14, %v1657_v17  ;;  %v7899_v43 = vand.u32 4294901760, %v7079_v62 }
 0x256   : > { %v1692_v19 = vsub.f32 %v7020_v24, %v8416_v58  ;;  %v7901_v40 = vand.u32 4294901760, %v7090_v45  ;;  %v4305_v4 = vpack.c.bf16 %v1687_v63, %v1675_v20  ;;  %v1698_v11 = vsub.f32 %v7043_v30, %v7908_v21 }
 0x257   : > { %v7124_v49 = vsub.f32 %v6720_v48, %v8417_v29  ;;  %v1710_v28 = vsub.f32 %v7064_v1, %v7907_v31  ;;  %v8419_v54 = vand.u32 4294901760, %v6739_v51  ;;  %v8421_v42 = vand.u32 4294901760, %v6741_v57  ;;  %4304 = vmatpush1.bf16.xpose.msra.mxu1 %v4303_v27  ;;  %v8447_v31 = vld [vmem:[#allocation37_spill] sm:$0xff] }
 0x258   : > { %v4687_v17 = vpack.c.bf16 %v3341_v13, %v3329_v9  ;;  %v3352_v56 = vsub.f32 %v7027_v50, %v7906_v8  ;;  %v4689_v20 = vpack.c.bf16 %v3359_v37, %v3347_v18  ;;  %v1681_v63 = vand.u32 4294901760, %v1680_v44  ;;  %4306 = vmatprep.subr.bf16.mxu1 %v4305_v4  ;;  %v8446_v8 = vld [vmem:[#allocation43_spill] sm:$0xff] }
 0x259   : > { %8418 = vst [vmem:[#allocation79_spill] sm:$0xff] %v7124_v49  ;;  %v7137_v48 = vsub.f32 %v6739_v51, %v8419_v54  ;;  %v7142_v14 = vsub.f32 %v6741_v57, %v8421_v42  ;;  %v1693_v58 = vand.u32 4294901760, %v1692_v19  ;;  %v3364_v29 = vsub.f32 %v7038_v60, %v7900_v39 }
 0x25a   : > { %v3370_v51 = vsub.f32 %v7079_v62, %v7899_v43  ;;  %v3382_v57 = vsub.f32 %v7090_v45, %v7901_v40  ;;  %v7905_v13 = vand.u32 4294901760, %v7109_v26  ;;  %v7904_v9 = vand.u32 4294901760, %v7124_v49  ;;  %4688 = vmatpush1.bf16.xpose.msra.mxu0 %v4687_v17 }
 0x25b   : > { %8420 = vst [vmem:[#allocation84_spill] sm:$0xff] %v7137_v48  ;;  %8422 = vst [vmem:[#allocation85_spill] sm:$0xff] %v7142_v14  ;;  %v1699_v44 = vand.u32 4294901760, %v1698_v11  ;;  %v1711_v18 = vand.u32 4294901760, %v1710_v28  ;;  %v3353_v37 = vand.u32 4294901760, %v3352_v56  ;;  %v4307_v19 = vpack.c.bf16 %v1693_v58, %v1681_v63  ;;  %4690 = vmatprep.subr.bf16.mxu0 %v4689_v20 }
 0x25c   : > { %v3365_v54 = vand.u32 4294901760, %v3364_v29  ;;  %v7902_v27 = vand.u32 4294901760, %v7137_v48  ;;  %v7903_v42 = vand.u32 4294901760, %v7142_v14  ;;  %v3371_v43 = vand.u32 4294901760, %v3370_v51 }
 0x25d   : > { %v3383_v39 = vand.u32 4294901760, %v3382_v57  ;;  %v1704_v40 = vsub.f32 %v7109_v26, %v7905_v13  ;;  %v1716_v4 = vsub.f32 %v7124_v49, %v7904_v9  ;;  %v4309_v11 = vpack.c.bf16 %v1711_v18, %v1699_v44  ;;  %v8423_v18 = vld [vmem:[#allocation81_spill] sm:$0xff] }
 0x25e   : > { %v4691_v28 = vpack.c.bf16 %v3365_v54, %v3353_v37  ;;  %v3376_v17 = vsub.f32 %v7137_v48, %v7902_v27  ;;  %v3388_v56 = vsub.f32 %v7142_v14, %v7903_v42  ;;  %v8424_v37 = vpack.c.bf16 %v6204_v32, %v8423_v18  ;;  %v8425_v54 = vld [vmem:[#allocation61_spill] sm:$0xff]  ;;  %v8426_v27 = vld [vmem:[#allocation58_spill] sm:$0xff] }
 0x25f   : > { %4308 = vmatpush1.bf16.xpose.msra.mxu1 %v4307_v19  ;;  %v4693_v20 = vpack.c.bf16 %v3383_v39, %v3371_v43  ;;  %v1705_v63 = vand.u32 4294901760, %v1704_v40  ;;  %v1717_v58 = vand.u32 4294901760, %v1716_v4  ;;  %v8427_v42 = vpack.c.bf16 %v8425_v54, %v8426_v27  ;;  %v8428_v43 = vld [vmem:[#allocation34_spill] sm:$0xff]  ;;  %v8429_v40 = vld [vmem:[#allocation35_spill] sm:$0xff]  ;;  %v8430_v4 = vld [vmem:[#allocation12_spill] sm:$0xff] }
 0x260   : > { %4310 = vmatprep.subr.bf16.mxu1 %v4309_v11  ;;  %v3377_v29 = vand.u32 4294901760, %v3376_v17  ;;  %v3389_v51 = vand.u32 4294901760, %v3388_v56  ;;  %v4315_v39 = vpack.c.bf16 %v6555_v3, %v6523_v38  ;;  %v4317_v19 = vpack.c.bf16 %v8429_v40, %v8428_v43  ;;  %v8435_v56 = vld [vmem:[#allocation36_spill] sm:$0xff] }
 0x261   : > { %v4311_v57 = vpack.c.bf16 %v1717_v58, %v1705_v63  ;;  %v8431_v11 = vpack.c.bf16 %v6263_v47, %v8430_v4  ;;  %v8437_v58 = vld [vmem:[#allocation30_spill] sm:$0xff]  ;;  %v4325_v9 = vpack.c.bf16 %v6646_v59, %v6641_v52  ;;  %v8448_v21 = vpack.c.bf16 %v8446_v8, %v8447_v31  ;;  %v8454_v59 = vld [vmem:[#allocation53_spill] sm:$0xff]  ;;  %v8455_v52 = vld [vmem:[#allocation59_spill] sm:$0xff] }
 0x262   : > { %4692 = vmatpush1.bf16.xpose.msra.mxu0 %v4691_v28  ;;  %v4695_v44 = vpack.c.bf16 %v3389_v51, %v3377_v29  ;;  %v8433_v28 = vld [vmem:[#allocation14_spill] sm:$0xff]  ;;  %v8438_v29 = vld [vmem:[#allocation33_spill] sm:$0xff] }
 0x263   : > { %4694 = vmatprep.subr.bf16.mxu0 %v4693_v20  ;;  %v8436_v20 = vld [vmem:[#allocation41_spill] sm:$0xff]  ;;  %v4703_v51 = vpack.c.bf16 %v8438_v29, %v8437_v58  ;;  %v4711_v58 = vpack.c.bf16 %v8455_v52, %v8454_v59  ;;  %v4717_v52 = vpack.c.bf16 %v6878_v10, %v6867_v16 }
 0x264   : > { %v4321_v63 = vpack.c.bf16 %v8436_v20, %v8435_v56  ;;  %v8449_v29 = vld [vmem:[#allocation57_spill] sm:$0xff] }
 0x267   : > { %4312 = vmatpush1.bf16.xpose.msra.mxu1 %v4311_v57  ;;  %v8439_v57 = vld [vmem:[#allocation19_spill] sm:$0xff] }
 0x268   : > { %4314 = vmatprep.subr.bf16.mxu1 %v8424_v37 }
 0x26a   : > { %4696 = vmatpush1.bf16.xpose.msra.mxu0 %v4695_v44  ;;  %v8440_v44 = vld [vmem:[#allocation15_spill] sm:$0xff] }
 0x26b   : > { %4698 = vmatprep.subr.bf16.mxu0 %v8427_v42  ;;  %v8432_v42 = vld [vmem:[#allocation13_spill] sm:$0xff]  ;;  %v8441_v37 = vpack.c.bf16 %v8439_v57, %v8440_v44 }
 0x26c   : > { %v8434_v17 = vpack.c.bf16 %v8432_v42, %v8433_v28 }
 0x26e   : > { %1752 = vmatmul.mubr.f32.vlgmr.msra.gmra.mrb[0].mxu1 %v8370_v36 }
 0x26f   : > { %4316 = vmatpush1.bf16.xpose.msra.mxu1 %v4315_v39  ;;  %1885 = vmatprep.mubr.f32.mxu1 %v8364_v6  ;;  %v8442_v39 = vld [vmem:[#allocation32_spill] sm:$0xff] }
 0x270   : > { %4318 = vmatprep.subr.bf16.mxu1 %v4317_v19  ;;  %v8443_v19 = vld [vmem:[#allocation28_spill] sm:$0xff] }
 0x271   : > { %3424 = vmatmul.mubr.f32.vlgmr.msra.gmra.mrb[0].mxu0 %v8370_v36 }
 0x272   : > { %4700 = vmatpush1.bf16.xpose.msra.mxu0 %v8431_v11  ;;  %3557 = vmatprep.mubr.f32.mxu0 %v8364_v6  ;;  %v8444_v11 = vpack.c.bf16 %v8442_v39, %v8443_v19  ;;  %v8453_v39 = vld [vmem:[#allocation64_spill] sm:$0xff] }
 0x273   : > { %4702 = vmatprep.subr.bf16.mxu0 %v8434_v17  ;;  %v8445_v17 = vld [vmem:[#allocation47_spill] sm:$0xff] }
 0x274   : > { %v4707_v13 = vpack.c.bf16 %v8445_v17, %v6620_v5  ;;  %v8456_v17 = vld [vmem:[#allocation83_spill] sm:$0xff] }
 0x277   : > { %4320 = vmatpush1.bf16.xpose.msra.mxu1 %v8441_v37  ;;  %v8450_v37 = vld [vmem:[#allocation52_spill] sm:$0xff] }
 0x278   : > { %4322 = vmatprep.subr.bf16.mxu1 %v4321_v63  ;;  %v8451_v63 = vpack.c.bf16 %v8449_v29, %v8450_v37 }
 0x27a   : > { %4704 = vmatpush1.bf16.xpose.msra.mxu0 %v4703_v51  ;;  %v4327_v51 = vpack.c.bf16 %v6688_v53, %v6676_v23  ;;  %v4715_v53 = vpack.c.bf16 %v6818_v33, %v6807_v0 }
 0x27b   : > { %4706 = vmatprep.subr.bf16.mxu0 %v8444_v11  ;;  %v8452_v11 = vld [vmem:[#allocation56_spill] sm:$0xff] }
 0x27c   : > { %v4329_v19 = vpack.c.bf16 %v8453_v39, %v8452_v11 }
 0x27f   : > { %4324 = vmatpush1.bf16.xpose.msra.mxu1 %v8448_v21  ;;  %v8457_v21 = vld [vmem:[#allocation77_spill] sm:$0xff] }
 0x280   : > { %4326 = vmatprep.subr.bf16.mxu1 %v4325_v9  ;;  %v8458_v9 = vpack.c.bf16 %v8456_v17, %v8457_v21 }
 0x282   : > { %4708 = vmatpush1.bf16.xpose.msra.mxu0 %v4707_v13  ;;  %v4331_v13 = vpack.c.bf16 %v6793_v34, %v6765_v25 }
 0x283   : > { %4710 = vmatprep.subr.bf16.mxu0 %v8451_v63  ;;  %v4333_v63 = vpack.c.bf16 %v6851_v46, %v6823_v55 }
 0x287   : > { %4328 = vmatpush1.bf16.xpose.msra.mxu1 %v4327_v51  ;;  %v4719_v51 = vpack.c.bf16 %v6934_v41, %v6923_v15 }
 0x288   : > { %4330 = vmatprep.subr.bf16.mxu1 %v4329_v19  ;;  %v4337_v19 = vpack.c.bf16 %v6960_v22, %v6939_v2 }
 0x28a   : > { %4712 = vmatpush1.bf16.xpose.msra.mxu0 %v4711_v58  ;;  %v4335_v58 = vpack.c.bf16 %v6916_v61, %v6898_v7 }
 0x28b   : > { %4714 = vmatprep.subr.bf16.mxu0 %v8458_v9  ;;  %v8459_v9 = vld [vmem:[#allocation78_spill] sm:$0xff] }
 0x28c   : > { %v4721_v33 = vpack.c.bf16 %v8459_v9, %v6975_v35 }
 0x28f   : > { %4332 = vmatpush1.bf16.xpose.msra.mxu1 %v4331_v13  ;;  %v4723_v13 = vpack.c.bf16 %v7038_v60, %v7027_v50 }
 0x290   : > { %4334 = vmatprep.subr.bf16.mxu1 %v4333_v63  ;;  %v4725_v63 = vpack.c.bf16 %v7090_v45, %v7079_v62 }
 0x292   : > { %4716 = vmatpush1.bf16.xpose.msra.mxu0 %v4715_v53  ;;  %v4339_v53 = vpack.c.bf16 %v7020_v24, %v7005_v12 }
 0x293   : > { %4718 = vmatprep.subr.bf16.mxu0 %v4717_v52  ;;  %v4341_v52 = vpack.c.bf16 %v7064_v1, %v7043_v30 }
 0x297   : > { %4336 = vmatpush1.bf16.xpose.msra.mxu1 %v4335_v58  ;;  %v4343_v58 = vpack.c.bf16 %v7124_v49, %v7109_v26  ;;  %v8475_v49 = vld [vmem:[#allocation65_spill] sm:$0xff] }
 0x298   : > { %4338 = vmatprep.subr.bf16.mxu1 %v4337_v19  ;;  %v8460_v19 = vld [vmem:[#allocation69_spill] sm:$0xff] }
 0x29a   : > { %4720 = vmatpush1.bf16.xpose.msra.mxu0 %v4719_v51  ;;  %v8461_v51 = vld [vmem:[#allocation82_spill] sm:$0xff] }
 0x29b   : > { %4722 = vmatprep.subr.bf16.mxu0 %v4721_v33  ;;  %v4727_v33 = vpack.c.bf16 %v7142_v14, %v7137_v48  ;;  %v8471_v14 = vld [vmem:[#allocation44_spill] sm:$0xff]  ;;  %v8473_v48 = vld [vmem:[#allocation55_spill] sm:$0xff] }
 0x29f   : > { %4340 = vmatpush1.bf16.xpose.msra.mxu1 %v4339_v53  ;;  %v8462_v53 = vld [vmem:[#allocation63_spill] sm:$0xff] }
 0x2a0   : > { %4342 = vmatprep.subr.bf16.mxu1 %v4341_v52  ;;  %v8463_v52 = vld [vmem:[#allocation71_spill] sm:$0xff] }
 0x2a2   : > { %4724 = vmatpush1.bf16.xpose.msra.mxu0 %v4723_v13  ;;  %v8464_v13 = vld [vmem:[#allocation72_spill] sm:$0xff] }
 0x2a3   : > { %4726 = vmatprep.subr.bf16.mxu0 %v4725_v63  ;;  %v8465_v63 = vld [vmem:[#allocation11_spill] sm:$0xff] }
 0x2a7   : > { %4344 = vmatpush1.bf16.xpose.msra.mxu1 %v4343_v58  ;;  %v8466_v58 = vld [vmem:[#allocation16_spill] sm:$0xff] }
 0x2a8   : > { %4346 = vmatprep.subr.bf16.mxu1 %v8460_v19  ;;  %v8469_v19 = vld [vmem:[#allocation31_spill] sm:$0xff] }
 0x2aa   : > { %4728 = vmatpush1.bf16.xpose.msra.mxu0 %v4727_v33  ;;  %v8467_v33 = vld [vmem:[#allocation22_spill] sm:$0xff] }
 0x2ab   : > { %4730 = vmatprep.subr.bf16.mxu0 %v8461_v51  ;;  %v8468_v51 = vld [vmem:[#allocation23_spill] sm:$0xff] }
 0x2ae   : > { %1886 = vmatmul.mubr.f32.vlgmr.msra.gmra.mrb[0].mxu1 %v8364_v6 }
 0x2af   : > { %4348 = vmatpush1.bf16.xpose.msra.mxu1 %v8462_v53  ;;  %1987 = vmatprep.mubr.f32.mxu1 %v8364_v6  ;;  %v8470_v53 = vld [vmem:[#allocation40_spill] sm:$0xff] }
 0x2b0   : > { %4350 = vmatprep.subr.bf16.mxu1 %v8463_v52  ;;  %v8472_v52 = vld [vmem:[#allocation49_spill] sm:$0xff] }
 0x2b1   : > { %3558 = vmatmul.mubr.f32.vlgmr.msra.gmra.mrb[0].mxu0 %v8364_v6 }
 0x2b2   : > { %4732 = vmatpush1.bf16.xpose.msra.mxu0 %v8464_v13  ;;  %3659 = vmatprep.mubr.f32.mxu0 %v8364_v6  ;;  %v8474_v13 = vld [vmem:[#allocation60_spill] sm:$0xff] }
 0x2b3   : > { %4734 = vmatprep.subr.bf16.mxu0 %v8465_v63  ;;  %v8476_v63 = vld [vmem:[#allocation66_spill] sm:$0xff] }
 0x2b7   : > { %4352 = vmatpush1.bf16.xpose.msra.mxu1 %v8466_v58  ;;  %v8477_v58 = vld [vmem:[#allocation70_spill] sm:$0xff] }
 0x2b8   : > { %4354 = vmatprep.subr.bf16.mxu1 %v8467_v33  ;;  %v8478_v33 = vld [vmem:[#allocation17_spill] sm:$0xff] }
 0x2ba   : > { %4736 = vmatpush1.bf16.xpose.msra.mxu0 %v8468_v51  ;;  %v8479_v51 = vld [vmem:[#allocation24_spill] sm:$0xff] }
 0x2bb   : > { %4738 = vmatprep.subr.bf16.mxu0 %v8469_v19  ;;  %v8480_v19 = vld [vmem:[#allocation25_spill] sm:$0xff] }
 0x2bf   : > { %4356 = vmatpush1.bf16.xpose.msra.mxu1 %v8470_v53  ;;  %v8481_v53 = vld [vmem:[#allocation26_spill] sm:$0xff] }
 0x2c0   : > { %4358 = vmatprep.subr.bf16.mxu1 %v8471_v14  ;;  %v8482_v14 = vld [vmem:[#allocation39_spill] sm:$0xff] }
 0x2c2   : > { %4740 = vmatpush1.bf16.xpose.msra.mxu0 %v8472_v52  ;;  %v8483_v52 = vld [vmem:[#allocation46_spill] sm:$0xff] }
 0x2c3   : > { %4742 = vmatprep.subr.bf16.mxu0 %v8473_v48  ;;  %v8484_v48 = vld [vmem:[#allocation48_spill] sm:$0xff] }
 0x2c7   : > { %4360 = vmatpush1.bf16.xpose.msra.mxu1 %v8474_v13  ;;  %v8485_v13 = vld [vmem:[#allocation50_spill] sm:$0xff] }
 0x2c8   : > { %4362 = vmatprep.subr.bf16.mxu1 %v8475_v49  ;;  %v8486_v49 = vld [vmem:[#allocation54_spill] sm:$0xff] }
 0x2ca   : > { %4744 = vmatpush1.bf16.xpose.msra.mxu0 %v8476_v63  ;;  %v8487_v63 = vld [vmem:[#allocation62_spill] sm:$0xff] }
 0x2cb   : > { %4746 = vmatprep.subr.bf16.mxu0 %v8477_v58  ;;  %v8488_v58 = vld [vmem:[#allocation67_spill] sm:$0xff] }
 0x2cf   : > { %4364 = vmatpush1.bf16.xpose.msra.mxu1 %v8478_v33  ;;  %v8489_v33 = vld [vmem:[#allocation68_spill] sm:$0xff] }
 0x2d0   : > { %4366 = vmatprep.subr.bf16.mxu1 %v8479_v51 }
 0x2d2   : > { %4748 = vmatpush1.bf16.xpose.msra.mxu0 %v8480_v19  ;;  %v8490_v19 = vand.u32 4294901760, %v8423_v18  ;;  %v8498_v18 = vand.u32 4294901760, %v8428_v43 }
 0x2d3   : > { %4750 = vmatprep.subr.bf16.mxu0 %v8481_v53  ;;  %v8491_v53 = vand.u32 4294901760, %v6204_v32  ;;  %v8499_v32 = vand.u32 4294901760, %v8429_v40  ;;  %v8506_v40 = vand.u32 4294901760, %v8435_v56  ;;  %v8517_v56 = vand.u32 4294901760, %v8446_v8  ;;  %v8528_v8 = vld [vmem:[#allocation51_spill] sm:$0xff] }
 0x2d5   : > { %v4377_v51 = vpack.c.bf16 %v8491_v53, %v8490_v19  ;;  %v4381_v19 = vpack.c.bf16 %v8499_v32, %v8498_v18  ;;  %v8514_v18 = vld [vmem:[#allocation32_spill] sm:$0xff] }
 0x2d6   : > { %v8515_v32 = vand.u32 4294901760, %v8514_v18 }
 0x2d7   : > { %4368 = vmatpush1.bf16.xpose.msra.mxu1 %v8482_v14  ;;  %v8492_v14 = vld [vmem:[#allocation73_spill] sm:$0xff] }
 0x2d8   : > { %4370 = vmatprep.subr.bf16.mxu1 %v8483_v52  ;;  %v8493_v52 = vand.u32 4294901760, %v8426_v27  ;;  %v8500_v27 = vand.u32 4294901760, %v8430_v4  ;;  %v8507_v4 = vand.u32 4294901760, %v8436_v20 }
 0x2da   : > { %4752 = vmatpush1.bf16.xpose.msra.mxu0 %v8484_v48  ;;  %v8494_v48 = vand.u32 4294901760, %v8425_v54 }
 0x2db   : > { %4754 = vmatprep.subr.bf16.mxu0 %v8485_v13 }
 0x2dc   : > { %v4761_v13 = vpack.c.bf16 %v8494_v48, %v8493_v52  ;;  %v8501_v48 = vand.u32 4294901760, %v6263_v47  ;;  %v8505_v47 = vand.u32 4294901760, %v8439_v57  ;;  %v8516_v57 = vand.u32 4294901760, %v8447_v31 }
 0x2dd   : > { %v8527_v31 = vand.u32 4294901760, %v6676_v23  ;;  %v8537_v23 = vand.u32 4294901760, %v6765_v25  ;;  %v8547_v25 = vand.u32 4294901760, %v6916_v61  ;;  %v8555_v61 = vand.u32 4294901760, %v7020_v24  ;;  %v8563_v24 = vld [vmem:[#allocation79_spill] sm:$0xff] }
 0x2de   : > { %v4763_v54 = vpack.c.bf16 %v8501_v48, %v8500_v27  ;;  %v4387_v20 = vpack.c.bf16 %v8517_v56, %v8516_v57  ;;  %v8520_v48 = vld [vmem:[#allocation45_spill] sm:$0xff]  ;;  %v8541_v57 = vand.u32 4294901760, %v6807_v0  ;;  %v8542_v56 = vld [vmem:[#allocation75_spill] sm:$0xff]  ;;  %v8549_v0 = vand.u32 4294901760, %v6960_v22 }
 0x2df   : > { %4372 = vmatpush1.bf16.xpose.msra.mxu1 %v8486_v49  ;;  %v8495_v49 = vld [vmem:[#allocation76_spill] sm:$0xff]  ;;  %v8556_v22 = vand.u32 4294901760, %v7043_v30  ;;  %v8564_v30 = vand.u32 4294901760, %v8563_v24 }
 0x2e0   : > { %4374 = vmatprep.subr.bf16.mxu1 %v8487_v63 }
 0x2e2   : > { %4756 = vmatpush1.bf16.xpose.msra.mxu0 %v8488_v58  ;;  %v8496_v58 = vand.u32 4294901760, %v6523_v38  ;;  %v8503_v38 = vand.u32 4294901760, %v8432_v42  ;;  %v4385_v42 = vpack.c.bf16 %v8507_v4, %v8506_v40  ;;  %v8526_v40 = vand.u32 4294901760, %v8449_v29 }
 0x2e3   : > { %4758 = vmatprep.subr.bf16.mxu0 %v8489_v33  ;;  %v8497_v33 = vand.u32 4294901760, %v6555_v3  ;;  %v8504_v3 = vand.u32 4294901760, %v8440_v44  ;;  %v8518_v44 = vld [vmem:[#allocation42_spill] sm:$0xff]  ;;  %v8535_v29 = vand.u32 4294901760, %v8457_v21  ;;  %v8543_v21 = vand.u32 4294901760, %v8542_v56  ;;  %v8591_v56 = vld [vmem:[#allocation39_spill] sm:$0xff] }
 0x2e4   : > { %v8519_v27 = vand.u32 4294901760, %v8518_v44  ;;  %v8545_v44 = vand.u32 4294901760, %v6878_v10  ;;  %v8552_v10 = vand.u32 4294901760, %v6975_v35  ;;  %v8559_v35 = vand.u32 4294901760, %v7038_v60 }
 0x2e5   : > { %v4379_v63 = vpack.c.bf16 %v8497_v33, %v8496_v58  ;;  %v4383_v43 = vpack.c.bf16 %v8505_v47, %v8504_v3 }
 0x2e7   : > { %4376 = vmatpush1.bf16.xpose.msra.mxu1 %v8492_v14 }
 0x2e8   : > { %4378 = vmatprep.subr.bf16.mxu1 %v4377_v51  ;;  %v8502_v51 = vand.u32 4294901760, %v8433_v28  ;;  %v8508_v28 = vld [vmem:[#allocation30_spill] sm:$0xff] }
 0x2e9   : > { %v8509_v52 = vand.u32 4294901760, %v8508_v28 }
 0x2ea   : > { %4760 = vmatpush1.bf16.xpose.msra.mxu0 %v8495_v49  ;;  %v4765_v53 = vpack.c.bf16 %v8503_v38, %v8502_v51  ;;  %v8522_v38 = vand.u32 4294901760, %v6620_v5  ;;  %v8531_v5 = vand.u32 4294901760, %v8453_v39 }
 0x2eb   : > { %4762 = vmatprep.subr.bf16.mxu0 %v4761_v13  ;;  %v8510_v13 = vld [vmem:[#allocation33_spill] sm:$0xff] }
 0x2ee   : > { %1988 = vmatmul.mubr.f32.vlgmr.msra.gmra.mrb[0].mxu1 %v8364_v6 }
 0x2ef   : > { %4380 = vmatpush1.bf16.xpose.msra.mxu1 %v4379_v63  ;;  %2153 = vmatprep.mubr.f32.mxu1 %v8370_v36  ;;  %v8511_v63 = vand.u32 4294901760, %v8510_v13 }
 0x2f0   : > { %4382 = vmatprep.subr.bf16.mxu1 %v4381_v19 }
 0x2f1   : > { %3660 = vmatmul.mubr.f32.vlgmr.msra.gmra.mrb[0].mxu0 %v8364_v6  ;;  %v4767_v58 = vpack.c.bf16 %v8511_v63, %v8509_v52  ;;  %v8512_v6 = vld [vmem:[#allocation28_spill] sm:$0xff]  ;;  %v8530_v52 = vand.u32 4294901760, %v8452_v11  ;;  %v8532_v63 = vand.u32 4294901760, %v8454_v59  ;;  %v8538_v11 = vand.u32 4294901760, %v6793_v34 }
 0x2f2   : > { %4764 = vmatpush1.bf16.xpose.msra.mxu0 %v4763_v54  ;;  %3825 = vmatprep.mubr.f32.mxu0 %v8370_v36  ;;  %v8513_v33 = vand.u32 4294901760, %v8512_v6  ;;  %v8521_v54 = vand.u32 4294901760, %v8520_v48  ;;  %v8540_v59 = vand.u32 4294901760, %v6851_v46  ;;  %v8546_v34 = vand.u32 4294901760, %v6898_v7 }
 0x2f3   : > { %4766 = vmatprep.subr.bf16.mxu0 %v4765_v53  ;;  %v8523_v53 = vld [vmem:[#allocation47_spill] sm:$0xff]  ;;  %v4393_v13 = vpack.c.bf16 %v8531_v5, %v8530_v52  ;;  %v4395_v39 = vpack.c.bf16 %v8538_v11, %v8537_v23  ;;  %v8554_v7 = vand.u32 4294901760, %v7005_v12  ;;  %v8562_v12 = vand.u32 4294901760, %v7109_v26  ;;  %v8575_v5 = vld [vmem:[#allocation16_spill] sm:$0xff]  ;;  %v8584_v23 = vld [vmem:[#allocation65_spill] sm:$0xff] }
 0x2f4   : > { %v4769_v19 = vpack.c.bf16 %v8515_v32, %v8513_v33  ;;  %v4389_v51 = vpack.c.bf16 %v8521_v54, %v8519_v27  ;;  %v8524_v3 = vand.u32 4294901760, %v8523_v53  ;;  %v8536_v33 = vand.u32 4294901760, %v8456_v17  ;;  %v8572_v26 = vld [vmem:[#allocation71_spill] sm:$0xff]  ;;  %v8585_v11 = vld [vmem:[#allocation66_spill] sm:$0xff] }
 0x2f5   : > { %v8539_v32 = vand.u32 4294901760, %v6823_v55  ;;  %v8544_v17 = vand.u32 4294901760, %v6867_v16  ;;  %v4399_v46 = vpack.c.bf16 %v8547_v25, %v8546_v34  ;;  %v8548_v55 = vand.u32 4294901760, %v6939_v2  ;;  %v8574_v52 = vld [vmem:[#allocation11_spill] sm:$0xff]  ;;  %v8598_v25 = vld [vmem:[#allocation68_spill] sm:$0xff] }
 0x2f6   : > { %v4771_v47 = vpack.c.bf16 %v8524_v3, %v8522_v38  ;;  %v4777_v18 = vpack.c.bf16 %v8536_v33, %v8535_v29  ;;  %v8550_v54 = vand.u32 4294901760, %v6923_v15  ;;  %v8551_v16 = vand.u32 4294901760, %v6934_v41  ;;  %v8581_v29 = vld [vmem:[#allocation49_spill] sm:$0xff]  ;;  %v8582_v33 = vld [vmem:[#allocation55_spill] sm:$0xff] }
 0x2f7   : > { %4384 = vmatpush1.bf16.xpose.msra.mxu1 %v4383_v43  ;;  %v8525_v43 = vand.u32 4294901760, %v8450_v37  ;;  %v4781_v27 = vpack.c.bf16 %v8545_v44, %v8544_v17  ;;  %v4401_v48 = vpack.c.bf16 %v8549_v0, %v8548_v55  ;;  %v8553_v38 = vand.u32 4294901760, %v8459_v9  ;;  %v8594_v17 = vld [vmem:[#allocation50_spill] sm:$0xff]  ;;  %v8597_v34 = vld [vmem:[#allocation67_spill] sm:$0xff] }
 0x2f8   : > { %4386 = vmatprep.subr.bf16.mxu1 %v4385_v42  ;;  %v8529_v42 = vand.u32 4294901760, %v8528_v8  ;;  %v4403_v2 = vpack.c.bf16 %v8555_v61, %v8554_v7  ;;  %v8557_v15 = vand.u32 4294901760, %v7064_v1  ;;  %v8558_v3 = vand.u32 4294901760, %v7027_v50  ;;  %v8567_v50 = vld [vmem:[#allocation85_spill] sm:$0xff]  ;;  %v8595_v44 = vld [vmem:[#allocation54_spill] sm:$0xff] }
 0x2f9   : > { %v4773_v4 = vpack.c.bf16 %v8526_v40, %v8525_v43  ;;  %v4785_v53 = vpack.c.bf16 %v8553_v38, %v8552_v10  ;;  %v8560_v9 = vand.u32 4294901760, %v7079_v62  ;;  %v8561_v43 = vand.u32 4294901760, %v7090_v45  ;;  %v8570_v62 = vld [vmem:[#allocation82_spill] sm:$0xff]  ;;  %v8571_v45 = vld [vmem:[#allocation63_spill] sm:$0xff] }
 0x2fa   : > { %4768 = vmatpush1.bf16.xpose.msra.mxu0 %v4767_v58  ;;  %v4391_v28 = vpack.c.bf16 %v8529_v42, %v8527_v31  ;;  %v8533_v58 = vld [vmem:[#allocation59_spill] sm:$0xff]  ;;  %v4405_v41 = vpack.c.bf16 %v8557_v15, %v8556_v22  ;;  %v4407_v1 = vpack.c.bf16 %v8564_v30, %v8562_v12  ;;  %v8568_v8 = vand.u32 4294901760, %v8567_v50  ;;  %v8569_v42 = vld [vmem:[#allocation69_spill] sm:$0xff] }
 0x2fb   : > { %4770 = vmatprep.subr.bf16.mxu0 %v4769_v19  ;;  %v8534_v37 = vand.u32 4294901760, %v8533_v58  ;;  %v4397_v19 = vpack.c.bf16 %v8540_v59, %v8539_v32  ;;  %v4789_v40 = vpack.c.bf16 %v8561_v43, %v8560_v9  ;;  %v8578_v58 = vld [vmem:[#allocation31_spill] sm:$0xff]  ;;  %v8587_v32 = vld [vmem:[#allocation17_spill] sm:$0xff]  ;;  %v8588_v59 = vld [vmem:[#allocation24_spill] sm:$0xff] }
 0x2fd   : > { %v4775_v6 = vpack.c.bf16 %v8534_v37, %v8532_v63  ;;  %v8577_v63 = vld [vmem:[#allocation23_spill] sm:$0xff]  ;;  %v8579_v37 = vld [vmem:[#allocation40_spill] sm:$0xff] }
 0x2ff   : > { %4388 = vmatpush1.bf16.xpose.msra.mxu1 %v4387_v20  ;;  %v4779_v20 = vpack.c.bf16 %v8543_v21, %v8541_v57  ;;  %v8590_v57 = vld [vmem:[#allocation26_spill] sm:$0xff] }
 0x300   : > { %4390 = vmatprep.subr.bf16.mxu1 %v4389_v51  ;;  %v4783_v51 = vpack.c.bf16 %v8551_v16, %v8550_v54  ;;  %v8592_v21 = vld [vmem:[#allocation46_spill] sm:$0xff] }
 0x302   : > { %4772 = vmatpush1.bf16.xpose.msra.mxu0 %v4771_v47  ;;  %v4787_v47 = vpack.c.bf16 %v8559_v35, %v8558_v3 }
 0x303   : > { %4774 = vmatprep.subr.bf16.mxu0 %v4773_v4  ;;  %v8565_v4 = vld [vmem:[#allocation84_spill] sm:$0xff] }
 0x304   : > { %v8566_v31 = vand.u32 4294901760, %v8565_v4 }
 0x306   : > { %v4791_v60 = vpack.c.bf16 %v8568_v8, %v8566_v31 }
 0x307   : > { %4392 = vmatpush1.bf16.xpose.msra.mxu1 %v4391_v28  ;;  %v8573_v28 = vld [vmem:[#allocation72_spill] sm:$0xff] }
 0x308   : > { %4394 = vmatprep.subr.bf16.mxu1 %v4393_v13  ;;  %v8576_v13 = vld [vmem:[#allocation22_spill] sm:$0xff] }
 0x30a   : > { %4776 = vmatpush1.bf16.xpose.msra.mxu0 %v4775_v6  ;;  %v8580_v6 = vld [vmem:[#allocation44_spill] sm:$0xff] }
 0x30b   : > { %4778 = vmatprep.subr.bf16.mxu0 %v4777_v18  ;;  %v8583_v18 = vld [vmem:[#allocation60_spill] sm:$0xff] }
 0x30f   : > { %4396 = vmatpush1.bf16.xpose.msra.mxu1 %v4395_v39  ;;  %v8586_v39 = vld [vmem:[#allocation70_spill] sm:$0xff] }
 0x310   : > { %4398 = vmatprep.subr.bf16.mxu1 %v4397_v19  ;;  %v8589_v19 = vld [vmem:[#allocation25_spill] sm:$0xff] }
 0x312   : > { %4780 = vmatpush1.bf16.xpose.msra.mxu0 %v4779_v20  ;;  %v8593_v20 = vld [vmem:[#allocation48_spill] sm:$0xff] }
 0x313   : > { %4782 = vmatprep.subr.bf16.mxu0 %v4781_v27  ;;  %v8596_v27 = vld [vmem:[#allocation62_spill] sm:$0xff] }
 0x317   : > { %4400 = vmatpush1.bf16.xpose.msra.mxu1 %v4399_v46 }
 0x318   : > { %4402 = vmatprep.subr.bf16.mxu1 %v4401_v48 }
 0x31a   : > { %4784 = vmatpush1.bf16.xpose.msra.mxu0 %v4783_v51 }
 0x31b   : > { %4786 = vmatprep.subr.bf16.mxu0 %v4785_v53 }
 0x31f   : > { %4404 = vmatpush1.bf16.xpose.msra.mxu1 %v4403_v2 }
 0x320   : > { %4406 = vmatprep.subr.bf16.mxu1 %v4405_v41 }
 0x322   : > { %4788 = vmatpush1.bf16.xpose.msra.mxu0 %v4787_v47 }
 0x323   : > { %4790 = vmatprep.subr.bf16.mxu0 %v4789_v40 }
 0x327   : > { %4408 = vmatpush1.bf16.xpose.msra.mxu1 %v4407_v1 }
 0x328   : > { %4410 = vmatprep.subr.bf16.mxu1 %v8569_v42 }
 0x32a   : > { %4792 = vmatpush1.bf16.xpose.msra.mxu0 %v4791_v60 }
 0x32b   : > { %4794 = vmatprep.subr.bf16.mxu0 %v8570_v62 }
 0x32e   : > { %2154 = vmatmul.mubr.f32.vlgmr.msra.gmra.mrb[0].mxu1 %v8370_v36 }
 0x32f   : > { %4412 = vmatpush1.bf16.xpose.msra.mxu1 %v8571_v45  ;;  %2255 = vmatprep.mubr.f32.mxu1 %v8370_v36 }
 0x330   : > { %4414 = vmatprep.subr.bf16.mxu1 %v8572_v26 }
 0x331   : > { %3826 = vmatmul.mubr.f32.vlgmr.msra.gmra.mrb[0].mxu0 %v8370_v36 }
 0x332   : > { %4796 = vmatpush1.bf16.xpose.msra.mxu0 %v8573_v28  ;;  %3927 = vmatprep.mubr.f32.mxu0 %v8370_v36 }
 0x333   : > { %4798 = vmatprep.subr.bf16.mxu0 %v8574_v52 }
 0x337   : > { %4416 = vmatpush1.bf16.xpose.msra.mxu1 %v8575_v5 }
 0x338   : > { %4418 = vmatprep.subr.bf16.mxu1 %v8576_v13 }
 0x33a   : > { %4800 = vmatpush1.bf16.xpose.msra.mxu0 %v8577_v63 }
 0x33b   : > { %4802 = vmatprep.subr.bf16.mxu0 %v8578_v58 }
 0x33f   : > { %4420 = vmatpush1.bf16.xpose.msra.mxu1 %v8579_v37 }
 0x340   : > { %4422 = vmatprep.subr.bf16.mxu1 %v8580_v6 }
 0x342   : > { %4804 = vmatpush1.bf16.xpose.msra.mxu0 %v8581_v29 }
 0x343   : > { %4806 = vmatprep.subr.bf16.mxu0 %v8582_v33 }
 0x347   : > { %4424 = vmatpush1.bf16.xpose.msra.mxu1 %v8583_v18 }
 0x348   : > { %4426 = vmatprep.subr.bf16.mxu1 %v8584_v23 }
 0x34a   : > { %4808 = vmatpush1.bf16.xpose.msra.mxu0 %v8585_v11 }
 0x34b   : > { %4810 = vmatprep.subr.bf16.mxu0 %v8586_v39 }
 0x34f   : > { %4428 = vmatpush1.bf16.xpose.msra.mxu1 %v8587_v32 }
 0x350   : > { %4430 = vmatprep.subr.bf16.mxu1 %v8588_v59 }
 0x352   : > { %4812 = vmatpush1.bf16.xpose.msra.mxu0 %v8589_v19 }
 0x353   : > { %4814 = vmatprep.subr.bf16.mxu0 %v8590_v57 }
 0x357   : > { %4432 = vmatpush1.bf16.xpose.msra.mxu1 %v8591_v56 }
 0x358   : > { %4434 = vmatprep.subr.bf16.mxu1 %v8592_v21 }
 0x35a   : > { %4816 = vmatpush1.bf16.xpose.msra.mxu0 %v8593_v20 }
 0x35b   : > { %4818 = vmatprep.subr.bf16.mxu0 %v8594_v17 }
 0x35f   : > { %4436 = vmatpush1.bf16.xpose.msra.mxu1 %v8595_v44 }
 0x360   : > { %4438 = vmatprep.subr.bf16.mxu1 %v8596_v27 }
 0x362   : > { %4820 = vmatpush1.bf16.xpose.msra.mxu0 %v8597_v34 }
 0x363   : > { %4822 = vmatprep.subr.bf16.mxu0 %v8598_v25 }
 0x367   : > { %4440 = vmatpush1.bf16.xpose.msra.mxu1 %v8492_v14 }
 0x36a   : > { %4824 = vmatpush1.bf16.xpose.msra.mxu0 %v8495_v49 }
 0x36e   : > { %2256 = vmatmul.mubr.f32.vlgmr.msra.gmra.mrb[0].mxu1 %v8370_v36 }
 0x371   : > { %3928 = vmatmul.mubr.f32.vlgmr.msra.gmra.mrb[0].mxu0 %v8370_v36 }
 0x441   : > { %v2257_v46 = vpop.f32.mrb[0].mxu1 }
 0x442   : > { %v2259_v55 = vpop.f32.mrb[1].mxu1 }
 0x444   : > { %v3929_v0 = vpop.f32.mrb[0].mxu0 }
 0x445   : > { %v4825_v48 = vadd.f32 %v3929_v0, %v2257_v46  ;;  %v3931_v54 = vpop.f32.mrb[1].mxu0 }
 0x447   : > { %3933 = vst [vmem:[%s202_s5] sm:$0x1] %v4825_v48 }
 0x448   : > { %4998 = shalt.err (!%p4995_p11)
}
 0x449   : > { %s4999_s7 = scalar_lea.hbm %s7460_s28, 16  ;;  %s5003_s30 = scalar_lea.hbm %s7506_s2, 32 }
 0x44a   : > { %p5000_p3 = scmp.ne.s32.totalorder %s7460_s28, %s4999_s7  ;;  %p5004_p2 = scmp.lt.u32.totalorder %s7460_s28, %s7506_s2 }
 0x44b   : > { %p5005_p4 = scmp.lt.u32.totalorder %s5003_s30, %s4999_s7  ;;  %p5007_p13 = scmp.lt.u32.totalorder %s4999_s7, %s7460_s28 }
 0x44c   : > { %p5001_p8 = pnand %p5000_p3, %p8599_p1 }
 0x44d   : > { %p5006_p6 = por %p5005_p4, %p5004_p2 }
 0x44e   : > { %p5002_p0 = pneg %p5001_p8 }
 0x44f   : > { %p5008_p12 = por %p5007_p13, %p5006_p6 }
 0x451   : > { %p5009_p10 = pnand %p5008_p12, %p5002_p0 }
 0x453   : > { %5012 = shalt.err (!%p5009_p10)
}
 0x454   : > { %4874 = dma.vmem_to_hbm [thread:$0]  (%p8599_p1), %s7462_s6, 16, %s7460_s28, %s3935_s24  }
 0x455 PF: > { %s3959_s3 = sand.u32 1, %s5043_s9   ;;  %p8600_p5 = scmp.ne.s32.totalorder %s7919_s22, 0 }
 0x456   : > { %p8601_p7 = scmp.ge.s32.totalorder %s5055_s12, 2  ;;  %s3960_s23 = scalar_lea.sflag [#allocation4], %s3959_s3 }
 0x458   : > { %p4884_p9 = pnand %p8601_p7, %p8600_p5 }
 0x45a   : > { %5038 = dma.done.wait (!%p4884_p9), %s3960_s23, 16  }
 0x45b   : > { %5040 = vsyncadd (!%p4884_p9), %s3960_s23, 4294967280  ;;  %p18_p11 = scmp.ge.s32.totalorder %s5104_s15, 4   ;;  %s8602_s9 = smov %s5047_s10 }
 0x45c   : > { %s8603_s10 = smov %s5051_s11  ;;  %s8604_s11 = smov %s5116_s18 }
 0x45d   : > { %s8605_s12 = smov %s5104_s15  ;;  %20 = sbr.rel (!%p18_p11) target bundleno = 7 (0x7), region = 86 }
 0x464   :  { %3964 = vsyncpa [#allocation3], 1 }
 0x465   :  { %3966 = vsyncpa [#allocation3 + $0x1], 1 }
 0x466   :  { %3967 = vsyncpa [#allocation6], 1 }
 0x467   :  { %3969 = vsyncpa [#allocation6 + $0x1], 1 }
 0x468   :  { %3970 = vsyncpa [#allocation4], 1 }
 0x469   :  { %3972 = vsyncpa [#allocation4 + $0x1], 1 }

</bundles_post_ra>
